<compile_context>
chip_gen: v7x
topology: tpu7x:2x2x1
jax: 0.10.0
libtpu: 0.0.40
codegen_flags: <defaults>
</compile_context>

<pallas_src>
import jax
import jax.numpy as jnp
from jax import lax
from jax.experimental import pallas as pl
from jax.experimental.pallas import tpu as pltpu

LANE = 128


def resblock_kernel(x_ref, w1_ref, b1_ref, w2_ref, b2_ref, w3_ref, b3_ref,
                    o_ref, pad2):
    # x_ref block: (1, H+2, W+2, Cp) -- spatial halo + channel padding done in wrapper.
    _, Hp2, Wp2, Cp = x_ref.shape
    H, W = Hp2 - 2, Wp2 - 2

    xp = x_ref[0]  # (H+2, W+2, Cp) float32

    def im2col3x3(src):
        # src: (H+2, W+2, Cp) value or ref -> (H*W, 9*Cp), tap-major, channel fastest.
        return jnp.concatenate(
            [src[dh:dh + H, dw:dw + W, :].reshape(H * W, Cp)
             for dh in range(3) for dw in range(3)],
            axis=-1)

    # ---- conv1: 3x3 (input pre-padded in wrapper) -> bias -> ReLU ----
    a1 = jnp.dot(im2col3x3(xp).astype(jnp.bfloat16), w1_ref[...],
                 preferred_element_type=jnp.float32)          # (H*W, Cp) f32
    h1 = jnp.maximum(a1 + b1_ref[...], 0.0)

    # ---- conv2: write activation into persistent padded scratch ----
    # Zero only the 1-pixel halo (cheap); interior is fully overwritten each step.
    zr = jnp.zeros((1, W + 2, Cp), jnp.float32)
    pad2[0:1, :, :] = zr
    pad2[H + 1:H + 2, :, :] = zr
    zc = jnp.zeros((H, 1, Cp), jnp.float32)
    pad2[1:H + 1, 0:1, :] = zc
    pad2[1:H + 1, W + 1:W + 2, :] = zc
    pad2[1:H + 1, 1:W + 1, :] = h1.reshape(H, W, Cp)

    a2 = jnp.dot(im2col3x3(pad2).astype(jnp.bfloat16), w2_ref[...],
                 preferred_element_type=jnp.float32)          # (H*W, Cp) f32
    h2 = jnp.maximum(a2 + b2_ref[...], 0.0)

    # ---- conv3: 1x1 + residual, fused on the (H*W, Cp) activation ----
    y = jnp.dot(h2.astype(jnp.bfloat16), w3_ref[...],
                preferred_element_type=jnp.float32) + b3_ref[...]
    res = xp[1:H + 1, 1:W + 1, :].reshape(H * W, Cp)          # residual in f32
    o_ref[0] = (y + res).reshape(H, W, Cp).astype(o_ref.dtype)


def resblock_pallas(x_nchw, w1, b1, w2, b2, w3, b3):
    """x_nchw: (N, C, H, W).  Weights in kernel layout:
       w1, w2: (3, 3, Cin, Cout);  w3: (Cin, Cout);  biases: (C,)."""
    N, C, H, W = x_nchw.shape
    Cp = ((C + LANE - 1) // LANE) * LANE  # lane-dense channel dim

    # NHWC, pad channels to Cp and add 1-pixel spatial zero halo (conv1 "SAME" padding).
    x = jnp.transpose(x_nchw, (0, 2, 3, 1)).astype(jnp.float32)
    x = jnp.pad(x, ((0, 0), (1, 1), (1, 1), (0, Cp - C)))      # (N, H+2, W+2, Cp)

    def pad_w3x3(w):  # (3,3,C,C) -> (9*Cp, Cp) bf16, tap-major / cin fastest
        wp = jnp.zeros((3, 3, Cp, Cp), jnp.float32).at[:, :, :C, :C].set(
            w.astype(jnp.float32))
        return wp.reshape(9 * Cp, Cp).astype(jnp.bfloat16)

    def pad_b(b):     # (C,) -> (1, Cp) f32
        return jnp.pad(b.astype(jnp.float32), (0, Cp - C)).reshape(1, Cp)

    w1p = pad_w3x3(w1)
    w2p = pad_w3x3(w2)
    w3p = jnp.zeros((Cp, Cp), jnp.float32).at[:C, :C].set(
        w3.astype(jnp.float32)).astype(jnp.bfloat16)
    b1p, b2p, b3p = pad_b(b1), pad_b(b2), pad_b(b3)

    out_nhwc = pl.pallas_call(
        resblock_kernel,
        out_shape=jax.ShapeDtypeStruct((N, H, W, Cp), jnp.float32),
        grid_spec=pltpu.PrefetchScalarGridSpec(
            num_scalar_prefetch=0,
            grid=(N,),
            in_specs=[
                pl.BlockSpec((1, H + 2, W + 2, Cp), lambda n: (n, 0, 0, 0)),  # x (padded)
                pl.BlockSpec((9 * Cp, Cp), lambda n: (0, 0)),                 # w1 (im2col)
                pl.BlockSpec((1, Cp), lambda n: (0, 0)),                      # b1
                pl.BlockSpec((9 * Cp, Cp), lambda n: (0, 0)),                 # w2 (im2col)
                pl.BlockSpec((1, Cp), lambda n: (0, 0)),                      # b2
                pl.BlockSpec((Cp, Cp), lambda n: (0, 0)),                     # w3 (1x1)
                pl.BlockSpec((1, Cp), lambda n: (0, 0)),                      # b3
            ],
            out_specs=pl.BlockSpec((1, H, W, Cp), lambda n: (n, 0, 0, 0)),
            scratch_shapes=[
                pltpu.VMEM((H + 2, W + 2, Cp), jnp.float32),  # conv2 padded activation
            ],
        ),
        compiler_params=pltpu.CompilerParams(
            dimension_semantics=("parallel",)),
    )(x, w1p, b1p, w2p, b2p, w3p, b3p)

    # Drop channel padding, back to NCHW to match PyTorch semantics.
    return jnp.transpose(out_nhwc[..., :C], (0, 3, 1, 2))


def resblock_reference(x_nchw, w1, b1, w2, b2, w3, b3):
    """Pure-JAX reference matching the PyTorch module, with conv inputs/weights rounded
    to bf16 (f32 accumulation) to mirror the kernel's deliberate MXU-precision choice."""
    x = jnp.transpose(x_nchw, (0, 2, 3, 1)).astype(jnp.float32)
    dn = ('NHWC', 'HWIO', 'NHWC')

    def conv(a, w, b):
        y = lax.conv_general_dilated(
            a.astype(jnp.bfloat16), w.astype(jnp.bfloat16), (1, 1), 'SAME',
            dimension_numbers=dn, preferred_element_type=jnp.float32)
        return y + b.reshape(1, 1, 1, -1).astype(jnp.float32)

    h = jax.nn.relu(conv(x, w1, b1))
    h = jax.nn.relu(conv(h, w2, b2))
    C = x.shape[-1]
    y = conv(h, w3.reshape(1, 1, C, C), b3)
    return jnp.transpose(y + x, (0, 3, 1, 2))


if __name__ == "__main__":
    N, C, H, W = 2, 4, 16, 16
    key = jax.random.PRNGKey(0)
    kx, k1, k2, k3, k4, k5, k6 = jax.random.split(key, 7)

    x = jax.random.normal(kx, (N, C, H, W), jnp.float32)

    # PyTorch Conv2d weight layout is (out, in, kh, kw); convert 3x3 weights to
    # (kh, kw, in, out) and the 1x1 to (in, out) for the kernel/reference.
    w1_pt = jax.random.normal(k1, (C, C, 3, 3), jnp.float32) * 0.2
    b1 = jax.random.normal(k2, (C,), jnp.float32) * 0.1
    w2_pt = jax.random.normal(k3, (C, C, 3, 3), jnp.float32) * 0.2
    b2 = jax.random.normal(k4, (C,), jnp.float32) * 0.1
    w3_pt = jax.random.normal(k5, (C, C, 1, 1), jnp.float32) * 0.2
    b3 = jax.random.normal(k6, (C,), jnp.float32) * 0.1

    w1 = jnp.transpose(w1_pt, (2, 3, 1, 0))
    w2 = jnp.transpose(w2_pt, (2, 3, 1, 0))
    w3 = jnp.transpose(w3_pt[:, :, 0, 0], (1, 0))

    out = jax.block_until_ready(resblock_pallas(x, w1, b1, w2, b2, w3, b3))

    ref = resblock_reference(x, w1, b1, w2, b2, w3, b3)
    assert out.shape == (N, C, H, W)
    assert jnp.allclose(out, ref, rtol=2e-3, atol=2e-3), "mismatch vs reference"

    print("KERNEL_OK")
</pallas_src>

<mosaic_0001>
module attributes {stable_mosaic.version = 11 : i64} {
  func.func @resblock_kernel(%arg0: i32, %arg1: memref<1x18x18x128xf32, #tpu.memory_space<vmem>>, %arg2: memref<1152x128xbf16, #tpu.memory_space<vmem>>, %arg3: memref<1x128xf32, #tpu.memory_space<vmem>>, %arg4: memref<1152x128xbf16, #tpu.memory_space<vmem>>, %arg5: memref<1x128xf32, #tpu.memory_space<vmem>>, %arg6: memref<128x128xbf16, #tpu.memory_space<vmem>>, %arg7: memref<1x128xf32, #tpu.memory_space<vmem>>, %arg8: memref<1x16x16x128xf32, #tpu.memory_space<vmem>>, %arg9: memref<18x18x128xf32, #tpu.memory_space<vmem>>) attributes {dimension_semantics = [#tpu.dimension_semantics<parallel>], iteration_bounds = array<i64: 2>, scalar_prefetch = 0 : i64, scratch_operands = 1 : i64, tpu.core_type = #tpu.core_type<tc>, window_params = [{transform_indices = @transform_0, window_bounds = array<i64: 1, 18, 18, 128>}, {pipeline_mode = #tpu.pipeline_mode<synchronous>, transform_indices = @transform_1, window_bounds = array<i64: 1152, 128>}, {pipeline_mode = #tpu.pipeline_mode<synchronous>, transform_indices = @transform_2, window_bounds = array<i64: 1, 128>}, {pipeline_mode = #tpu.pipeline_mode<synchronous>, transform_indices = @transform_3, window_bounds = array<i64: 1152, 128>}, {pipeline_mode = #tpu.pipeline_mode<synchronous>, transform_indices = @transform_4, window_bounds = array<i64: 1, 128>}, {pipeline_mode = #tpu.pipeline_mode<synchronous>, transform_indices = @transform_5, window_bounds = array<i64: 128, 128>}, {pipeline_mode = #tpu.pipeline_mode<synchronous>, transform_indices = @transform_6, window_bounds = array<i64: 1, 128>}, {transform_indices = @transform_7, window_bounds = array<i64: 1, 16, 16, 128>}]} {
    %c0 = arith.constant 0 : index
    %c0_0 = arith.constant 0 : index
    %c0_1 = arith.constant 0 : index
    %c0_2 = arith.constant 0 : index
    %0 = vector.load %arg1[%c0, %c0_0, %c0_1, %c0_2] : memref<1x18x18x128xf32, #tpu.memory_space<vmem>>, vector<1x18x18x128xf32>
    %1 = vector.shape_cast %0 : vector<1x18x18x128xf32> to vector<18x18x128xf32>
    %2 = vector.extract_strided_slice %1 {offsets = [0, 0, 0], sizes = [16, 16, 128], strides = [1, 1, 1]} : vector<18x18x128xf32> to vector<16x16x128xf32>
    %3 = vector.shape_cast %2 : vector<16x16x128xf32> to vector<256x128xf32>
    %4 = vector.extract_strided_slice %1 {offsets = [0, 1, 0], sizes = [16, 16, 128], strides = [1, 1, 1]} : vector<18x18x128xf32> to vector<16x16x128xf32>
    %5 = vector.shape_cast %4 : vector<16x16x128xf32> to vector<256x128xf32>
    %6 = vector.extract_strided_slice %1 {offsets = [0, 2, 0], sizes = [16, 16, 128], strides = [1, 1, 1]} : vector<18x18x128xf32> to vector<16x16x128xf32>
    %7 = vector.shape_cast %6 : vector<16x16x128xf32> to vector<256x128xf32>
    %8 = vector.extract_strided_slice %1 {offsets = [1, 0, 0], sizes = [16, 16, 128], strides = [1, 1, 1]} : vector<18x18x128xf32> to vector<16x16x128xf32>
    %9 = vector.shape_cast %8 : vector<16x16x128xf32> to vector<256x128xf32>
    %10 = vector.extract_strided_slice %1 {offsets = [1, 1, 0], sizes = [16, 16, 128], strides = [1, 1, 1]} : vector<18x18x128xf32> to vector<16x16x128xf32>
    %11 = vector.shape_cast %10 : vector<16x16x128xf32> to vector<256x128xf32>
    %12 = vector.extract_strided_slice %1 {offsets = [1, 2, 0], sizes = [16, 16, 128], strides = [1, 1, 1]} : vector<18x18x128xf32> to vector<16x16x128xf32>
    %13 = vector.shape_cast %12 : vector<16x16x128xf32> to vector<256x128xf32>
    %14 = vector.extract_strided_slice %1 {offsets = [2, 0, 0], sizes = [16, 16, 128], strides = [1, 1, 1]} : vector<18x18x128xf32> to vector<16x16x128xf32>
    %15 = vector.shape_cast %14 : vector<16x16x128xf32> to vector<256x128xf32>
    %16 = vector.extract_strided_slice %1 {offsets = [2, 1, 0], sizes = [16, 16, 128], strides = [1, 1, 1]} : vector<18x18x128xf32> to vector<16x16x128xf32>
    %17 = vector.shape_cast %16 : vector<16x16x128xf32> to vector<256x128xf32>
    %18 = vector.extract_strided_slice %1 {offsets = [2, 2, 0], sizes = [16, 16, 128], strides = [1, 1, 1]} : vector<18x18x128xf32> to vector<16x16x128xf32>
    %19 = vector.shape_cast %18 : vector<16x16x128xf32> to vector<256x128xf32>
    %20 = tpu.concatenate %3, %5, %7, %9, %11, %13, %15, %17, %19 in 1 : vector<256x128xf32>, vector<256x128xf32>, vector<256x128xf32>, vector<256x128xf32>, vector<256x128xf32>, vector<256x128xf32>, vector<256x128xf32>, vector<256x128xf32>, vector<256x128xf32> -> vector<256x1152xf32>
    %21 = arith.truncf %20 : vector<256x1152xf32> to vector<256x1152xbf16>
    %c0_3 = arith.constant 0 : index
    %c0_4 = arith.constant 0 : index
    %22 = vector.load %arg2[%c0_3, %c0_4] : memref<1152x128xbf16, #tpu.memory_space<vmem>>, vector<1152x128xbf16>
    %cst = arith.constant dense<0.000000e+00> : vector<256x128xf32>
    %23 = tpu.matmul %21, %22, %cst {dimension_numbers = #tpu.dot_dimension_numbers<[1], [0], [0], [1], [0, 0, 1, 1], [], []>} : vector<256x1152xbf16>, vector<1152x128xbf16>, vector<256x128xf32> -> vector<256x128xf32>
    %c0_5 = arith.constant 0 : index
    %c0_6 = arith.constant 0 : index
    %24 = vector.load %arg3[%c0_5, %c0_6] : memref<1x128xf32, #tpu.memory_space<vmem>>, vector<1x128xf32>
    %25 = vector.broadcast %24 : vector<1x128xf32> to vector<256x128xf32>
    %26 = arith.addf %23, %25 : vector<256x128xf32>
    %cst_7 = arith.constant 0.000000e+00 : f32
    %27 = vector.broadcast %cst_7 : f32 to vector<256x128xf32>
    %28 = arith.maximumf %26, %27 : vector<256x128xf32>
    %cst_8 = arith.constant 0.000000e+00 : f32
    %29 = vector.broadcast %cst_8 : f32 to vector<1x18x128xf32>
    %c0_9 = arith.constant 0 : index
    %c0_10 = arith.constant 0 : index
    %c0_11 = arith.constant 0 : index
    %30 = vector.load %arg9[%c0_9, %c0_10, %c0_11] : memref<18x18x128xf32, #tpu.memory_space<vmem>>, vector<1x18x128xf32>
    tpu.vector_store %arg9[%c0_9, %c0_10, %c0_11], %29 {strides = array<i32>} : memref<18x18x128xf32, #tpu.memory_space<vmem>>, vector<1x18x128xf32>,
    %c17 = arith.constant 17 : index
    %c0_12 = arith.constant 0 : index
    %c0_13 = arith.constant 0 : index
    %31 = vector.load %arg9[%c17, %c0_12, %c0_13] : memref<18x18x128xf32, #tpu.memory_space<vmem>>, vector<1x18x128xf32>
    tpu.vector_store %arg9[%c17, %c0_12, %c0_13], %29 {strides = array<i32>} : memref<18x18x128xf32, #tpu.memory_space<vmem>>, vector<1x18x128xf32>,
    %cst_14 = arith.constant 0.000000e+00 : f32
    %32 = vector.broadcast %cst_14 : f32 to vector<16x1x128xf32>
    %c1 = arith.constant 1 : index
    %c0_15 = arith.constant 0 : index
    %c0_16 = arith.constant 0 : index
    %33 = vector.load %arg9[%c1, %c0_15, %c0_16] : memref<18x18x128xf32, #tpu.memory_space<vmem>>, vector<16x1x128xf32>
    tpu.vector_store %arg9[%c1, %c0_15, %c0_16], %32 {strides = array<i32>} : memref<18x18x128xf32, #tpu.memory_space<vmem>>, vector<16x1x128xf32>,
    %c1_17 = arith.constant 1 : index
    %c17_18 = arith.constant 17 : index
    %c0_19 = arith.constant 0 : index
    %34 = vector.load %arg9[%c1_17, %c17_18, %c0_19] : memref<18x18x128xf32, #tpu.memory_space<vmem>>, vector<16x1x128xf32>
    tpu.vector_store %arg9[%c1_17, %c17_18, %c0_19], %32 {strides = array<i32>} : memref<18x18x128xf32, #tpu.memory_space<vmem>>, vector<16x1x128xf32>,
    %35 = vector.shape_cast %28 : vector<256x128xf32> to vector<16x16x128xf32>
    %c1_20 = arith.constant 1 : index
    %c1_21 = arith.constant 1 : index
    %c0_22 = arith.constant 0 : index
    %36 = vector.load %arg9[%c1_20, %c1_21, %c0_22] : memref<18x18x128xf32, #tpu.memory_space<vmem>>, vector<16x16x128xf32>
    tpu.vector_store %arg9[%c1_20, %c1_21, %c0_22], %35 {strides = array<i32>} : memref<18x18x128xf32, #tpu.memory_space<vmem>>, vector<16x16x128xf32>,
    %c0_23 = arith.constant 0 : index
    %c0_24 = arith.constant 0 : index
    %c0_25 = arith.constant 0 : index
    %37 = vector.load %arg9[%c0_23, %c0_24, %c0_25] : memref<18x18x128xf32, #tpu.memory_space<vmem>>, vector<16x16x128xf32>
    %38 = vector.shape_cast %37 : vector<16x16x128xf32> to vector<256x128xf32>
    %c0_26 = arith.constant 0 : index
    %c1_27 = arith.constant 1 : index
    %c0_28 = arith.constant 0 : index
    %39 = vector.load %arg9[%c0_26, %c1_27, %c0_28] : memref<18x18x128xf32, #tpu.memory_space<vmem>>, vector<16x16x128xf32>
    %40 = vector.shape_cast %39 : vector<16x16x128xf32> to vector<256x128xf32>
    %c0_29 = arith.constant 0 : index
    %c2 = arith.constant 2 : index
    %c0_30 = arith.constant 0 : index
    %41 = vector.load %arg9[%c0_29, %c2, %c0_30] : memref<18x18x128xf32, #tpu.memory_space<vmem>>, vector<16x16x128xf32>
    %42 = vector.shape_cast %41 : vector<16x16x128xf32> to vector<256x128xf32>
    %c1_31 = arith.constant 1 : index
    %c0_32 = arith.constant 0 : index
    %c0_33 = arith.constant 0 : index
    %43 = vector.load %arg9[%c1_31, %c0_32, %c0_33] : memref<18x18x128xf32, #tpu.memory_space<vmem>>, vector<16x16x128xf32>
    %44 = vector.shape_cast %43 : vector<16x16x128xf32> to vector<256x128xf32>
    %c1_34 = arith.constant 1 : index
    %c1_35 = arith.constant 1 : index
    %c0_36 = arith.constant 0 : index
    %45 = vector.load %arg9[%c1_34, %c1_35, %c0_36] : memref<18x18x128xf32, #tpu.memory_space<vmem>>, vector<16x16x128xf32>
    %46 = vector.shape_cast %45 : vector<16x16x128xf32> to vector<256x128xf32>
    %c1_37 = arith.constant 1 : index
    %c2_38 = arith.constant 2 : index
    %c0_39 = arith.constant 0 : index
    %47 = vector.load %arg9[%c1_37, %c2_38, %c0_39] : memref<18x18x128xf32, #tpu.memory_space<vmem>>, vector<16x16x128xf32>
    %48 = vector.shape_cast %47 : vector<16x16x128xf32> to vector<256x128xf32>
    %c2_40 = arith.constant 2 : index
    %c0_41 = arith.constant 0 : index
    %c0_42 = arith.constant 0 : index
    %49 = vector.load %arg9[%c2_40, %c0_41, %c0_42] : memref<18x18x128xf32, #tpu.memory_space<vmem>>, vector<16x16x128xf32>
    %50 = vector.shape_cast %49 : vector<16x16x128xf32> to vector<256x128xf32>
    %c2_43 = arith.constant 2 : index
    %c1_44 = arith.constant 1 : index
    %c0_45 = arith.constant 0 : index
    %51 = vector.load %arg9[%c2_43, %c1_44, %c0_45] : memref<18x18x128xf32, #tpu.memory_space<vmem>>, vector<16x16x128xf32>
    %52 = vector.shape_cast %51 : vector<16x16x128xf32> to vector<256x128xf32>
    %c2_46 = arith.constant 2 : index
    %c2_47 = arith.constant 2 : index
    %c0_48 = arith.constant 0 : index
    %53 = vector.load %arg9[%c2_46, %c2_47, %c0_48] : memref<18x18x128xf32, #tpu.memory_space<vmem>>, vector<16x16x128xf32>
    %54 = vector.shape_cast %53 : vector<16x16x128xf32> to vector<256x128xf32>
    %55 = tpu.concatenate %38, %40, %42, %44, %46, %48, %50, %52, %54 in 1 : vector<256x128xf32>, vector<256x128xf32>, vector<256x128xf32>, vector<256x128xf32>, vector<256x128xf32>, vector<256x128xf32>, vector<256x128xf32>, vector<256x128xf32>, vector<256x128xf32> -> vector<256x1152xf32>
    %56 = arith.truncf %55 : vector<256x1152xf32> to vector<256x1152xbf16>
    %c0_49 = arith.constant 0 : index
    %c0_50 = arith.constant 0 : index
    %57 = vector.load %arg4[%c0_49, %c0_50] : memref<1152x128xbf16, #tpu.memory_space<vmem>>, vector<1152x128xbf16>
    %cst_51 = arith.constant dense<0.000000e+00> : vector<256x128xf32>
    %58 = tpu.matmul %56, %57, %cst_51 {dimension_numbers = #tpu.dot_dimension_numbers<[1], [0], [0], [1], [0, 0, 1, 1], [], []>} : vector<256x1152xbf16>, vector<1152x128xbf16>, vector<256x128xf32> -> vector<256x128xf32>
    %c0_52 = arith.constant 0 : index
    %c0_53 = arith.constant 0 : index
    %59 = vector.load %arg5[%c0_52, %c0_53] : memref<1x128xf32, #tpu.memory_space<vmem>>, vector<1x128xf32>
    %60 = vector.broadcast %59 : vector<1x128xf32> to vector<256x128xf32>
    %61 = arith.addf %58, %60 : vector<256x128xf32>
    %cst_54 = arith.constant 0.000000e+00 : f32
    %62 = vector.broadcast %cst_54 : f32 to vector<256x128xf32>
    %63 = arith.maximumf %61, %62 : vector<256x128xf32>
    %64 = arith.truncf %63 : vector<256x128xf32> to vector<256x128xbf16>
    %c0_55 = arith.constant 0 : index
    %c0_56 = arith.constant 0 : index
    %65 = vector.load %arg6[%c0_55, %c0_56] : memref<128x128xbf16, #tpu.memory_space<vmem>>, vector<128x128xbf16>
    %cst_57 = arith.constant dense<0.000000e+00> : vector<256x128xf32>
    %66 = tpu.matmul %64, %65, %cst_57 {dimension_numbers = #tpu.dot_dimension_numbers<[1], [0], [0], [1], [0, 0, 1, 1], [], []>} : vector<256x128xbf16>, vector<128x128xbf16>, vector<256x128xf32> -> vector<256x128xf32>
    %c0_58 = arith.constant 0 : index
    %c0_59 = arith.constant 0 : index
    %67 = vector.load %arg7[%c0_58, %c0_59] : memref<1x128xf32, #tpu.memory_space<vmem>>, vector<1x128xf32>
    %68 = vector.broadcast %67 : vector<1x128xf32> to vector<256x128xf32>
    %69 = arith.addf %66, %68 : vector<256x128xf32>
    %70 = vector.extract_strided_slice %1 {offsets = [1, 1, 0], sizes = [16, 16, 128], strides = [1, 1, 1]} : vector<18x18x128xf32> to vector<16x16x128xf32>
    %71 = vector.shape_cast %70 : vector<16x16x128xf32> to vector<256x128xf32>
    %72 = arith.addf %69, %71 : vector<256x128xf32>
    %73 = vector.shape_cast %72 : vector<256x128xf32> to vector<16x16x128xf32>
    %c0_60 = arith.constant 0 : index
    %c0_61 = arith.constant 0 : index
    %c0_62 = arith.constant 0 : index
    %c0_63 = arith.constant 0 : index
    %74 = vector.load %arg8[%c0_60, %c0_61, %c0_62, %c0_63] : memref<1x16x16x128xf32, #tpu.memory_space<vmem>>, vector<1x16x16x128xf32>
    %75 = vector.shape_cast %74 : vector<1x16x16x128xf32> to vector<16x16x128xf32>
    %76 = vector.shape_cast %73 : vector<16x16x128xf32> to vector<1x16x16x128xf32>
    tpu.vector_store %arg8[%c0_60, %c0_61, %c0_62, %c0_63], %76 {strides = array<i32>} : memref<1x16x16x128xf32, #tpu.memory_space<vmem>>, vector<1x16x16x128xf32>,
    return
  }
  func.func @transform_0(%arg0: i32) -> (i32, i32, i32, i32) {
    %c0_i32 = arith.constant 0 : i32
    %c0_i32_0 = arith.constant 0 : i32
    %c0_i32_1 = arith.constant 0 : i32
    %c0_i32_2 = arith.constant 0 : i32
    return %arg0, %c0_i32, %c0_i32_0, %c0_i32_1 : i32, i32, i32, i32
  }
  func.func @transform_1(%arg0: i32) -> (i32, i32) {
    %c0_i32 = arith.constant 0 : i32
    %c0_i32_0 = arith.constant 0 : i32
    %c0_i32_1 = arith.constant 0 : i32
    return %c0_i32, %c0_i32_0 : i32, i32
  }
  func.func @transform_2(%arg0: i32) -> (i32, i32) {
    %c0_i32 = arith.constant 0 : i32
    %c0_i32_0 = arith.constant 0 : i32
    %c0_i32_1 = arith.constant 0 : i32
    return %c0_i32, %c0_i32_0 : i32, i32
  }
  func.func @transform_3(%arg0: i32) -> (i32, i32) {
    %c0_i32 = arith.constant 0 : i32
    %c0_i32_0 = arith.constant 0 : i32
    %c0_i32_1 = arith.constant 0 : i32
    return %c0_i32, %c0_i32_0 : i32, i32
  }
  func.func @transform_4(%arg0: i32) -> (i32, i32) {
    %c0_i32 = arith.constant 0 : i32
    %c0_i32_0 = arith.constant 0 : i32
    %c0_i32_1 = arith.constant 0 : i32
    return %c0_i32, %c0_i32_0 : i32, i32
  }
  func.func @transform_5(%arg0: i32) -> (i32, i32) {
    %c0_i32 = arith.constant 0 : i32
    %c0_i32_0 = arith.constant 0 : i32
    %c0_i32_1 = arith.constant 0 : i32
    return %c0_i32, %c0_i32_0 : i32, i32
  }
  func.func @transform_6(%arg0: i32) -> (i32, i32) {
    %c0_i32 = arith.constant 0 : i32
    %c0_i32_0 = arith.constant 0 : i32
    %c0_i32_1 = arith.constant 0 : i32
    return %c0_i32, %c0_i32_0 : i32, i32
  }
  func.func @transform_7(%arg0: i32) -> (i32, i32, i32, i32) {
    %c0_i32 = arith.constant 0 : i32
    %c0_i32_0 = arith.constant 0 : i32
    %c0_i32_1 = arith.constant 0 : i32
    %c0_i32_2 = arith.constant 0 : i32
    return %arg0, %c0_i32, %c0_i32_0, %c0_i32_1 : i32, i32, i32, i32
  }
}

</mosaic_0001>

<bundles_post_ra>
// kernel: tpu_custom_call.1
= control target key start
LH: loop header
LB: loop body
LE: loop exit
PB: predicated region body
PF: predicated region fallthrough
CT: control target
= control target key end

     0   :  { %12 = vsyncpa [#allocation4], 0  ;;  %s8266_s0 = inlined_call_operand.vmem [shape: f32[2,18,18,128], index: 0, kind: input, shape index: {}]   ;;  %s8267_s1 = inlined_call_operand.vmem [shape: bf16[1152,128], index: 1, kind: input, shape index: {}]   ;;  %s8268_s2 = inlined_call_operand.vmem [shape: f32[1,128], index: 2, kind: input, shape index: {}]   ;;  %s8269_s3 = inlined_call_operand.vmem [shape: bf16[1152,128], index: 3, kind: input, shape index: {}]   ;;  %s8270_s4 = inlined_call_operand.vmem [shape: f32[1,128], index: 4, kind: input, shape index: {}]   ;;  %s8271_s5 = inlined_call_operand.vmem [shape: bf16[128,128], index: 5, kind: input, shape index: {}]   ;;  %s8272_s6 = inlined_call_operand.vmem [shape: f32[1,128], index: 6, kind: input, shape index: {}]   ;;  %s8273_s7 = inlined_call_operand.hbm [shape: f32[2,16,16,128], index: 7, kind: output, shape index: {}]  }
   0x1   :  { %14 = vsyncpa [#allocation4 + $0x1], 0  ;;  %s6027_s24 = smov 0   ;;  %s6029_s25 = smov 0  }
   0x2   :  { %s6031_s26 = smov 0   ;;  %s6033_s27 = smov 0  }
   0x3 LB: > { %s6048_s28 = sadd.s32 4294967295, %s5980_s27   ;;  %s4427_s29 = sadd.s32 4294967294, %s5980_s27   ;;  %s5980_s27 = sphi %s6033_s27, %s8413_s27   ;;  %s5976_s26 = sphi %s6031_s26, %s8412_s26   ;;  %s5972_s25 = sphi %s6029_s25, %s8411_s25   ;;  %s5968_s24 = sphi %s6027_s24, %s8410_s24  }
   0x4   : > { %s6052_s30 = sadd.s32 1, %s5980_s27   ;;  %s179_s8 = sadd.s32 1, %s5976_s26 }
   0x5   : > { %s176_s9 = ssub.s32 %s5980_s27, %s6052_s30  ;;  %p189_p0 = scmp.ne.s32.totalorder %s5976_s26, %s5972_s25 }
   0x6   : > { %p177_p1 = scmp.eq.s32.totalorder %s176_s9, 0  ;;  %p190_p2 = scmp.eq.s32.totalorder %s6048_s28, 1 }
   0x7   : > { %p195_p3 = scmp.ne.s32.totalorder %s5972_s25, %s5968_s24  ;;  %p196_p4 = scmp.eq.s32.totalorder %s4427_s29, 1 }
   0x8   : > { %s6063_s10 = scalar_select %p177_p1, %s5976_s26, %s179_s8  }
   0x9   : > { %p6065_p5 = por %p190_p2, %p189_p0  ;;  %p6069_p6 = por %p196_p4, %p195_p3 }
   0xa   : > { %p4430_p7 = scmp.ge.s32.totalorder %s5980_s27, 1  ;;  %p240_p8 = scmp.lt.s32.totalorder %s5980_s27, 3 }
   0xc   : > { %p241_p9 = pnand %p4430_p7, %p240_p8 }
   0xe   : > { %244 = sbr.rel (%p241_p9) target bundleno = 1267 (0x4f3), region = 48 }
  0x15   : > { %v5765_v0 = vld [vmem:[%s8267_s1 + $0x40] sm:$0xff]   ;;  %p272_p10 = scmp.lt.s32.totalorder %s6048_s28, 1  ;;  %v5767_v2 = vld [vmem:[%s8267_s1 + $0x48] sm:$0xff]   ;;  %v5769_v4 = vld [vmem:[%s8267_s1 + $0x50] sm:$0xff]   ;;  %vm380_vm0 = vcmask 1046528   ;;  %vm493_vm1 = vcmask 1045504  }
  0x16   : > { %v5766_v1 = vld [vmem:[%s8267_s1] sm:$0xff]   ;;  %4594 = vmatprep.subr.bf16.mxu0 %v5765_v0  ;;  %5706 = vmatprep.subr.bf16.mxu1 %v5765_v0  ;;  %v5768_v3 = vld [vmem:[%s8267_s1 + $0x8] sm:$0xff]   ;;  %v5770_v5 = vld [vmem:[%s8267_s1 + $0x10] sm:$0xff]   ;;  %s4593_s19 = sshll.u32 %s6048_s28, 12  ;;  %s5984_s9 = smov [#allocation3]  }
  0x17   : > { %4595 = vmatpush3.bf16.msra.mxu0 %v5766_v1  ;;  %5714 = vmatpush3.bf16.msra.mxu1 %v5766_v1  ;;  %s273_s23 = scalar_select %p272_p10, %s6048_s28, 1  ;;  %v5771_v6 = vld [vmem:[%s8267_s1 + $0x58] sm:$0xff]   ;;  %v5773_v8 = vld [vmem:[%s8267_s1 + $0x60] sm:$0xff]   ;;  %v5775_v10 = vld [vmem:[%s8267_s1 + $0x68] sm:$0xff]  }
  0x18   : > { %4596 = vmatprep.subr.bf16.mxu0 %v5767_v2  ;;  %5707 = vmatprep.subr.bf16.mxu1 %v5767_v2  ;;  %v5772_v7 = vld [vmem:[%s8267_s1 + $0x18] sm:$0xff]   ;;  %v5774_v9 = vld [vmem:[%s8267_s1 + $0x20] sm:$0xff]   ;;  %v5776_v22 = vld [vmem:[%s8267_s1 + $0x28] sm:$0xff]  }
  0x19   : > { %s5722_s14 = smul.u32 432, %s273_s23  ;;  %v5777_v26 = vld [vmem:[%s8267_s1 + $0x70] sm:$0xff]   ;;  %v5779_v32 = vld [vmem:[%s8267_s1 + $0x78] sm:$0xff]   ;;  %v5781_v37 = vld [vmem:[%s8267_s1 + $0xc0] sm:$0xff]   ;;  %s8215_s23 = scalar_lea.hbm %s8273_s7, %s4593_s19 }
  0x1a   : > { %v5778_v31 = vld [vmem:[%s8267_s1 + $0x30] sm:$0xff]   ;;  %v5780_v33 = vld [vmem:[%s8267_s1 + $0x38] sm:$0xff]   ;;  %v5782_v46 = vld [vmem:[%s8267_s1 + $0x140] sm:$0xff]  }
  0x1b   : > { %4597 = vmatpush3.bf16.msra.mxu0 %v5768_v3  ;;  %5715 = vmatpush3.bf16.msra.mxu1 %v5768_v3  ;;  %s6107_s21 = scalar_lea.vmem %s8266_s0, %s5722_s14  ;;  %v5783_v52 = vld [vmem:[%s8267_s1 + $0x80] sm:$0xff]   ;;  %v5785_v56 = vld [vmem:[%s8267_s1 + $0xc8] sm:$0xff]   ;;  %s269_s14 = sand.u32 1, %s5972_s25  }
  0x1c   : > { %4598 = vmatprep.subr.bf16.mxu0 %v5769_v4  ;;  %5708 = vmatprep.subr.bf16.mxu1 %v5769_v4  ;;  %v6116_v11 = vld [vmem:[%s6107_s21] sm:$0xff]  ;;  %v6119_v12 = vld [vmem:[%s6107_s21 + $0x8] sm:$0xff]  ;;  %v6122_v13 = vld [vmem:[%s6107_s21 + $0x10] sm:$0x3]  ;;  %s4431_s17 = sshll.u32 %s269_s14, 8  ;;  %s8225_s28 = scalar_lea.sflag [#allocation4], %s269_s14 }
  0x1d   : > { %v381_v14 = vrot.slane %v6116_v11, 1  ;;  %v382_v15 = vrot.slane %v6119_v12, 1  ;;  %v384_v16 = vrot.slane %v6122_v13, 1  ;;  %v6128_v17 = vld [vmem:[%s6107_s21 + $0x120] sm:$0xff]  ;;  %v6131_v18 = vld [vmem:[%s6107_s21 + $0x128] sm:$0xff]  ;;  %v6168_v34 = vld [vmem:[%s6107_s21 + $0x18] sm:$0xff]  ;;  %v640_v50 = vpack.c.bf16 %v6119_v12, %v6116_v11 }
  0x1e   : > { %v6134_v19 = vld [vmem:[%s6107_s21 + $0x130] sm:$0x3]  ;;  %v441_v20 = vrot.slane %v6128_v17, 1  ;;  %v442_v21 = vrot.slane %v6131_v18, 1  ;;  %v6171_v35 = vld [vmem:[%s6107_s21 + $0x20] sm:$0xff]  ;;  %v386_v38 = vrot.slane %v6168_v34, 1  ;;  %v6207_v51 = vpack.c.bf16 %v6131_v18, %v6128_v17 }
  0x1f   : > { %4599 = vmatpush3.bf16.msra.mxu0 %v5770_v5  ;;  %5716 = vmatpush3.bf16.msra.mxu1 %v5770_v5  ;;  %v383_v23 = vsel %vm380_vm0, %v381_v14, %v382_v15  ;;  %v385_v24 = vsel %vm380_vm0, %v382_v15, %v384_v16  ;;  %v444_v25 = vrot.slane %v6134_v19, 1  ;;  %v6174_v36 = vld [vmem:[%s6107_s21 + $0x28] sm:$0x3]  ;;  %v387_v39 = vrot.slane %v6171_v35, 1  ;;  %v6183_v41 = vld [vmem:[%s6107_s21 + $0x138] sm:$0xff]  ;;  %v6186_v42 = vld [vmem:[%s6107_s21 + $0x140] sm:$0xff] }
  0x20   : > { %4600 = vmatprep.subr.bf16.mxu0 %v5771_v6  ;;  %5709 = vmatprep.subr.bf16.mxu1 %v5771_v6  ;;  %v641_v27 = vpack.c.bf16 %v385_v24, %v383_v23  ;;  %v6148_v28 = vsel %vm380_vm0, %v441_v20, %v442_v21  ;;  %v389_v40 = vrot.slane %v6174_v36, 1  ;;  %v6189_v43 = vld [vmem:[%s6107_s21 + $0x148] sm:$0x3]  ;;  %v446_v44 = vrot.slane %v6183_v41, 1  ;;  %v5784_v55 = vld [vmem:[%s8267_s1 + $0x100] sm:$0xff]   ;;  %v6239_v61 = vld [vmem:[%s6107_s21 + $0x30] sm:$0xff] }
  0x21   : > { %8318 = vst [vmem:[#allocation6_spill] sm:$0xff] %v6148_v28  ;;  %v6151_v29 = vsel %vm380_vm0, %v442_v21, %v444_v25  ;;  %v447_v45 = vrot.slane %v6186_v42, 1  ;;  %v449_v47 = vrot.slane %v6189_v43, 1  ;;  %v6198_v48 = vsel %vm380_vm0, %v386_v38, %v387_v39  ;;  %v5786_v58 = vld [vmem:[%s8267_s1 + $0x88] sm:$0xff]   ;;  %v6242_v62 = vld [vmem:[%s6107_s21 + $0x38] sm:$0xff]  ;;  %v6254_v5 = vld [vmem:[%s6107_s21 + $0x150] sm:$0xff] }
  0x22   : > { %8319 = vst [vmem:[#allocation7_spill] sm:$0xff] %v6151_v29  ;;  %1309 = vmatprep.mubr.bf16.mxu0 %v641_v27  ;;  %v6155_v30 = vpack.c.bf16 %v6151_v29, %v6148_v28  ;;  %8321 = vst [vmem:[#allocation9_spill] sm:$0xff] %v6198_v48  ;;  %v6201_v49 = vsel %vm380_vm0, %v387_v39, %v389_v40  ;;  %v5790_v60 = vld [vmem:[%s8267_s1 + $0x148] sm:$0xff]   ;;  %v554_v63 = vrot.slane %v6128_v17, 2  ;;  %v555_v0 = vrot.slane %v6131_v18, 2  ;;  %v6257_v6 = vld [vmem:[%s6107_s21 + $0x158] sm:$0xff] }
  0x23   : > { %4601 = vmatpush3.bf16.msra.mxu0 %v5772_v7  ;;  %5717 = vmatpush3.bf16.msra.mxu1 %v5772_v7  ;;  %8322 = vst [vmem:[#allocation10_spill] sm:$0xff] %v6201_v49  ;;  %v6213_v53 = vsel %vm380_vm0, %v446_v44, %v447_v45  ;;  %v6216_v54 = vsel %vm380_vm0, %v447_v45, %v449_v47  ;;  %v557_v1 = vrot.slane %v6134_v19, 2  ;;  %v6249_v2 = vld [vmem:[%s6107_s21 + $0x40] sm:$0x3]  ;;  %v391_v3 = vrot.slane %v6239_v61, 1  ;;  %v5792_v7 = vld [vmem:[%s8267_s1 + $0x108] sm:$0xff]  }
  0x24   : > { %4602 = vmatprep.subr.bf16.mxu0 %v5773_v8  ;;  %5710 = vmatprep.subr.bf16.mxu1 %v5773_v8  ;;  %8320 = vst [vmem:[#allocation8_spill] sm:$0xff] %v6155_v30  ;;  %8323 = vst [vmem:[#allocation11_spill] sm:$0xff] %v6213_v53  ;;  %v6226_v57 = vpack.c.bf16 %v6201_v49, %v6198_v48  ;;  %v6233_v59 = vpack.c.bf16 %v6216_v54, %v6213_v53  ;;  %v392_v4 = vrot.slane %v6242_v62, 1  ;;  %v5787_v15 = vld [vmem:[%s8267_s1 + $0xd0] sm:$0xff]   ;;  %v5789_v27 = vld [vmem:[%s8267_s1 + $0xd8] sm:$0xff]   ;;  %s8122_s18 = scalar_lea.vmem [#allocation3], %s4431_s17 }
  0x25   : > { %1405 = vmatprep.mubr.bf16.mxu1 %v6155_v30  ;;  %8324 = vst [vmem:[#allocation12_spill] sm:$0xff] %v6216_v54  ;;  %v394_v8 = vrot.slane %v6249_v2, 1  ;;  %v452_v14 = vrot.slane %v6257_v6, 1  ;;  %v556_v18 = vsel %vm493_vm1, %v554_v63, %v555_v0  ;;  %v558_v21 = vsel %vm493_vm1, %v555_v0, %v557_v1  ;;  %v5788_v24 = vld [vmem:[%s8267_s1 + $0x90] sm:$0xff]   ;;  %v6319_v38 = vld [vmem:[%s6107_s21 + $0x58] sm:$0x3] }
  0x26   : > { %8325 = vst [vmem:[#allocation13_spill] sm:$0xff] %v6233_v59  ;;  %v6273_v16 = vsel %vm380_vm0, %v391_v3, %v392_v4  ;;  %v6291_v23 = vpack.c.bf16 %v6186_v42, %v6183_v41  ;;  %v6323_v40 = vld [vmem:[%s6107_s21 + $0x168] sm:$0xff]  ;;  %v5791_v44 = vld [vmem:[%s8267_s1 + $0x98] sm:$0xff]   ;;  %v6331_v47 = vld [vmem:[%s6107_s21 + $0x170] sm:$0xff]  ;;  %s4365_s20 = sshll.u32 %s8122_s18, 4  ;;  %s8217_s20 = int_to_ptr.vmem [resolvable:$true] %s4365_s20 }
  0x27   : > { %4603 = vmatpush3.bf16.msra.mxu0 %v5774_v9  ;;  %5718 = vmatpush3.bf16.msra.mxu1 %v5774_v9  ;;  %v6264_v9 = vld [vmem:[%s6107_s21 + $0x160] sm:$0x3]  ;;  %8326 = vst [vmem:[#allocation14_spill] sm:$0xff] %v6273_v16  ;;  %v6279_v19 = vsel %vm380_vm0, %v392_v4, %v394_v8  ;;  %v5798_v3 = vld [vmem:[%s8267_s1 + $0x150] sm:$0xff]   ;;  %v559_v4 = vrot.slane %v6183_v41, 2  ;;  %v6368_v8 = vpack.c.bf16 %v6257_v6, %v6254_v5  ;;  %s5918_s8 = scalar_lea.vmem %s8217_s20, 4096 }
  0x28   : > { %4604 = vmatprep.subr.bf16.mxu0 %v5775_v10  ;;  %5711 = vmatprep.subr.bf16.mxu1 %v5775_v10  ;;  %v451_v10 = vrot.slane %v6254_v5, 1  ;;  %v454_v17 = vrot.slane %v6264_v9, 1  ;;  %8327 = vst [vmem:[#allocation15_spill] sm:$0xff] %v6279_v19  ;;  %v5794_v41 = vld [vmem:[%s8267_s1 + $0xa0] sm:$0xff]   ;;  %p5919_p11 = scmp.ne.s32.totalorder %s8217_s20, %s5918_s8 }
  0x29   : > { %v6612_v49 = vld [vmem:[%s6107_s21 + $0xe0] sm:$0xff] }
  0x2a   : > { %v6282_v20 = vsel %vm380_vm0, %v451_v10, %v452_v14  ;;  %v6297_v25 = vsel %vm380_vm0, %v452_v14, %v454_v17  ;;  %v5800_v10 = vld [vmem:[%s8267_s1 + $0x110] sm:$0xff]   ;;  %v560_v14 = vrot.slane %v6186_v42, 2  ;;  %v5795_v42 = vld [vmem:[%s8267_s1 + $0xe8] sm:$0xff]   ;;  %p5920_p12 = pnand %p5919_p11, %p6065_p5 }
  0x2b   : > { %4605 = vmatpush3.bf16.msra.mxu0 %v5776_v22  ;;  %5719 = vmatpush3.bf16.msra.mxu1 %v5776_v22  ;;  %8328 = vst [vmem:[#allocation16_spill] sm:$0xff] %v6282_v20  ;;  %v6287_v22 = vpack.c.bf16 %v6171_v35, %v6168_v34  ;;  %8329 = vst [vmem:[#allocation17_spill] sm:$0xff] %v6297_v25 }
  0x2c   : > { %4606 = vmatprep.subr.bf16.mxu0 %v5777_v26  ;;  %5712 = vmatprep.subr.bf16.mxu1 %v5777_v26  ;;  %v6299_v26 = vpack.c.bf16 %v558_v21, %v556_v18  ;;  %v562_v18 = vrot.slane %v6189_v43, 2  ;;  %v6390_v21 = vld [vmem:[%s6107_s21 + $0x60] sm:$0xff]  ;;  %p5921_p13 = pneg %p5920_p12 }
  0x2d   : > { %v401_v43 = vrot.slane %v6390_v21, 1 }
  0x2f   : > { %4607 = vmatpush3.bf16.msra.mxu0 %v5778_v31  ;;  %5720 = vmatpush3.bf16.msra.mxu1 %v5778_v31  ;;  %v6306_v31 = vpack.c.bf16 %v6279_v19, %v6273_v16  ;;  %v570_v16 = vrot.slane %v6331_v47, 2 }
  0x30   : > { %4608 = vmatprep.subr.bf16.mxu0 %v5779_v32  ;;  %5713 = vmatprep.subr.bf16.mxu1 %v5779_v32  ;;  %v6309_v32 = vld [vmem:[%s6107_s21 + $0x48] sm:$0xff] }
  0x31   : > { %v396_v39 = vrot.slane %v6309_v32, 1 }
  0x33   : > { %4609 = vmatpush3.bf16.msra.mxu0 %v5780_v33  ;;  %5721 = vmatpush3.bf16.msra.mxu1 %v5780_v33  ;;  %v6313_v33 = vpack.c.bf16 %v6297_v25, %v6282_v20  ;;  %v6492_v25 = vld [vmem:[%s6107_s21 + $0x90] sm:$0xff] }
  0x34   : > { %4706 = vmatprep.subr.bf16.mxu1 %v5781_v37  ;;  %4818 = vmatprep.subr.bf16.mxu0 %v5782_v46  ;;  %v6316_v37 = vld [vmem:[%s6107_s21 + $0x50] sm:$0xff]  ;;  %v399_v46 = vrot.slane %v6319_v38, 1 }
  0x35   : > { %8330 = vst [vmem:[#allocation18_spill] sm:$0xff] %v6313_v33  ;;  %v397_v45 = vrot.slane %v6316_v37, 1 }
  0x36   : > { %1310 = vmatmul.mubr.bf16.vlgmr.msra.gmra.mrb[0].mxu0 %v640_v50  ;;  %1406 = vmatmul.mubr.bf16.vlgmr.msra.gmra.mrb[0].mxu1 %v6207_v51  ;;  %v6334_v50 = vld [vmem:[%s6107_s21 + $0x178] sm:$0x3] }
  0x37   : > { %4707 = vmatpush3.bf16.msra.mxu1 %v5783_v52  ;;  %4819 = vmatpush3.bf16.msra.mxu0 %v5784_v55  ;;  %v456_v52 = vrot.slane %v6323_v40, 1  ;;  %v457_v55 = vrot.slane %v6331_v47, 1  ;;  %v6350_v63 = vsel %vm380_vm0, %v397_v45, %v399_v46  ;;  %v6400_v46 = vld [vmem:[%s6107_s21 + $0x70] sm:$0x3] }
  0x38   : > { %4708 = vmatprep.subr.bf16.mxu1 %v5785_v56  ;;  %1317 = vmatprep.mubr.bf16.mxu0 %v6226_v57  ;;  %v459_v56 = vrot.slane %v6334_v50, 1  ;;  %8332 = vst [vmem:[#allocation20_spill] sm:$0xff] %v6350_v63 }
  0x39   : > { %1413 = vmatprep.mubr.bf16.mxu1 %v6233_v59  ;;  %4820 = vmatprep.subr.bf16.mxu0 %v5790_v60  ;;  %v6346_v60 = vsel %vm380_vm0, %v396_v39, %v397_v45  ;;  %v6353_v0 = vsel %vm380_vm0, %v456_v52, %v457_v55  ;;  %v564_v39 = vrot.slane %v6254_v5, 2  ;;  %v567_v45 = vrot.slane %v6264_v9, 2  ;;  %v5803_v5 = vld [vmem:[%s8267_s1 + $0x158] sm:$0xff]  }
  0x3a   : > { %8331 = vst [vmem:[#allocation19_spill] sm:$0xff] %v6346_v60  ;;  %8333 = vst [vmem:[#allocation21_spill] sm:$0xff] %v6353_v0  ;;  %v6356_v1 = vsel %vm380_vm0, %v457_v55, %v459_v56  ;;  %v563_v55 = vsel %vm493_vm1, %v560_v14, %v562_v18  ;;  %v404_v56 = vrot.slane %v6400_v46, 1  ;;  %v8352_v59 = vrot.slane %v6319_v38, 2  ;;  %v6693_v38 = vld [vmem:[%s6107_s21 + $0x108] sm:$0xff] }
  0x3b   : > { %4709 = vmatpush3.bf16.msra.mxu1 %v5786_v58  ;;  %4821 = vmatpush3.bf16.msra.mxu0 %v5792_v7  ;;  %v5793_v58 = vld [vmem:[%s8267_s1 + $0xe0] sm:$0xff]   ;;  %8334 = vst [vmem:[#allocation22_spill] sm:$0xff] %v6356_v1  ;;  %v6364_v7 = vpack.c.bf16 %v6242_v62, %v6239_v61  ;;  %v6383_v17 = vpack.c.bf16 %v6356_v1, %v6353_v0 }
  0x3c   : > { %4710 = vmatprep.subr.bf16.mxu1 %v5787_v15  ;;  %4822 = vmatprep.subr.bf16.mxu0 %v5798_v3  ;;  %v6379_v15 = vpack.c.bf16 %v6350_v63, %v6346_v60  ;;  %v5796_v3 = vld [vmem:[%s8267_s1 + $0xa8] sm:$0xff]   ;;  %v6585_v63 = vld [vmem:[%s6107_s21 + $0xd8] sm:$0xff] }
  0x3d   : > { %8335 = vst [vmem:[#allocation23_spill] sm:$0xff] %v6364_v7  ;;  %8336 = vst [vmem:[#allocation24_spill] sm:$0xff] %v6383_v17 }
  0x3e   : > { %1318 = vmatmul.mubr.bf16.gmra.mrb[4].mxu0 %v6287_v22  ;;  %1414 = vmatmul.mubr.bf16.gmra.mrb[4].mxu1 %v6291_v23 }
  0x3f   : > { %4711 = vmatpush3.bf16.msra.mxu1 %v5788_v24  ;;  %1325 = vmatprep.mubr.bf16.mxu0 %v6306_v31  ;;  %v6393_v24 = vld [vmem:[%s6107_s21 + $0x68] sm:$0xff] }
  0x40   : > { %4712 = vmatprep.subr.bf16.mxu1 %v5789_v27  ;;  %1421 = vmatprep.mubr.bf16.mxu1 %v6313_v33  ;;  %v561_v27 = vsel %vm493_vm1, %v559_v4, %v560_v14  ;;  %v402_v52 = vrot.slane %v6393_v24, 1  ;;  %v5804_v4 = vld [vmem:[%s8267_s1 + $0x118] sm:$0xff]   ;;  %v5797_v14 = vld [vmem:[%s8267_s1 + $0xf0] sm:$0xff]  }
  0x41   : > { %4823 = vmatpush3.bf16.msra.mxu0 %v5800_v10 }
  0x42   : > { %v6432_v18 = vsel %vm380_vm0, %v402_v52, %v404_v56  ;;  %4824 = vmatprep.subr.bf16.mxu0 %v5803_v5  ;;  %v5799_v56 = vld [vmem:[%s8267_s1 + $0xb0] sm:$0xff]  }
  0x43   : > { %4713 = vmatpush3.bf16.msra.mxu1 %v5791_v44  ;;  %v565_v44 = vrot.slane %v6257_v6, 2  ;;  %v6411_v6 = vpack.c.bf16 %v563_v55, %v561_v27  ;;  %8339 = vst [vmem:[#allocation27_spill] sm:$0xff] %v6432_v18  ;;  %v6435_v27 = vld [vmem:[%s6107_s21 + $0x78] sm:$0xff]  ;;  %v495_v55 = vrot.slane %v6119_v12, 2 }
  0x44   : > { %4714 = vmatprep.subr.bf16.mxu1 %v5793_v58  ;;  %v5801_v12 = vld [vmem:[%s8267_s1 + $0xf8] sm:$0xff]  }
  0x45   : > { %v566_v9 = vsel %vm493_vm1, %v564_v39, %v565_v44  ;;  %v568_v58 = vsel %vm493_vm1, %v565_v44, %v567_v45  ;;  %v494_v39 = vrot.slane %v6116_v11, 2  ;;  %v6439_v44 = vld [vmem:[%s6107_s21 + $0x80] sm:$0xff]  ;;  %v6455_v11 = vpack.c.bf16 %v6331_v47, %v6323_v40  ;;  %4825 = vmatpush3.bf16.msra.mxu0 %v5804_v4  ;;  %v5807_v4 = vld [vmem:[%s8267_s1 + $0x168] sm:$0xff]  }
  0x46   : > { %1326 = vmatmul.mubr.bf16.gmra.mrb[8].mxu0 %v6364_v7  ;;  %1422 = vmatmul.mubr.bf16.gmra.mrb[8].mxu1 %v6368_v8  ;;  %v6422_v10 = vpack.c.bf16 %v568_v58, %v566_v9  ;;  %v5805_v45 = vld [vmem:[%s8267_s1 + $0x160] sm:$0xff]   ;;  %v407_v9 = vrot.slane %v6439_v44, 1  ;;  %v8350_v47 = vrot.slane %v6316_v37, 2 }
  0x47   : > { %4715 = vmatpush3.bf16.msra.mxu1 %v5794_v41  ;;  %1333 = vmatprep.mubr.bf16.mxu0 %v6379_v15  ;;  %v6429_v41 = vsel %vm380_vm0, %v401_v43, %v402_v52  ;;  %v497_v43 = vrot.slane %v6122_v13, 2  ;;  %v6451_v52 = vpack.c.bf16 %v6316_v37, %v6309_v32  ;;  %v406_v13 = vrot.slane %v6435_v27, 1  ;;  %v6698_v37 = vld [vmem:[%s6107_s21 + $0x110] sm:$0xff] }
  0x48   : > { %8337 = vst [vmem:[#allocation25_spill] sm:$0xff] %v6422_v10  ;;  %4716 = vmatprep.subr.bf16.mxu1 %v5795_v42  ;;  %1429 = vmatprep.mubr.bf16.mxu1 %v6383_v17  ;;  %8338 = vst [vmem:[#allocation26_spill] sm:$0xff] %v6429_v41  ;;  %v6442_v42 = vld [vmem:[%s6107_s21 + $0x88] sm:$0x3]  ;;  %v6462_v5 = vpack.c.bf16 %v6432_v18, %v6429_v41  ;;  %v496_v1 = vsel %vm493_vm1, %v494_v39, %v495_v55  ;;  %v6651_v17 = vld [vmem:[%s6107_s21 + $0x100] sm:$0x3]  ;;  %v8353_v30 = vmov %v8350_v47 }
  0x49   : > { %8340 = vst [vmem:[#allocation28_spill] sm:$0xff] %v6451_v52  ;;  %4826 = vmatprep.subr.bf16.mxu0 %v5805_v45  ;;  %v409_v58 = vrot.slane %v6442_v42, 1  ;;  %v5802_v45 = vld [vmem:[%s8267_s1 + $0xb8] sm:$0xff]   ;;  %v6486_v0 = vsel %vm380_vm0, %v406_v13, %v407_v9  ;;  %v5808_v39 = vld [vmem:[%s8267_s1 + $0x128] sm:$0xff]  }
  0x4a   : > { %8341 = vst [vmem:[#allocation29_spill] sm:$0xff] %v6486_v0 }
  0x4b   : > { %4717 = vmatpush3.bf16.msra.mxu1 %v5796_v3  ;;  %v5806_v3 = vld [vmem:[%s8267_s1 + $0x120] sm:$0xff]   ;;  %v6489_v54 = vsel %vm380_vm0, %v407_v9, %v409_v58  ;;  %v500_v9 = vrot.slane %v6171_v35, 2  ;;  %v502_v58 = vrot.slane %v6174_v36, 2  ;;  %v5810_v35 = vld [vmem:[%s8267_s1 + $0x130] sm:$0xff]   ;;  %v505_v36 = vrot.slane %v6242_v62, 2 }
  0x4c   : > { %4718 = vmatprep.subr.bf16.mxu1 %v5797_v14  ;;  %v498_v14 = vsel %vm493_vm1, %v495_v55, %v497_v43  ;;  %8342 = vst [vmem:[#allocation30_spill] sm:$0xff] %v6489_v54  ;;  %v6495_v43 = vld [vmem:[%s6107_s21 + $0x98] sm:$0xff]  ;;  %4827 = vmatpush3.bf16.msra.mxu0 %v5806_v3  ;;  %v6510_v13 = vpack.c.bf16 %v6489_v54, %v6486_v0  ;;  %v411_v3 = vrot.slane %v6492_v25, 1  ;;  %v6539_v62 = vld [vmem:[%s6107_s21 + $0xb0] sm:$0xff] }
  0x4d   : > { %v642_v55 = vpack.c.bf16 %v498_v14, %v496_v1  ;;  %4828 = vmatprep.subr.bf16.mxu0 %v5807_v4  ;;  %v412_v53 = vrot.slane %v6495_v43, 1  ;;  %v504_v1 = vrot.slane %v6239_v61, 2  ;;  %v507_v4 = vrot.slane %v6249_v2, 2  ;;  %v5811_v61 = vld [vmem:[%s8267_s1 + $0x178] sm:$0xff]   ;;  %v6574_v2 = vld [vmem:[%s6107_s21 + $0xd0] sm:$0x3] }
  0x4e   : > { %1334 = vmatmul.mubr.bf16.gmra.mrb[12].mxu0 %v6451_v52  ;;  %1430 = vmatmul.mubr.bf16.gmra.mrb[12].mxu1 %v6455_v11  ;;  %v6550_v54 = vld [vmem:[%s6107_s21 + $0xb8] sm:$0x3]  ;;  %v417_v0 = vrot.slane %v6539_v62, 1  ;;  %v424_v41 = vrot.slane %v6574_v2, 1 }
  0x4f   : > { %4719 = vmatpush3.bf16.msra.mxu1 %v5799_v56  ;;  %1341 = vmatprep.mubr.bf16.mxu0 %v6462_v5  ;;  %v6498_v56 = vld [vmem:[%s6107_s21 + $0xa0] sm:$0x3]  ;;  %v6544_v29 = vsel %vm380_vm0, %v411_v3, %v412_v53  ;;  %v508_v18 = vsel %vm493_vm1, %v505_v36, %v507_v4  ;;  %v5820_v4 = vld [vmem:[%s8267_s1 + $0x190] sm:$0xff]  }
  0x50   : > { %4720 = vmatprep.subr.bf16.mxu1 %v5801_v12  ;;  %1470 = vmatprep.mubr.bf16.mxu1 %v6287_v22  ;;  %v6505_v22 = vpack.c.bf16 %v6393_v24, %v6390_v21  ;;  %v499_v12 = vrot.slane %v6168_v34, 2  ;;  %v414_v20 = vrot.slane %v6498_v56, 1  ;;  %v5809_v34 = vld [vmem:[%s8267_s1 + $0x170] sm:$0xff]   ;;  %8344 = vst [vmem:[#allocation32_spill] sm:$0xff] %v6544_v29 }
  0x51   : > { %4829 = vmatpush3.bf16.msra.mxu0 %v5808_v39  ;;  %v503_v39 = vsel %vm493_vm1, %v500_v9, %v502_v58  ;;  %v6557_v58 = vld [vmem:[%s6107_s21 + $0xc0] sm:$0xff] }
  0x52   : > { %8343 = vst [vmem:[#allocation31_spill] sm:$0xff] %v6505_v22  ;;  %v6547_v28 = vsel %vm380_vm0, %v412_v53, %v414_v20  ;;  %4830 = vmatprep.subr.bf16.mxu0 %v5809_v34  ;;  %v5813_v53 = vld [vmem:[%s8267_s1 + $0x1c0] sm:$0xff]   ;;  %v6565_v20 = vpack.c.bf16 %v6439_v44, %v6435_v27 }
  0x53   : > { %4721 = vmatpush3.bf16.msra.mxu1 %v5802_v45  ;;  %v501_v45 = vsel %vm493_vm1, %v499_v12, %v500_v9  ;;  %8345 = vst [vmem:[#allocation33_spill] sm:$0xff] %v6547_v28  ;;  %v5812_v9 = vld [vmem:[%s8267_s1 + $0x138] sm:$0xff]   ;;  %v6571_v12 = vld [vmem:[%s6107_s21 + $0xc8] sm:$0xff]  ;;  %v6581_v14 = vpack.c.bf16 %v6547_v28, %v6544_v29 }
  0x54   : > { %8346 = vst [vmem:[#allocation34_spill] sm:$0xff] %v6565_v20  ;;  %v6567_v3 = vpack.c.bf16 %v503_v39, %v501_v45  ;;  %4930 = vmatprep.subr.bf16.mxu1 %v5813_v53  ;;  %v419_v45 = vrot.slane %v6550_v54, 1  ;;  %v5816_v28 = vld [vmem:[%s8267_s1 + $0x1c8] sm:$0xff]   ;;  %v421_v53 = vrot.slane %v6557_v58, 1  ;;  %v422_v60 = vrot.slane %v6571_v12, 1 }
  0x55   : > { %4831 = vmatpush3.bf16.msra.mxu0 %v5810_v35  ;;  %v5814_v35 = vld [vmem:[%s8267_s1 + $0x180] sm:$0xff]   ;;  %v5817_v39 = vld [vmem:[%s8267_s1 + $0x188] sm:$0xff]  }
  0x56   : > { %1342 = vmatmul.mubr.bf16.gmra.mrb[16].mxu0 %v6505_v22  ;;  %1471 = vmatmul.mubr.bf16.vlgmr.msra.gmra.mrb[16].mxu1 %v642_v55  ;;  %v6536_v55 = vld [vmem:[%s6107_s21 + $0xa8] sm:$0xff]  ;;  %v6621_v19 = vsel %vm380_vm0, %v417_v0, %v419_v45  ;;  %v569_v45 = vrot.slane %v6323_v40, 2 }
  0x57   : > { %1349 = vmatprep.mubr.bf16.mxu0 %v6510_v13  ;;  %1478 = vmatprep.mubr.bf16.mxu1 %v6364_v7  ;;  %v416_v34 = vrot.slane %v6536_v55, 1  ;;  %8348 = vst [vmem:[#allocation36_spill] sm:$0xff] %v6621_v19 }
  0x58   : > { %4832 = vmatprep.subr.bf16.mxu0 %v5811_v61  ;;  %4931 = vmatpush3.bf16.msra.mxu1 %v5814_v35  ;;  %v6591_v61 = vld [vmem:[%s8267_s1 + $0x200] sm:$0xff]   ;;  %v5819_v35 = vld [vmem:[%s8267_s1 + $0x1d0] sm:$0xff]  }
  0x59   : > { %4833 = vmatpush3.bf16.msra.mxu0 %v5812_v9  ;;  %v506_v9 = vsel %vm493_vm1, %v504_v1, %v505_v36  ;;  %v6618_v29 = vsel %vm380_vm0, %v416_v34, %v417_v0  ;;  %v6624_v1 = vld [vmem:[%s6107_s21 + $0xe8] sm:$0x3]  ;;  %4932 = vmatprep.subr.bf16.mxu1 %v5816_v28  ;;  %v6633_v34 = vpack.c.bf16 %v6495_v43, %v6492_v25  ;;  %v427_v0 = vrot.slane %v6612_v49, 1  ;;  %v6644_v28 = vld [vmem:[%s6107_s21 + $0xf0] sm:$0xff] }
  0x5a   : > { %8347 = vst [vmem:[#allocation35_spill] sm:$0xff] %v6618_v29  ;;  %5562 = vmatprep.subr.bf16.mxu0 %v6591_v61  ;;  %v6635_v48 = vpack.c.bf16 %v508_v18, %v506_v9  ;;  %v6641_v36 = vpack.c.bf16 %v6621_v19, %v6618_v29  ;;  %v5822_v18 = vld [vmem:[%s8267_s1 + $0x1d8] sm:$0xff]   ;;  %v429_v40 = vrot.slane %v6624_v1, 1  ;;  %v571_v19 = vsel %vm493_vm1, %v569_v45, %v570_v16 }
  0x5b   : > { %v5823_v9 = vld [vmem:[%s8267_s1 + $0x198] sm:$0xff]   ;;  %v8351_v29 = vrot.slane %v6309_v32, 2  ;;  %v513_v32 = vsel %vm493_vm1, %v8353_v30, %v8352_v59  ;;  %v434_v59 = vrot.slane %v6651_v17, 1 }
  0x5c   : > { %4933 = vmatpush3.bf16.msra.mxu1 %v5817_v39  ;;  %8349 = vst [vmem:[#allocation37_spill] sm:$0xff] %v6641_v36  ;;  %v6648_v39 = vld [vmem:[%s6107_s21 + $0xf8] sm:$0xff]  ;;  %v6754_v10 = vsel %vm380_vm0, %v427_v0, %v429_v40 }
  0x5d   : > { %4934 = vmatprep.subr.bf16.mxu1 %v5819_v35  ;;  %v572_v35 = vrot.slane %v6334_v50, 2  ;;  %v511_v50 = vsel %vm493_vm1, %v8351_v29, %v8350_v47  ;;  %v432_v30 = vrot.slane %v6648_v39, 1  ;;  %v436_v29 = vrot.slane %v6693_v38, 1  ;;  %v5832_v40 = vld [vmem:[%s8267_s1 + $0x1b8] sm:$0xff]  }
  0x5e   : > { %1350 = vmatmul.mubr.bf16.gmra.mrb[20].mxu0 %v6565_v20  ;;  %1479 = vmatmul.mubr.bf16.gmra.mrb[20].mxu1 %v6567_v3  ;;  %v8359_v47 = vrot.slane %v6390_v21, 2 }
  0x5f   : > { %1357 = vmatprep.mubr.bf16.mxu0 %v6581_v14  ;;  %1486 = vmatprep.mubr.bf16.mxu1 %v6451_v52  ;;  %v573_v45 = vsel %vm493_vm1, %v570_v16, %v572_v35  ;;  %v6686_v52 = vsel %vm380_vm0, %v421_v53, %v422_v60  ;;  %v6689_v16 = vsel %vm380_vm0, %v422_v60, %v424_v41  ;;  %v431_v35 = vrot.slane %v6644_v28, 1 }
  0x60   : > { %4935 = vmatpush3.bf16.msra.mxu1 %v5820_v4  ;;  %v5824_v4 = vld [vmem:[%s8267_s1 + $0x1e0] sm:$0xff]   ;;  %v6683_v33 = vpack.c.bf16 %v573_v45, %v571_v19  ;;  %8355 = vst [vmem:[#allocation39_spill] sm:$0xff] %v6686_v52  ;;  %8356 = vst [vmem:[#allocation40_spill] sm:$0xff] %v6689_v16  ;;  %v6705_v60 = vpack.c.bf16 %v6539_v62, %v6536_v55  ;;  %v6707_v41 = vpack.c.bf16 %v513_v32, %v511_v50  ;;  %v5827_v50 = vld [vmem:[%s8267_s1 + $0x1e8] sm:$0xff]  }
  0x61   : > { %4936 = vmatprep.subr.bf16.mxu1 %v5822_v18  ;;  %v5826_v19 = vld [vmem:[%s8267_s1 + $0x1a0] sm:$0xff]   ;;  %v527_v53 = vrot.slane %v6498_v56, 2  ;;  %v6711_v18 = vld [vmem:[%s6107_s21 + $0x118] sm:$0x3]  ;;  %v532_v32 = vrot.slane %v6550_v54, 2  ;;  %v5829_v45 = vld [vmem:[%s8267_s1 + $0x1f0] sm:$0xff]   ;;  %v6796_v21 = vsel %vm380_vm0, %v432_v30, %v434_v59 }
  0x62   : > { %8354 = vst [vmem:[#allocation38_spill] sm:$0xff] %v6683_v33  ;;  %v439_v56 = vrot.slane %v6711_v18, 1  ;;  %v534_v33 = vrot.slane %v6557_v58, 2 }
  0x64   : > { %4937 = vmatpush3.bf16.msra.mxu1 %v5823_v9  ;;  %v6716_v9 = vpack.c.bf16 %v6689_v16, %v6686_v52  ;;  %v8360_v52 = vrot.slane %v6400_v46, 2 }
  0x65   : > { %4938 = vmatprep.subr.bf16.mxu1 %v5824_v4  ;;  %v5828_v4 = vld [vmem:[%s8267_s1 + $0x1a8] sm:$0xff]  }
  0x66   : > { %1358 = vmatmul.mubr.bf16.gmra.mrb[24].mxu0 %v6633_v34  ;;  %1487 = vmatmul.mubr.bf16.gmra.mrb[24].mxu1 %v6635_v48  ;;  %8357 = vst [vmem:[#allocation41_spill] sm:$0xff] %v6716_v9 }
  0x67   : > { %1365 = vmatprep.mubr.bf16.mxu0 %v6641_v36  ;;  %1494 = vmatprep.mubr.bf16.mxu1 %v6505_v22  ;;  %v437_v22 = vrot.slane %v6698_v37, 1  ;;  %v535_v36 = vrot.slane %v6571_v12, 2 }
  0x68   : > { %4939 = vmatpush3.bf16.msra.mxu1 %v5826_v19  ;;  %v8358_v19 = vrot.slane %v6393_v24, 2  ;;  %v5830_v24 = vld [vmem:[%s8267_s1 + $0x1b0] sm:$0xff]  }
  0x69   : > { %4940 = vmatprep.subr.bf16.mxu1 %v5827_v50  ;;  %v6821_v59 = vsel %vm380_vm0, %v436_v29, %v437_v22  ;;  %v8370_v29 = vrot.slane %v6539_v62, 2  ;;  %v6865_v62 = vpack.c.bf16 %v6698_v37, %v6693_v38 }
  0x6a   : > { %v516_v16 = vsel %vm493_vm1, %v8359_v47, %v8358_v19  ;;  %v8361_v7 = vmov %v8358_v19  ;;  %v539_v47 = vrot.slane %v6585_v63, 2 }
  0x6b   : > { %v518_v54 = vsel %vm493_vm1, %v8361_v7, %v8360_v52  ;;  %v6762_v7 = vpack.c.bf16 %v6571_v12, %v6557_v58  ;;  %v5831_v52 = vld [vmem:[%s8267_s1 + $0x1f8] sm:$0xff]  }
  0x6c   : > { %4941 = vmatpush3.bf16.msra.mxu1 %v5828_v4  ;;  %v6764_v46 = vpack.c.bf16 %v518_v54, %v516_v16  ;;  %v540_v16 = vrot.slane %v6612_v49, 2  ;;  %v8365_v4 = vrot.slane %v6442_v42, 2  ;;  %v8367_v42 = vrot.slane %v6495_v43, 2 }
  0x6d   : > { %4942 = vmatprep.subr.bf16.mxu1 %v5829_v45  ;;  %v8363_v45 = vrot.slane %v6439_v44, 2  ;;  %v542_v43 = vrot.slane %v6624_v1, 2 }
  0x6e   : > { %1366 = vmatmul.mubr.bf16.gmra.mrb[28].mxu0 %v6705_v60  ;;  %1495 = vmatmul.mubr.bf16.gmra.mrb[28].mxu1 %v6707_v41 }
  0x6f   : > { %1373 = vmatprep.mubr.bf16.mxu0 %v6716_v9  ;;  %1502 = vmatprep.mubr.bf16.mxu1 %v6565_v20  ;;  %v8362_v9 = vrot.slane %v6585_v63, 1  ;;  %v8366_v19 = vmov %v8363_v45  ;;  %v543_v12 = vsel %vm493_vm1, %v540_v16, %v542_v43 }
  0x70   : > { %4943 = vmatpush3.bf16.msra.mxu1 %v5830_v24  ;;  %v523_v54 = vsel %vm493_vm1, %v8366_v19, %v8365_v4  ;;  %v6793_v24 = vsel %vm380_vm0, %v431_v35, %v432_v30  ;;  %v8369_v35 = vmov %v8367_v42  ;;  %v8372_v4 = vmov %v8370_v29 }
  0x71   : > { %v6751_v20 = vsel %vm380_vm0, %v8362_v9, %v427_v0  ;;  %v8364_v9 = vrot.slane %v6435_v27, 2  ;;  %4944 = vmatprep.subr.bf16.mxu1 %v5831_v52  ;;  %v6800_v27 = vpack.c.bf16 %v6612_v49, %v6585_v63  ;;  %v6806_v44 = vpack.c.bf16 %v6796_v21, %v6793_v24 }
  0x72   : > { %v6771_v0 = vpack.c.bf16 %v6754_v10, %v6751_v20  ;;  %v8368_v49 = vrot.slane %v6492_v25, 2  ;;  %v528_v30 = vsel %vm493_vm1, %v8369_v35, %v527_v53  ;;  %v6824_v52 = vsel %vm380_vm0, %v437_v22, %v439_v56  ;;  %v6843_v22 = vld [vmem:[%s6107_s21 + $0x188] sm:$0xff] }
  0x73   : > { %v521_v50 = vsel %vm493_vm1, %v8364_v9, %v8363_v45  ;;  %v6834_v25 = vpack.c.bf16 %v6824_v52, %v6821_v59  ;;  %v8371_v53 = vrot.slane %v6536_v55, 2  ;;  %v533_v19 = vsel %vm493_vm1, %v8372_v4, %v532_v32  ;;  %v5836_v4 = vld [vmem:[%s8267_s1 + $0x238] sm:$0xff]  }
  0x74   : > { %4945 = vmatpush3.bf16.msra.mxu1 %v5832_v40  ;;  %v6802_v45 = vpack.c.bf16 %v523_v54, %v521_v50  ;;  %v526_v63 = vsel %vm493_vm1, %v8368_v49, %v8367_v42  ;;  %v6828_v40 = vpack.c.bf16 %v6648_v39, %v6644_v28  ;;  %v6837_v50 = vld [vmem:[%s6107_s21 + $0x180] sm:$0xff]  ;;  %v610_v1 = vrot.slane %v6843_v22, 1 }
  0x75   : > { %v6830_v9 = vpack.c.bf16 %v528_v30, %v526_v63  ;;  %v531_v56 = vsel %vm493_vm1, %v8371_v53, %v8370_v29  ;;  %v609_v54 = vrot.slane %v6837_v50, 1  ;;  %v544_v42 = vrot.slane %v6644_v28, 2  ;;  %v5835_v53 = vld [vmem:[%s8267_s1 + $0x230] sm:$0xff]  }
  0x76   : > { %1374 = vmatmul.mubr.bf16.gmra.mrb[32].mxu0 %v6762_v7  ;;  %1503 = vmatmul.mubr.bf16.gmra.mrb[32].mxu1 %v6764_v46  ;;  %v545_v49 = vrot.slane %v6648_v39, 2  ;;  %v547_v63 = vrot.slane %v6651_v17, 2  ;;  %v549_v35 = vrot.slane %v6693_v38, 2  ;;  %v550_v55 = vrot.slane %v6698_v37, 2 }
  0x77   : > { %1381 = vmatprep.mubr.bf16.mxu0 %v6771_v0  ;;  %1510 = vmatprep.mubr.bf16.mxu1 %v6633_v34  ;;  %v552_v30 = vrot.slane %v6711_v18, 2  ;;  %v6867_v32 = vpack.c.bf16 %v533_v19, %v531_v56  ;;  %v6872_v28 = vsel %vm380_vm0, %v609_v54, %v610_v1  ;;  %v536_v17 = vsel %vm493_vm1, %v534_v33, %v535_v36  ;;  %v5818_v18 = vld [vmem:[%s8267_s1 + $0x208] sm:$0xff]   ;;  %v5821_v33 = vld [vmem:[%s8267_s1 + $0x210] sm:$0xff]  }
  0x78   : > { %v8373_v39 = vrot.slane %v6574_v2, 2  ;;  %v541_v2 = vsel %vm493_vm1, %v539_v47, %v540_v16  ;;  %v5834_v16 = vld [vmem:[%s8267_s1 + $0x228] sm:$0xff]   ;;  %v551_v43 = vsel %vm493_vm1, %v549_v35, %v550_v55  ;;  %v6950_v19 = vpack.c.bf16 %v6843_v22, %v6837_v50  ;;  %v8378_v35 = vld [vmem:[#allocation23_spill] sm:$0xff] }
  0x79   : > { %v6903_v58 = vpack.c.bf16 %v543_v12, %v541_v2  ;;  %v553_v29 = vsel %vm493_vm1, %v550_v55, %v552_v30  ;;  %v8374_v54 = vld [vmem:[#allocation25_spill] sm:$0xff]  ;;  %v8379_v55 = vld [vmem:[#allocation28_spill] sm:$0xff] }
  0x7a   : > { %v538_v38 = vsel %vm493_vm1, %v535_v36, %v8373_v39  ;;  %v5833_v36 = vld [vmem:[%s8267_s1 + $0x220] sm:$0xff]   ;;  %v6931_v56 = vpack.c.bf16 %v553_v29, %v551_v43  ;;  %v328_v39 = vld [vmem:[%s6107_s21 + $0x190] sm:$0x3] }
  0x7b   : > { %v6888_v37 = vpack.c.bf16 %v538_v38, %v536_v17  ;;  %v8381_v30 = vld [vmem:[#allocation8_spill] sm:$0xff]  ;;  %v8383_v17 = vld [vmem:[#allocation13_spill] sm:$0xff]  ;;  %v617_v38 = vrot.slane %v6843_v22, 2 }
  0x7e   : > { %1382 = vmatmul.mubr.bf16.gmra.mrb[36].mxu0 %v6800_v27  ;;  %1511 = vmatmul.mubr.bf16.gmra.mrb[36].mxu1 %v6802_v45 }
  0x7f   : > { %1389 = vmatprep.mubr.bf16.mxu0 %v6806_v44  ;;  %1518 = vmatprep.mubr.bf16.mxu1 %v6705_v60 }
  0x86   : > { %1390 = vmatmul.mubr.bf16.gmra.mrb[40].mxu0 %v6828_v40  ;;  %1519 = vmatmul.mubr.bf16.gmra.mrb[40].mxu1 %v6830_v9 }
  0x87   : > { %1397 = vmatprep.mubr.bf16.mxu0 %v6834_v25  ;;  %1526 = vmatprep.mubr.bf16.mxu1 %v6762_v7 }
  0x8e   : > { %1398 = vmatmul.mubr.bf16.gmra.mrb[44].mxu0 %v6865_v62  ;;  %1527 = vmatmul.mubr.bf16.gmra.mrb[44].mxu1 %v6867_v32 }
  0x8f   : > { %1534 = vmatprep.mubr.bf16.mxu1 %v6800_v27  ;;  %1631 = vmatprep.mubr.bf16.mxu0 %v6567_v3  ;;  %v546_v3 = vsel %vm493_vm1, %v544_v42, %v545_v49  ;;  %v8375_v42 = vld [vmem:[#allocation37_spill] sm:$0xff] }
  0x96   : > { %1535 = vmatmul.mubr.bf16.gmra.mrb[48].mxu1 %v6888_v37  ;;  %1632 = vmatmul.mubr.bf16.vlgmr.msra.gmra.mrb[48].mxu0 %v6226_v57  ;;  %v5825_v57 = vld [vmem:[%s8267_s1 + $0x218] sm:$0xff]  }
  0x97   : > { %5563 = vmatpush3.bf16.msra.mxu0 %v6591_v61  ;;  %1542 = vmatprep.mubr.bf16.mxu1 %v6828_v40  ;;  %v548_v61 = vsel %vm493_vm1, %v545_v49, %v547_v63  ;;  %v8376_v49 = vld [vmem:[#allocation38_spill] sm:$0xff]  ;;  %v8377_v63 = vld [vmem:[#allocation41_spill] sm:$0xff] }
  0x98   : > { %1639 = vmatprep.mubr.bf16.mxu0 %v6635_v48  ;;  %5564 = vmatprep.subr.bf16.mxu0 %v5818_v18  ;;  %v6917_v47 = vpack.c.bf16 %v548_v61, %v546_v3  ;;  %v8385_v3 = vld [vmem:[#allocation24_spill] sm:$0xff]  ;;  %v5840_v61 = vld [vmem:[%s8269_s3 + $0x8] sm:$0xff]  }
  0x9b   : > { %5565 = vmatpush3.bf16.msra.mxu0 %v5818_v18  ;;  %v8384_v18 = vld [vmem:[#allocation18_spill] sm:$0xff] }
  0x9c   : > { %5566 = vmatprep.subr.bf16.mxu0 %v5821_v33 }
  0x9e   : > { %1543 = vmatmul.mubr.bf16.gmra.mrb[52].mxu1 %v6903_v58  ;;  %1640 = vmatmul.mubr.bf16.gmra.mrb[52].mxu0 %v6306_v31 }
  0x9f   : > { %1550 = vmatprep.mubr.bf16.mxu1 %v6865_v62  ;;  %1647 = vmatprep.mubr.bf16.mxu0 %v6707_v41 }
  0xa0   : > { %5567 = vmatpush3.bf16.msra.mxu0 %v5821_v33 }
  0xa1   : > { %5568 = vmatprep.subr.bf16.mxu0 %v5825_v57 }
  0xa4   : > { %5569 = vmatpush3.bf16.msra.mxu0 %v5825_v57  ;;  %v612_v57 = vrot.slane %v328_v39, 1 }
  0xa5   : > { %5570 = vmatprep.subr.bf16.mxu0 %v5833_v36 }
  0xa6   : > { %1551 = vmatmul.mubr.bf16.gmra.mrb[56].mxu1 %v6917_v47  ;;  %1648 = vmatmul.mubr.bf16.gmra.mrb[56].mxu0 %v6379_v15 }
  0xa7   : > { %1558 = vmatprep.mubr.bf16.mxu1 %v6207_v51  ;;  %1655 = vmatprep.mubr.bf16.mxu0 %v6764_v46 }
  0xa8   : > { %5571 = vmatpush3.bf16.msra.mxu0 %v5833_v36 }
  0xa9   : > { %5572 = vmatprep.subr.bf16.mxu0 %v5834_v16 }
  0xac   : > { %5573 = vmatpush3.bf16.msra.mxu0 %v5834_v16 }
  0xad   : > { %5574 = vmatprep.subr.bf16.mxu0 %v5835_v53 }
  0xae   : > { %1559 = vmatmul.mubr.bf16.gmra.mrb[60].mxu1 %v6931_v56  ;;  %1656 = vmatmul.mubr.bf16.gmra.mrb[60].mxu0 %v6462_v5 }
  0xaf   : > { %1566 = vmatprep.mubr.bf16.mxu1 %v6291_v23  ;;  %1663 = vmatprep.mubr.bf16.mxu0 %v6802_v45 }
  0xb0   : > { %5575 = vmatpush3.bf16.msra.mxu0 %v5835_v53 }
  0xb1   : > { %5576 = vmatprep.subr.bf16.mxu0 %v5836_v4 }
  0xb4   : > { %5577 = vmatpush3.bf16.msra.mxu0 %v5836_v4 }
  0xb6   : > { %1567 = vmatmul.mubr.bf16.gmra.mrb[64].mxu1 %v6299_v26  ;;  %1664 = vmatmul.mubr.bf16.gmra.mrb[64].mxu0 %v6510_v13 }
  0xb7   : > { %1574 = vmatprep.mubr.bf16.mxu1 %v6368_v8  ;;  %1671 = vmatprep.mubr.bf16.mxu0 %v6830_v9 }
  0xbe   : > { %1575 = vmatmul.mubr.bf16.gmra.mrb[68].mxu1 %v6411_v6  ;;  %1672 = vmatmul.mubr.bf16.gmra.mrb[68].mxu0 %v6581_v14 }
  0xbf   : > { %1582 = vmatprep.mubr.bf16.mxu1 %v6455_v11  ;;  %1679 = vmatprep.mubr.bf16.mxu0 %v6867_v32 }
  0xc6   : > { %1583 = vmatmul.mubr.bf16.gmra.mrb[72].mxu1 %v8374_v54  ;;  %1680 = vmatmul.mubr.bf16.gmra.mrb[72].mxu0 %v8375_v42 }
  0xc7   : > { %1590 = vmatprep.mubr.bf16.mxu1 %v6950_v19  ;;  %1687 = vmatprep.mubr.bf16.mxu0 %v6888_v37 }
  0xce   : > { %1591 = vmatmul.mubr.bf16.gmra.mrb[76].mxu1 %v8376_v49  ;;  %1688 = vmatmul.mubr.bf16.gmra.mrb[76].mxu0 %v8377_v63 }
  0xcf   : > { %1695 = vmatprep.mubr.bf16.mxu0 %v6903_v58  ;;  %1792 = vmatprep.mubr.bf16.mxu1 %v6306_v31  ;;  %v8380_v31 = vld [vmem:[#allocation31_spill] sm:$0xff] }
  0xd6   : > { %1696 = vmatmul.mubr.bf16.gmra.mrb[80].mxu0 %v6771_v0  ;;  %1793 = vmatmul.mubr.bf16.vlgmr.msra.gmra.mrb[80].mxu1 %v8378_v35 }
  0xd7   : > { %1703 = vmatprep.mubr.bf16.mxu0 %v6917_v47  ;;  %1800 = vmatprep.mubr.bf16.mxu1 %v6379_v15  ;;  %v8382_v15 = vld [vmem:[#allocation34_spill] sm:$0xff] }
  0xde   : > { %1704 = vmatmul.mubr.bf16.gmra.mrb[84].mxu0 %v6806_v44  ;;  %1801 = vmatmul.mubr.bf16.gmra.mrb[84].mxu1 %v8379_v55 }
  0xdf   : > { %1711 = vmatprep.mubr.bf16.mxu0 %v6931_v56  ;;  %1808 = vmatprep.mubr.bf16.mxu1 %v6462_v5  ;;  %v5837_v5 = vld [vmem:[%s8269_s3 + $0x40] sm:$0xff]  }
  0xe0   : > { %5066 = vmatprep.subr.bf16.mxu1 %v5837_v5 }
  0xe6   : > { %1712 = vmatmul.mubr.bf16.gmra.mrb[88].mxu0 %v6834_v25  ;;  %1809 = vmatmul.mubr.bf16.gmra.mrb[88].mxu1 %v8380_v31 }
  0xe7   : > { %1719 = vmatprep.mubr.bf16.mxu0 %v6299_v26  ;;  %1816 = vmatprep.mubr.bf16.mxu1 %v6510_v13  ;;  %v5838_v13 = vld [vmem:[%s8269_s3] sm:$0xff]  }
  0xe8   : > { %5067 = vmatpush3.bf16.msra.mxu1 %v5838_v13 }
  0xee   : > { %1720 = vmatmul.mubr.bf16.gmra.mrb[92].mxu0 %v8381_v30  ;;  %1817 = vmatmul.mubr.bf16.gmra.mrb[92].mxu1 %v8382_v15 }
  0xef   : > { %1727 = vmatprep.mubr.bf16.mxu0 %v6411_v6  ;;  %1824 = vmatprep.mubr.bf16.mxu1 %v6581_v14  ;;  %v616_v14 = vrot.slane %v6837_v50, 2  ;;  %v5839_v50 = vld [vmem:[%s8269_s3 + $0x48] sm:$0xff]  }
  0xf0   : > { %5068 = vmatprep.subr.bf16.mxu1 %v5839_v50 }
  0xf1   : > { %v618_v33 = vsel %vm493_vm1, %v616_v14, %v617_v38  ;;  %5069 = vmatpush3.bf16.msra.mxu1 %v5840_v61 }
  0xf6   : > { %1728 = vmatmul.mubr.bf16.gmra.mrb[96].mxu0 %v8383_v17  ;;  %1825 = vmatmul.mubr.bf16.gmra.mrb[96].mxu1 %v6633_v34  ;;  %v619_v34 = vrot.slane %v328_v39, 2 }
  0xf7   : > { %1735 = vmatprep.mubr.bf16.mxu0 %v8374_v54  ;;  %1832 = vmatprep.mubr.bf16.mxu1 %v8375_v42 }
  0xf8   : > { %v620_v2 = vsel %vm493_vm1, %v617_v38, %v619_v34 }
  0xf9   : > { %v6995_v12 = vpack.c.bf16 %v620_v2, %v618_v33 }
  0xfe   : > { %1736 = vmatmul.mubr.bf16.gmra.mrb[100].mxu0 %v8384_v18  ;;  %1833 = vmatmul.mubr.bf16.gmra.mrb[100].mxu1 %v6705_v60  ;;  %v7004_v60 = vsel %vm380_vm0, %v610_v1, %v612_v57 }
  0xff   : > { %1743 = vmatprep.mubr.bf16.mxu0 %v8376_v49  ;;  %1840 = vmatprep.mubr.bf16.mxu1 %v8377_v63 }
 0x106   : > { %1744 = vmatmul.mubr.bf16.gmra.mrb[104].mxu0 %v8385_v3  ;;  %1841 = vmatmul.mubr.bf16.gmra.mrb[104].mxu1 %v6762_v7 }
 0x107   : > { %1751 = vmatprep.mubr.bf16.mxu0 %v6995_v12  ;;  %1848 = vmatprep.mubr.bf16.mxu1 %v6771_v0  ;;  %v7014_v0 = vpack.c.bf16 %v7004_v60, %v6872_v28 }
 0x109   : > { %v4610_v36 = vpop.f32.mrb[0].mxu0  ;;  %v4682_v16 = vpop.f32.mrb[0].mxu1 }
 0x10a   : > { %v4611_v7 = vpop.f32.mrb[1].mxu0  ;;  %v4683_v22 = vpop.f32.mrb[1].mxu1 }
 0x10b   : > { %v7016_v1 = vadd.f32 %v4611_v7, %v4610_v36  ;;  %v4613_v43 = vpop.f32.mrb[2].mxu0  ;;  %v7018_v29 = vadd.f32 %v4683_v22, %v4682_v16  ;;  %v4685_v53 = vpop.f32.mrb[2].mxu1 }
 0x10c   : > { %v4614_v4 = vpop.f32.mrb[3].mxu0  ;;  %v4686_v42 = vpop.f32.mrb[3].mxu1 }
 0x10d   : > { %v7020_v63 = vadd.f32 %v4614_v4, %v4613_v43  ;;  %v7022_v35 = vadd.f32 %v4686_v42, %v4685_v53 }
 0x10e   : > { %1752 = vmatmul.mubr.bf16.gmra.mrb[108].mxu0 %v7014_v0  ;;  %1849 = vmatmul.mubr.bf16.gmra.mrb[108].mxu1 %v6800_v27  ;;  %v5842_v27 = vld [vmem:[%s8269_s3 + $0x10] sm:$0xff]  }
 0x10f   : > { %1856 = vmatprep.mubr.bf16.mxu1 %v6806_v44  ;;  %5578 = vmatprep.mubr.bf16.mxu0 %v6635_v48  ;;  %v5841_v48 = vld [vmem:[%s8269_s3 + $0x50] sm:$0xff]  }
 0x110   : > { %5070 = vmatprep.subr.bf16.mxu1 %v5841_v48 }
 0x111   : > { %v4616_v55 = vpop.f32.mrb[4].mxu0  ;;  %v4688_v31 = vpop.f32.mrb[4].mxu1  ;;  %5071 = vmatpush3.bf16.msra.mxu1 %v5842_v27 }
 0x112   : > { %v4617_v15 = vpop.f32.mrb[5].mxu0  ;;  %v4689_v5 = vpop.f32.mrb[5].mxu1 }
 0x113   : > { %v7028_v13 = vadd.f32 %v4617_v15, %v4616_v55  ;;  %v4619_v39 = vpop.f32.mrb[6].mxu0  ;;  %v7030_v14 = vadd.f32 %v4689_v5, %v4688_v31  ;;  %v4691_v38 = vpop.f32.mrb[6].mxu1 }
 0x114   : > { %v4620_v34 = vpop.f32.mrb[7].mxu0  ;;  %v4692_v33 = vpop.f32.mrb[7].mxu1 }
 0x115   : > { %v7032_v2 = vadd.f32 %v4620_v34, %v4619_v39  ;;  %v7034_v57 = vadd.f32 %v4692_v33, %v4691_v38 }
 0x116   : > { %1857 = vmatmul.mubr.bf16.gmra.mrb[112].mxu1 %v6828_v40  ;;  %5579 = vmatmul.mubr.bf16.vlgmr.msra.gmra.mrb[112].mxu0 %v6707_v41 }
 0x117   : > { %1864 = vmatprep.mubr.bf16.mxu1 %v6834_v25  ;;  %5582 = vmatprep.mubr.bf16.mxu0 %v6764_v46 }
 0x119   : > { %v4622_v44 = vpop.f32.mrb[8].mxu0  ;;  %v4694_v50 = vpop.f32.mrb[8].mxu1 }
 0x11a   : > { %v4623_v61 = vpop.f32.mrb[9].mxu0  ;;  %v4695_v36 = vpop.f32.mrb[9].mxu1 }
 0x11b   : > { %v7046_v40 = vadd.f32 %v4623_v61, %v4622_v44  ;;  %v4625_v41 = vpop.f32.mrb[10].mxu0  ;;  %v7048_v25 = vadd.f32 %v4695_v36, %v4694_v50  ;;  %v4697_v46 = vpop.f32.mrb[10].mxu1 }
 0x11c   : > { %v4626_v16 = vpop.f32.mrb[11].mxu0  ;;  %v4698_v7 = vpop.f32.mrb[11].mxu1 }
 0x11d   : > { %v7050_v22 = vadd.f32 %v4626_v16, %v4625_v41  ;;  %v7052_v43 = vadd.f32 %v4698_v7, %v4697_v46 }
 0x11e   : > { %1865 = vmatmul.mubr.bf16.gmra.mrb[116].mxu1 %v6865_v62  ;;  %5583 = vmatmul.mubr.bf16.gmra.mrb[116].mxu0 %v6802_v45  ;;  %v5843_v45 = vld [vmem:[%s8269_s3 + $0x58] sm:$0xff]  }
 0x11f   : > { %1872 = vmatprep.mubr.bf16.mxu1 %v8381_v30  ;;  %5586 = vmatprep.mubr.bf16.mxu0 %v6830_v9  ;;  %v5844_v9 = vld [vmem:[%s8269_s3 + $0x18] sm:$0xff]   ;;  %v7079_v30 = vld [vmem:[%s8268_s2] ss:$0 sm:$0xff] }
 0x120   : > { %5072 = vmatprep.subr.bf16.mxu1 %v5843_v45  ;;  %v1315_v46 = vadd.f32 %v7020_v63, %v7079_v30  ;;  %v1320_v63 = vadd.f32 %v7028_v13, %v7079_v30 }
 0x121   : > { %v4628_v53 = vpop.f32.mrb[12].mxu0  ;;  %v4700_v4 = vpop.f32.mrb[12].mxu1  ;;  %5073 = vmatpush3.bf16.msra.mxu1 %v5844_v9 }
 0x122   : > { %v4629_v42 = vpop.f32.mrb[13].mxu0  ;;  %v4701_v55 = vpop.f32.mrb[13].mxu1 }
 0x123   : > { %v7058_v31 = vadd.f32 %v4629_v42, %v4628_v53  ;;  %v4631_v15 = vpop.f32.mrb[14].mxu0  ;;  %v7060_v5 = vadd.f32 %v4701_v55, %v4700_v4  ;;  %v4703_v39 = vpop.f32.mrb[14].mxu1 }
 0x124   : > { %v4632_v38 = vpop.f32.mrb[15].mxu0  ;;  %v4704_v34 = vpop.f32.mrb[15].mxu1 }
 0x125   : > { %v7062_v33 = vadd.f32 %v4632_v38, %v4631_v15  ;;  %v7064_v62 = vadd.f32 %v4704_v34, %v4703_v39 }
 0x126   : > { %1873 = vmatmul.mubr.bf16.gmra.mrb[120].mxu1 %v6207_v51  ;;  %5587 = vmatmul.mubr.bf16.gmra.mrb[120].mxu0 %v6867_v32 }
 0x127   : > { %1880 = vmatprep.mubr.bf16.mxu1 %v8383_v17  ;;  %5590 = vmatprep.mubr.bf16.mxu0 %v6888_v37  ;;  %v1312_v37 = vadd.f32 %v7016_v1, %v7079_v30 }
 0x129   : > { %v4634_v51 = vpop.f32.mrb[16].mxu0  ;;  %v4722_v48 = vpop.f32.mrb[16].mxu1 }
 0x12a   : > { %v4635_v32 = vpop.f32.mrb[17].mxu0  ;;  %v4723_v17 = vpop.f32.mrb[17].mxu1 }
 0x12b   : > { %v7083_v27 = vadd.f32 %v4635_v32, %v4634_v51  ;;  %v4724_v44 = vadd.f32 %v4723_v17, %v4722_v48  ;;  %v4637_v50 = vpop.f32.mrb[18].mxu0  ;;  %v4725_v61 = vpop.f32.mrb[18].mxu1  ;;  %v5845_v48 = vld [vmem:[%s8269_s3 + $0x60] sm:$0xff]  }
 0x12c   : > { %v4638_v36 = vpop.f32.mrb[19].mxu0  ;;  %v4726_v41 = vpop.f32.mrb[19].mxu1  ;;  %5074 = vmatprep.subr.bf16.mxu1 %v5845_v48 }
 0x12d   : > { %v7087_v16 = vadd.f32 %v4638_v36, %v4637_v50  ;;  %v4727_v7 = vadd.f32 %v4726_v41, %v4725_v61  ;;  %v7089_v53 = vadd.f32 %v4724_v44, %v1312_v37  ;;  %v7120_v37 = vld [vmem:[%s6107_s21 + $0x198] sm:$0xff]  ;;  %v1328_v44 = vadd.f32 %v7046_v40, %v7079_v30 }
 0x12e   : > { %1881 = vmatmul.mubr.bf16.gmra.mrb[124].mxu1 %v6291_v23  ;;  %5591 = vmatmul.mubr.bf16.gmra.mrb[124].mxu0 %v6903_v58  ;;  %v633_v48 = vrot.slane %v7120_v37, 2 }
 0x12f   : > { %1888 = vmatprep.mubr.bf16.mxu1 %v8384_v18  ;;  %5594 = vmatprep.mubr.bf16.mxu0 %v6917_v47  ;;  %v7095_v1 = vadd.f32 %v4727_v7, %v1315_v46  ;;  %v1323_v47 = vadd.f32 %v7032_v2, %v7079_v30  ;;  %v5846_v2 = vld [vmem:[%s8269_s3 + $0x20] sm:$0xff]  }
 0x130   : > { %5075 = vmatpush3.bf16.msra.mxu1 %v5846_v2 }
 0x131   : > { %v4640_v4 = vpop.f32.mrb[20].mxu0  ;;  %v4728_v42 = vpop.f32.mrb[20].mxu1 }
 0x132   : > { %v4641_v55 = vpop.f32.mrb[21].mxu0  ;;  %v4729_v15 = vpop.f32.mrb[21].mxu1 }
 0x133   : > { %v7099_v39 = vadd.f32 %v4641_v55, %v4640_v4  ;;  %v4730_v38 = vadd.f32 %v4729_v15, %v4728_v42  ;;  %v4643_v34 = vpop.f32.mrb[22].mxu0  ;;  %v4731_v23 = vpop.f32.mrb[22].mxu1  ;;  %v626_v4 = vrot.slane %v7120_v37, 1  ;;  %v1331_v15 = vadd.f32 %v7050_v22, %v7079_v30 }
 0x134   : > { %v4644_v58 = vpop.f32.mrb[23].mxu0  ;;  %v4732_v18 = vpop.f32.mrb[23].mxu1 }
 0x135   : > { %v7103_v45 = vadd.f32 %v4644_v58, %v4643_v34  ;;  %v4733_v9 = vadd.f32 %v4732_v18, %v4731_v23  ;;  %v7105_v51 = vadd.f32 %v4730_v38, %v1320_v63 }
 0x136   : > { %1889 = vmatmul.mubr.bf16.gmra.mrb[128].mxu1 %v6368_v8  ;;  %5595 = vmatmul.mubr.bf16.gmra.mrb[128].mxu0 %v6931_v56  ;;  %v7123_v8 = vld [vmem:[%s6107_s21 + $0x1a0] sm:$0xff]  ;;  %v331_v56 = vld [vmem:[%s6107_s21 + $0x1a8] sm:$0x3]  ;;  %s5922_s21 = sshll.u32 %s5984_s9, 4  ;;  %s5923_s21 = int_to_ptr.vmem [resolvable:$false] %s5922_s21 }
 0x137   : > { %1896 = vmatprep.mubr.bf16.mxu1 %v8385_v3  ;;  %5598 = vmatprep.mubr.bf16.mxu0 %v6299_v26  ;;  %v7111_v13 = vadd.f32 %v4733_v9, %v1323_v47  ;;  %v627_v42 = vrot.slane %v7123_v8, 1  ;;  %v629_v55 = vrot.slane %v331_v56, 1  ;;  %v636_v2 = vrot.slane %v331_v56, 2  ;;  %s5924_s13 = scalar_lea.vmem %s5923_s21, 8192  ;;  %p5925_p0 = scmp.lt.s32.totalorder %s8217_s20, %s5923_s21 }
 0x138   : > { %p5926_p1 = scmp.lt.s32.totalorder %s5924_s13, %s5918_s8 }
 0x139   : > { %v4646_v32 = vpop.f32.mrb[24].mxu0  ;;  %v4734_v17 = vpop.f32.mrb[24].mxu1  ;;  %v628_v23 = vsel %vm380_vm0, %v626_v4, %v627_v42  ;;  %v630_v58 = vsel %vm380_vm0, %v627_v42, %v629_v55  ;;  %v5848_v4 = vld [vmem:[%s8269_s3 + $0x28] sm:$0xff]  }
 0x13a   : > { %v4647_v3 = vpop.f32.mrb[25].mxu0  ;;  %v4735_v26 = vpop.f32.mrb[25].mxu1  ;;  %p5927_p2 = por %p5926_p1, %p5925_p0 }
 0x13b   : > { %v7128_v50 = vadd.f32 %v4647_v3, %v4646_v32  ;;  %v4736_v61 = vadd.f32 %v4735_v26, %v4734_v17  ;;  %v4649_v36 = vpop.f32.mrb[26].mxu0  ;;  %v4737_v41 = vpop.f32.mrb[26].mxu1  ;;  %v692_v3 = vpack.c.bf16 %v630_v58, %v628_v23 }
 0x13c   : > { %v4650_v46 = vpop.f32.mrb[27].mxu0  ;;  %v4738_v7 = vpop.f32.mrb[27].mxu1  ;;  %p5928_p3 = pnand %p5927_p2, %p5921_p13 }
 0x13d   : > { %v7134_v63 = vadd.f32 %v4650_v46, %v4649_v36  ;;  %v4739_v38 = vadd.f32 %v4738_v7, %v4737_v41  ;;  %v7136_v34 = vadd.f32 %v4736_v61, %v1328_v44  ;;  %v1339_v61 = vadd.f32 %v7062_v33, %v7079_v30  ;;  %v5847_v33 = vld [vmem:[%s8269_s3 + $0x68] sm:$0xff]  }
 0x13e   : > { %1897 = vmatmul.mubr.bf16.gmra.mrb[132].mxu1 %v6455_v11  ;;  %5599 = vmatmul.mubr.bf16.gmra.mrb[132].mxu0 %v6411_v6  ;;  %v634_v11 = vrot.slane %v7123_v8, 2  ;;  %v1336_v6 = vadd.f32 %v7058_v31, %v7079_v30 }
 0x13f   : > { %1904 = vmatprep.mubr.bf16.mxu1 %v7014_v0  ;;  %5602 = vmatprep.mubr.bf16.mxu0 %v8374_v54  ;;  %v7142_v40 = vadd.f32 %v4739_v38, %v1331_v15  ;;  %v1344_v38 = vadd.f32 %v7083_v27, %v7079_v30 }
 0x140   : > { %v635_v31 = vsel %vm493_vm1, %v633_v48, %v634_v11  ;;  %v637_v56 = vsel %vm493_vm1, %v634_v11, %v636_v2  ;;  %5076 = vmatprep.subr.bf16.mxu1 %v5847_v33  ;;  %v1347_v48 = vadd.f32 %v7087_v16, %v7079_v30 }
 0x141   : > { %v4652_v22 = vpop.f32.mrb[28].mxu0  ;;  %v4740_v18 = vpop.f32.mrb[28].mxu1  ;;  %v693_v15 = vpack.c.bf16 %v637_v56, %v635_v31  ;;  %5077 = vmatpush3.bf16.msra.mxu1 %v5848_v4  ;;  %v1355_v31 = vadd.f32 %v7103_v45, %v7079_v30 }
 0x142   : > { %v4653_v47 = vpop.f32.mrb[29].mxu0  ;;  %v4741_v9 = vpop.f32.mrb[29].mxu1 }
 0x143   : > { %v7150_v0 = vadd.f32 %v4653_v47, %v4652_v22  ;;  %v4742_v54 = vadd.f32 %v4741_v9, %v4740_v18  ;;  %v4655_v32 = vpop.f32.mrb[30].mxu0  ;;  %v4743_v17 = vpop.f32.mrb[30].mxu1 }
 0x144   : > { %v4656_v26 = vpop.f32.mrb[31].mxu0  ;;  %v4744_v44 = vpop.f32.mrb[31].mxu1 }
 0x145   : > { %v7154_v36 = vadd.f32 %v4656_v26, %v4655_v32  ;;  %v4745_v41 = vadd.f32 %v4744_v44, %v4743_v17  ;;  %v7156_v46 = vadd.f32 %v4742_v54, %v1336_v6  ;;  %v1352_v17 = vadd.f32 %v7099_v39, %v7079_v30  ;;  %v5849_v39 = vld [vmem:[%s8269_s3 + $0x70] sm:$0xff]  }
 0x146   : > { %1905 = vmatmul.mubr.bf16.gmra.mrb[136].mxu1 %v6950_v19  ;;  %5603 = vmatmul.mubr.bf16.gmra.mrb[136].mxu0 %v8376_v49 }
 0x147   : > { %1912 = vmatprep.mubr.bf16.mxu1 %v692_v3  ;;  %5606 = vmatprep.mubr.bf16.mxu0 %v6995_v12  ;;  %v7163_v7 = vadd.f32 %v4745_v41, %v1339_v61  ;;  %v691_v12 = vpack.c.bf16 %v7123_v8, %v7120_v37 }
 0x148   : > { %5078 = vmatprep.subr.bf16.mxu1 %v5849_v39 }
 0x149   : > { %v4658_v19 = vpop.f32.mrb[32].mxu0  ;;  %v4746_v42 = vpop.f32.mrb[32].mxu1 }
 0x14a   : > { %v4659_v49 = vpop.f32.mrb[33].mxu0  ;;  %v4747_v55 = vpop.f32.mrb[33].mxu1 }
 0x14b   : > { %v7175_v23 = vadd.f32 %v4659_v49, %v4658_v19  ;;  %v4748_v58 = vadd.f32 %v4747_v55, %v4746_v42  ;;  %v4661_v22 = vpop.f32.mrb[34].mxu0  ;;  %v4749_v18 = vpop.f32.mrb[34].mxu1  ;;  %v5850_v42 = vld [vmem:[%s8269_s3 + $0x30] sm:$0xff]  }
 0x14c   : > { %v4662_v47 = vpop.f32.mrb[35].mxu0  ;;  %v4750_v9 = vpop.f32.mrb[35].mxu1  ;;  %5079 = vmatpush3.bf16.msra.mxu1 %v5850_v42 }
 0x14d   : > { %v7179_v11 = vadd.f32 %v4662_v47, %v4661_v22  ;;  %v4751_v2 = vadd.f32 %v4750_v9, %v4749_v18  ;;  %v7181_v6 = vadd.f32 %v4748_v58, %v1344_v38  ;;  %v1360_v38 = vadd.f32 %v7128_v50, %v7079_v30  ;;  %v5852_v9 = vld [vmem:[%s8269_s3 + $0x80] sm:$0xff]   ;;  %v5853_v50 = vld [vmem:[%s8269_s3 + $0xc8] sm:$0xff]  }
 0x14e   : > { %1913 = vmatmul.mubr.bf16.gmra.mrb[140].mxu1 %v691_v12  ;;  %5607 = vmatmul.mubr.bf16.gmra.mrb[140].mxu0 %v693_v15  ;;  %v5851_v15 = vld [vmem:[%s8269_s3 + $0xc0] sm:$0xff]  }
 0x14f   : > { %v7183_v37 = vadd.f32 %v4751_v2, %v1347_v48  ;;  %5178 = vmatprep.subr.bf16.mxu0 %v5851_v15  ;;  %v1371_v15 = vadd.f32 %v7154_v36, %v7079_v30  ;;  %v5859_v36 = vld [vmem:[%s8269_s3 + $0xd8] sm:$0xff]  }
 0x150   : > { %5179 = vmatpush3.bf16.msra.mxu0 %v5852_v9  ;;  %v5855_v9 = vld [vmem:[%s8269_s3 + $0x78] sm:$0xff]  }
 0x151   : > { %v4664_v27 = vpop.f32.mrb[36].mxu0  ;;  %v4752_v8 = vpop.f32.mrb[36].mxu1  ;;  %5180 = vmatprep.subr.bf16.mxu0 %v5853_v50  ;;  %5080 = vmatprep.subr.bf16.mxu1 %v5855_v9 }
 0x152   : > { %v4665_v54 = vpop.f32.mrb[37].mxu0  ;;  %v4753_v32 = vpop.f32.mrb[37].mxu1 }
 0x153   : > { %v7187_v3 = vadd.f32 %v4665_v54, %v4664_v27  ;;  %v4754_v26 = vadd.f32 %v4753_v32, %v4752_v8  ;;  %v4667_v16 = vpop.f32.mrb[38].mxu0  ;;  %v4755_v44 = vpop.f32.mrb[38].mxu1  ;;  %v1363_v27 = vadd.f32 %v7134_v63, %v7079_v30 }
 0x154   : > { %v4668_v61 = vpop.f32.mrb[39].mxu0  ;;  %v4756_v41 = vpop.f32.mrb[39].mxu1 }
 0x155   : > { %v7191_v56 = vadd.f32 %v4668_v61, %v4667_v16  ;;  %v4757_v33 = vadd.f32 %v4756_v41, %v4755_v44  ;;  %v7193_v4 = vadd.f32 %v4754_v26, %v1352_v17  ;;  %v5854_v26 = vld [vmem:[%s8269_s3 + $0x88] sm:$0xff]   ;;  %v5856_v41 = vld [vmem:[%s8269_s3 + $0xd0] sm:$0xff]  }
 0x156   : > { %5181 = vmatpush3.bf16.msra.mxu0 %v5854_v26 }
 0x157   : > { %v7195_v19 = vadd.f32 %v4757_v33, %v1355_v31  ;;  %v1368_v31 = vadd.f32 %v7150_v0, %v7079_v30  ;;  %5182 = vmatprep.subr.bf16.mxu0 %v5856_v41  ;;  %v5982_v0 = vmov 0.0  }
 0x158   : > { %2114 = vst [vmem:[#allocation2] sm:$0xff] %v5982_v0  ;;  %2115 = vst [vmem:[#allocation2 + $0x8] sm:$0xff] %v5982_v0 }
 0x159   : > { %v4670_v49 = vpop.f32.mrb[40].mxu0  ;;  %v4758_v55 = vpop.f32.mrb[40].mxu1  ;;  %2116 = vst [vmem:[#allocation2 + $0x10] sm:$0x3] %v5982_v0  ;;  %2118 = vst [vmem:[#allocation2 + $0x198] sm:$0xff] %v5982_v0 }
 0x15a   : > { %v4671_v12 = vpop.f32.mrb[41].mxu0  ;;  %v4759_v45 = vpop.f32.mrb[41].mxu1  ;;  %2119 = vst [vmem:[#allocation2 + $0x1a0] sm:$0xff] %v5982_v0  ;;  %2120 = vst [vmem:[#allocation2 + $0x1a8] sm:$0x3] %v5982_v0 }
 0x15b   : > { %v7208_v58 = vadd.f32 %v4671_v12, %v4670_v49  ;;  %v4760_v22 = vadd.f32 %v4759_v45, %v4758_v55  ;;  %v4673_v18 = vpop.f32.mrb[42].mxu0  ;;  %v4761_v47 = vpop.f32.mrb[42].mxu1  ;;  %v5858_v55 = vld [vmem:[%s8269_s3 + $0x90] sm:$0xff]   ;;  %2122 = vst [vmem:[#allocation2 + $0x18] sm:$0x1] %v5982_v0 }
 0x15c   : > { %v4674_v48 = vpop.f32.mrb[43].mxu0  ;;  %v4762_v2 = vpop.f32.mrb[43].mxu1  ;;  %5183 = vmatpush3.bf16.msra.mxu0 %v5858_v55  ;;  %2123 = vst [vmem:[#allocation2 + $0x30] sm:$0x1] %v5982_v0  ;;  %2124 = vst [vmem:[#allocation2 + $0x48] sm:$0x1] %v5982_v0 }
 0x15d   : > { %v7215_v8 = vadd.f32 %v4674_v48, %v4673_v18  ;;  %v4763_v54 = vadd.f32 %v4762_v2, %v4761_v47  ;;  %v7217_v32 = vadd.f32 %v4760_v22, %v1360_v38  ;;  %2125 = vst [vmem:[#allocation2 + $0x60] sm:$0x1] %v5982_v0  ;;  %2126 = vst [vmem:[#allocation2 + $0x78] sm:$0x1] %v5982_v0  ;;  %v5857_v48 = vld [vmem:[%s8269_s3 + $0x38] sm:$0xff]   ;;  %5184 = vmatprep.subr.bf16.mxu0 %v5859_v36  ;;  %v5863_v36 = vld [vmem:[%s8269_s3 + $0xe8] sm:$0xff]  }
 0x15e   : > { %2127 = vst [vmem:[#allocation2 + $0x90] sm:$0x1] %v5982_v0  ;;  %2128 = vst [vmem:[#allocation2 + $0xa8] sm:$0x1] %v5982_v0  ;;  %v5860_v2 = vld [vmem:[%s8269_s3 + $0x98] sm:$0xff]   ;;  %5081 = vmatpush3.bf16.msra.mxu1 %v5857_v48 }
 0x15f   : > { %v7222_v17 = vadd.f32 %v4763_v54, %v1363_v27  ;;  %2129 = vst [vmem:[#allocation2 + $0xc0] sm:$0x1] %v5982_v0  ;;  %2130 = vst [vmem:[#allocation2 + $0xd8] sm:$0x1] %v5982_v0 }
 0x160   : > { %2131 = vst [vmem:[#allocation2 + $0xf0] sm:$0x1] %v5982_v0  ;;  %2132 = vst [vmem:[#allocation2 + $0x108] sm:$0x1] %v5982_v0  ;;  %5185 = vmatpush3.bf16.msra.mxu0 %v5860_v2  ;;  %v5864_v2 = vld [vmem:[%s8269_s3 + $0xa8] sm:$0xff]  }
 0x161   : > { %v4676_v16 = vpop.f32.mrb[44].mxu0  ;;  %v4764_v44 = vpop.f32.mrb[44].mxu1  ;;  %2133 = vst [vmem:[#allocation2 + $0x120] sm:$0x1] %v5982_v0  ;;  %2134 = vst [vmem:[#allocation2 + $0x138] sm:$0x1] %v5982_v0 }
 0x162   : > { %v4677_v63 = vpop.f32.mrb[45].mxu0  ;;  %v4765_v61 = vpop.f32.mrb[45].mxu1  ;;  %2135 = vst [vmem:[#allocation2 + $0x150] sm:$0x1] %v5982_v0  ;;  %2136 = vst [vmem:[#allocation2 + $0x168] sm:$0x1] %v5982_v0 }
 0x163   : > { %v7232_v33 = vadd.f32 %v4677_v63, %v4676_v16  ;;  %v4766_v39 = vadd.f32 %v4765_v61, %v4764_v44  ;;  %v4679_v42 = vpop.f32.mrb[46].mxu0  ;;  %v4767_v49 = vpop.f32.mrb[46].mxu1  ;;  %2137 = vst [vmem:[#allocation2 + $0x180] sm:$0x1] %v5982_v0  ;;  %2138 = vst [vmem:[#allocation2 + $0x29] sm:$0x1] %v5982_v0  ;;  %v1376_v44 = vadd.f32 %v7175_v23, %v7079_v30 }
 0x164   : > { %v4680_v12 = vpop.f32.mrb[47].mxu0  ;;  %v4768_v45 = vpop.f32.mrb[47].mxu1  ;;  %2139 = vst [vmem:[#allocation2 + $0x41] sm:$0x1] %v5982_v0  ;;  %2140 = vst [vmem:[#allocation2 + $0x59] sm:$0x1] %v5982_v0 }
 0x165   : > { %v7239_v38 = vadd.f32 %v4680_v12, %v4679_v42  ;;  %v4769_v22 = vadd.f32 %v4768_v45, %v4767_v49  ;;  %v7241_v18 = vadd.f32 %v4766_v39, %v1368_v31  ;;  %2141 = vst [vmem:[#allocation2 + $0x71] sm:$0x1] %v5982_v0  ;;  %2142 = vst [vmem:[#allocation2 + $0x89] sm:$0x1] %v5982_v0  ;;  %v5861_v16 = vld [vmem:[%s8269_s3 + $0xe0] sm:$0xff]   ;;  %v2219_v45 = vld [vmem:[#allocation2 + $0x9] sm:$0xff] }
 0x166   : > { %2143 = vst [vmem:[#allocation2 + $0xa1] sm:$0x1] %v5982_v0  ;;  %2144 = vst [vmem:[#allocation2 + $0xb9] sm:$0x1] %v5982_v0  ;;  %v5862_v39 = vld [vmem:[%s8269_s3 + $0xa0] sm:$0xff]   ;;  %v1379_v42 = vadd.f32 %v7179_v11, %v7079_v30  ;;  %5186 = vmatprep.subr.bf16.mxu0 %v5861_v16  ;;  %v5865_v16 = vld [vmem:[%s8269_s3 + $0xf0] sm:$0xff]  }
 0x167   : > { %2145 = vst [vmem:[#allocation2 + $0xd1] sm:$0x1] %v5982_v0  ;;  %2146 = vst [vmem:[#allocation2 + $0xe9] sm:$0x1] %v5982_v0  ;;  %v7246_v47 = vadd.f32 %v4769_v22, %v1371_v15  ;;  %v2218_v12 = vld [vmem:[#allocation2 + $0x1] sm:$0xff]  ;;  %5187 = vmatpush3.bf16.msra.mxu0 %v5862_v39  ;;  %v1387_v39 = vadd.f32 %v7191_v56, %v7079_v30  ;;  %v5870_v56 = vld [vmem:[%s8269_s3 + $0xb8] sm:$0xff]  }
 0x168   : > { %2147 = vst [vmem:[#allocation2 + $0x101] sm:$0x1] %v5982_v0  ;;  %2148 = vst [vmem:[#allocation2 + $0x119] sm:$0x1] %v5982_v0  ;;  %v2476_v9 = vpack.c.bf16 %v2219_v45, %v2218_v12  ;;  %5188 = vmatprep.subr.bf16.mxu0 %v5863_v36 }
 0x169   : > { %2149 = vst [vmem:[#allocation2 + $0x131] sm:$0x1] %v5982_v0  ;;  %2150 = vst [vmem:[#allocation2 + $0x149] sm:$0x1] %v5982_v0  ;;  %v4770_v27 = vpop.f32.mrb[48].mxu1  ;;  %v4834_v54 = vpop.f32.mrb[48].mxu0 }
 0x16a   : > { %2151 = vst [vmem:[#allocation2 + $0x161] sm:$0x1] %v5982_v0  ;;  %2152 = vst [vmem:[#allocation2 + $0x179] sm:$0x1] %v5982_v0  ;;  %v4771_v50 = vpop.f32.mrb[49].mxu1  ;;  %v4835_v26 = vpop.f32.mrb[49].mxu0  ;;  %3234 = vmatprep.mubr.bf16.mxu1 %v2476_v9 }
 0x16b   : > { %2153 = vst [vmem:[#allocation2 + $0x191] sm:$0x1] %v5982_v0  ;;  %v4772_v63 = vadd.f32 %v4771_v50, %v4770_v27  ;;  %v4836_v61 = vadd.f32 %v4835_v26, %v4834_v54  ;;  %v4773_v41 = vpop.f32.mrb[50].mxu1  ;;  %v4837_v31 = vpop.f32.mrb[50].mxu0  ;;  %5189 = vmatpush3.bf16.msra.mxu0 %v5864_v2  ;;  %v5983_v54 = vmov 0.0|0.0  }
 0x16c   : > { %v4774_v49 = vpop.f32.mrb[51].mxu1  ;;  %v4838_v55 = vpop.f32.mrb[51].mxu0  ;;  %3235 = vmatmul.mubr.bf16.vlgmr.msra.gmra.mrb[144].mxu1 %v5983_v54  ;;  %5190 = vmatprep.subr.bf16.mxu0 %v5865_v16 }
 0x16d   : > { %v7267_v15 = vadd.f32 %v4772_v63, %v1376_v44  ;;  %v7270_v23 = vadd.f32 %v4836_v61, %v7089_v53  ;;  %v4775_v22 = vadd.f32 %v4774_v49, %v4773_v41  ;;  %v4839_v0 = vadd.f32 %v4838_v55, %v4837_v31  ;;  %v5867_v31 = vld [vmem:[%s8269_s3 + $0xb0] sm:$0xff]  }
 0x16f   : > { %v7275_v48 = vadd.f32 %v4775_v22, %v1379_v42  ;;  %v7278_v11 = vadd.f32 %v4839_v0, %v7095_v1  ;;  %v1384_v1 = vadd.f32 %v7187_v3, %v7079_v30  ;;  %5191 = vmatpush3.bf16.msra.mxu0 %v5867_v31  ;;  %v5869_v22 = vld [vmem:[%s8269_s3 + $0xf8] sm:$0xff]  }
 0x170   : > { %5192 = vmatprep.subr.bf16.mxu0 %v5869_v22  ;;  %v1400_v22 = vadd.f32 %v7232_v33, %v7079_v30 }
 0x171   : > { %v4776_v53 = vpop.f32.mrb[52].mxu1  ;;  %v4840_v27 = vpop.f32.mrb[52].mxu0 }
 0x172   : > { %v4777_v50 = vpop.f32.mrb[53].mxu1  ;;  %v4841_v26 = vpop.f32.mrb[53].mxu0 }
 0x173   : > { %v4778_v44 = vadd.f32 %v4777_v50, %v4776_v53  ;;  %v4842_v63 = vadd.f32 %v4841_v26, %v4840_v27  ;;  %v4779_v61 = vpop.f32.mrb[54].mxu1  ;;  %v4843_v41 = vpop.f32.mrb[54].mxu0  ;;  %5193 = vmatpush3.bf16.msra.mxu0 %v5870_v56  ;;  %v1392_v27 = vadd.f32 %v7208_v58, %v7079_v30 }
 0x174   : > { %v4780_v42 = vpop.f32.mrb[55].mxu1  ;;  %v4844_v49 = vpop.f32.mrb[55].mxu0 }
 0x175   : > { %v7293_v55 = vadd.f32 %v4778_v44, %v1384_v1  ;;  %v7296_v12 = vadd.f32 %v4842_v63, %v7105_v51  ;;  %v4781_v3 = vadd.f32 %v4780_v42, %v4779_v61  ;;  %v4845_v45 = vadd.f32 %v4844_v49, %v4843_v41 }
 0x177   : > { %v7301_v0 = vadd.f32 %v4781_v3, %v1387_v39  ;;  %v7304_v36 = vadd.f32 %v4845_v45, %v7111_v13  ;;  %v1395_v13 = vadd.f32 %v7215_v8, %v7079_v30  ;;  %v5866_v8 = vld [vmem:[%s8269_s3 + $0x140] sm:$0xff]  }
 0x178   : > { %v5868_v3 = vld [vmem:[%s8269_s3 + $0x100] sm:$0xff]   ;;  %5290 = vmatprep.subr.bf16.mxu1 %v5866_v8 }
 0x179   : > { %v4782_v9 = vpop.f32.mrb[56].mxu1  ;;  %v4846_v51 = vpop.f32.mrb[56].mxu0  ;;  %5291 = vmatpush3.bf16.msra.mxu1 %v5868_v3 }
 0x17a   : > { %v4783_v2 = vpop.f32.mrb[57].mxu1  ;;  %v4847_v53 = vpop.f32.mrb[57].mxu0 }
 0x17b   : > { %v4784_v54 = vadd.f32 %v4783_v2, %v4782_v9  ;;  %v4848_v50 = vadd.f32 %v4847_v53, %v4846_v51  ;;  %v4785_v26 = vpop.f32.mrb[58].mxu1  ;;  %v4849_v16 = vpop.f32.mrb[58].mxu0  ;;  %v1403_v2 = vadd.f32 %v7239_v38, %v7079_v30  ;;  %v5871_v38 = vld [vmem:[%s8269_s3 + $0x148] sm:$0xff]  }
 0x17c   : > { %v4786_v1 = vpop.f32.mrb[59].mxu1  ;;  %v4850_v44 = vpop.f32.mrb[59].mxu0  ;;  %5292 = vmatprep.subr.bf16.mxu1 %v5871_v38 }
 0x17d   : > { %v7313_v63 = vadd.f32 %v4784_v54, %v1392_v27  ;;  %v7316_v61 = vadd.f32 %v4848_v50, %v7136_v34  ;;  %v4787_v41 = vadd.f32 %v4786_v1, %v4785_v26  ;;  %v4851_v31 = vadd.f32 %v4850_v44, %v4849_v16 }
 0x17f   : > { %v7318_v39 = vadd.f32 %v4787_v41, %v1395_v13  ;;  %v7321_v58 = vadd.f32 %v4851_v31, %v7142_v40  ;;  %v5872_v41 = vld [vmem:[%s8269_s3 + $0x108] sm:$0xff]  }
 0x180   : > { %5293 = vmatpush3.bf16.msra.mxu1 %v5872_v41 }
 0x181   : > { %v4788_v42 = vpop.f32.mrb[60].mxu1  ;;  %v4852_v49 = vpop.f32.mrb[60].mxu0 }
 0x182   : > { %v4789_v45 = vpop.f32.mrb[61].mxu1  ;;  %v4853_v34 = vpop.f32.mrb[61].mxu0 }
 0x183   : > { %v4790_v56 = vadd.f32 %v4789_v45, %v4788_v42  ;;  %v4854_v9 = vadd.f32 %v4853_v34, %v4852_v49  ;;  %v4791_v51 = vpop.f32.mrb[62].mxu1  ;;  %v4855_v40 = vpop.f32.mrb[62].mxu0  ;;  %v1408_v42 = vadd.f32 %v7018_v29, %v7079_v30  ;;  %v1411_v45 = vadd.f32 %v7022_v35, %v7079_v30 }
 0x184   : > { %v4792_v53 = vpop.f32.mrb[63].mxu1  ;;  %v4856_v27 = vpop.f32.mrb[63].mxu0  ;;  %v1416_v35 = vadd.f32 %v7030_v14, %v7079_v30 }
 0x185   : > { %v7333_v54 = vadd.f32 %v4790_v56, %v1400_v22  ;;  %v7336_v50 = vadd.f32 %v4854_v9, %v7156_v46  ;;  %v4793_v26 = vadd.f32 %v4792_v53, %v4791_v51  ;;  %v4857_v16 = vadd.f32 %v4856_v27, %v4855_v40 }
 0x187   : > { %v7338_v13 = vadd.f32 %v4793_v26, %v1403_v2  ;;  %v7341_v33 = vadd.f32 %v4857_v16, %v7163_v7 }
 0x189   : > { %v4794_v1 = vpop.f32.mrb[64].mxu1  ;;  %v4858_v44 = vpop.f32.mrb[64].mxu0 }
 0x18a   : > { %v4795_v31 = vpop.f32.mrb[65].mxu1  ;;  %v4859_v46 = vpop.f32.mrb[65].mxu0 }
 0x18b   : > { %v4796_v49 = vadd.f32 %v4795_v31, %v4794_v1  ;;  %v4860_v8 = vadd.f32 %v4859_v46, %v4858_v44  ;;  %v4797_v3 = vpop.f32.mrb[66].mxu1  ;;  %v4861_v7 = vpop.f32.mrb[66].mxu0 }
 0x18c   : > { %v4798_v34 = vpop.f32.mrb[67].mxu1  ;;  %v4862_v22 = vpop.f32.mrb[67].mxu0 }
 0x18d   : > { %v7353_v56 = vadd.f32 %v4796_v49, %v1408_v42  ;;  %v7356_v9 = vadd.f32 %v4860_v8, %v7181_v6  ;;  %v4799_v51 = vadd.f32 %v4798_v34, %v4797_v3  ;;  %v4863_v40 = vadd.f32 %v4862_v22, %v4861_v7  ;;  %v5874_v34 = vld [vmem:[%s8269_s3 + $0x110] sm:$0xff]  }
 0x18e   : > { %v1419_v6 = vadd.f32 %v7034_v57, %v7079_v30  ;;  %v5873_v57 = vld [vmem:[%s8269_s3 + $0x150] sm:$0xff]  }
 0x18f   : > { %v7358_v2 = vadd.f32 %v4799_v51, %v1411_v45  ;;  %v7361_v29 = vadd.f32 %v4863_v40, %v7183_v37  ;;  %v1424_v51 = vadd.f32 %v7048_v25, %v7079_v30  ;;  %5294 = vmatprep.subr.bf16.mxu1 %v5873_v57 }
 0x190   : > { %5295 = vmatpush3.bf16.msra.mxu1 %v5874_v34 }
 0x191   : > { %v4800_v53 = vpop.f32.mrb[68].mxu1  ;;  %v4864_v27 = vpop.f32.mrb[68].mxu0 }
 0x192   : > { %v4801_v26 = vpop.f32.mrb[69].mxu1  ;;  %v4865_v16 = vpop.f32.mrb[69].mxu0 }
 0x193   : > { %v4802_v1 = vadd.f32 %v4801_v26, %v4800_v53  ;;  %v4866_v44 = vadd.f32 %v4865_v16, %v4864_v27  ;;  %v4803_v38 = vpop.f32.mrb[70].mxu1  ;;  %v4867_v41 = vpop.f32.mrb[70].mxu0  ;;  %v1427_v26 = vadd.f32 %v7052_v43, %v7079_v30  ;;  %v1432_v43 = vadd.f32 %v7060_v5, %v7079_v30 }
 0x194   : > { %v4804_v31 = vpop.f32.mrb[71].mxu1  ;;  %v4868_v46 = vpop.f32.mrb[71].mxu0 }
 0x195   : > { %v7367_v42 = vadd.f32 %v4802_v1, %v1416_v35  ;;  %v7370_v37 = vadd.f32 %v4866_v44, %v7193_v4  ;;  %v4805_v49 = vadd.f32 %v4804_v31, %v4803_v38  ;;  %v4869_v8 = vadd.f32 %v4868_v46, %v4867_v41 }
 0x197   : > { %v7372_v3 = vadd.f32 %v4805_v49, %v1419_v6  ;;  %v7375_v14 = vadd.f32 %v4869_v8, %v7195_v19 }
 0x199   : > { %v4806_v7 = vpop.f32.mrb[72].mxu1  ;;  %v4870_v45 = vpop.f32.mrb[72].mxu0 }
 0x19a   : > { %v4807_v22 = vpop.f32.mrb[73].mxu1  ;;  %v4871_v4 = vpop.f32.mrb[73].mxu0 }
 0x19b   : > { %v4808_v40 = vadd.f32 %v4807_v22, %v4806_v7  ;;  %v4872_v53 = vadd.f32 %v4871_v4, %v4870_v45  ;;  %v4809_v27 = vpop.f32.mrb[74].mxu1  ;;  %v4873_v19 = vpop.f32.mrb[74].mxu0 }
 0x19c   : > { %v4810_v16 = vpop.f32.mrb[75].mxu1  ;;  %v4874_v35 = vpop.f32.mrb[75].mxu0 }
 0x19d   : > { %v7387_v1 = vadd.f32 %v4808_v40, %v1424_v51  ;;  %v7390_v44 = vadd.f32 %v4872_v53, %v7217_v32  ;;  %v4811_v38 = vadd.f32 %v4810_v16, %v4809_v27  ;;  %v4875_v41 = vadd.f32 %v4874_v35, %v4873_v19 }
 0x19e   : > { %v1435_v32 = vadd.f32 %v7064_v62, %v7079_v30 }
 0x19f   : > { %v7392_v6 = vadd.f32 %v4811_v38, %v1427_v26  ;;  %v7395_v25 = vadd.f32 %v4875_v41, %v7222_v17 }
 0x1a1   : > { %v4812_v31 = vpop.f32.mrb[76].mxu1  ;;  %v4876_v46 = vpop.f32.mrb[76].mxu0 }
 0x1a2   : > { %v4813_v49 = vpop.f32.mrb[77].mxu1  ;;  %v4877_v8 = vpop.f32.mrb[77].mxu0 }
 0x1a3   : > { %v4814_v7 = vadd.f32 %v4813_v49, %v4812_v31  ;;  %v4878_v45 = vadd.f32 %v4877_v8, %v4876_v46  ;;  %v4815_v57 = vpop.f32.mrb[78].mxu1  ;;  %v4879_v34 = vpop.f32.mrb[78].mxu0 }
 0x1a4   : > { %v4816_v22 = vpop.f32.mrb[79].mxu1  ;;  %v4880_v4 = vpop.f32.mrb[79].mxu0 }
 0x1a5   : > { %v7401_v51 = vadd.f32 %v4814_v7, %v1432_v43  ;;  %v7404_v17 = vadd.f32 %v4878_v45, %v7241_v18  ;;  %v4817_v40 = vadd.f32 %v4816_v22, %v4815_v57  ;;  %v4881_v53 = vadd.f32 %v4880_v4, %v4879_v34  ;;  %v5876_v7 = vld [vmem:[%s8269_s3 + $0x118] sm:$0xff]   ;;  %v5877_v45 = vld [vmem:[%s8269_s3 + $0x1c0] sm:$0xff]  }
 0x1a6   : > { %5402 = vmatprep.subr.bf16.mxu0 %v5877_v45 }
 0x1a7   : > { %v7406_v27 = vadd.f32 %v4817_v40, %v1435_v32  ;;  %v7409_v5 = vadd.f32 %v4881_v53, %v7246_v47  ;;  %v5875_v47 = vld [vmem:[%s8269_s3 + $0x158] sm:$0xff]  }
 0x1a8   : > { %5296 = vmatprep.subr.bf16.mxu1 %v5875_v47 }
 0x1a9   : > { %v4882_v19 = vpop.f32.mrb[80].mxu0  ;;  %v4946_v26 = vpop.f32.mrb[80].mxu1  ;;  %5297 = vmatpush3.bf16.msra.mxu1 %v5876_v7 }
 0x1aa   : > { %v4883_v16 = vpop.f32.mrb[81].mxu0  ;;  %v4947_v35 = vpop.f32.mrb[81].mxu1 }
 0x1ab   : > { %v4884_v38 = vadd.f32 %v4883_v16, %v4882_v19  ;;  %v4948_v62 = vadd.f32 %v4947_v35, %v4946_v26  ;;  %v4885_v30 = vpop.f32.mrb[82].mxu0  ;;  %v4949_v41 = vpop.f32.mrb[82].mxu1 }
 0x1ac   : > { %v4886_v31 = vpop.f32.mrb[83].mxu0  ;;  %v4950_v46 = vpop.f32.mrb[83].mxu1 }
 0x1ad   : > { %v7412_v18 = vadd.f32 %v4884_v38, %v7267_v15  ;;  %v4887_v49 = vadd.f32 %v4886_v31, %v4885_v30  ;;  %v4951_v8 = vadd.f32 %v4950_v46, %v4949_v41  ;;  %v7415_v43 = vadd.f32 %v4948_v62, %v7270_v23  ;;  %v5880_v30 = vld [vmem:[%s8269_s3 + $0x120] sm:$0xff]  }
 0x1af   : > { %v7427_v15 = vadd.f32 %v4887_v49, %v7275_v48  ;;  %v7430_v57 = vadd.f32 %v4951_v8, %v7278_v11  ;;  %v5879_v48 = vld [vmem:[%s8269_s3 + $0x160] sm:$0xff]  }
 0x1b0   : > { %5298 = vmatprep.subr.bf16.mxu1 %v5879_v48 }
 0x1b1   : > { %v4888_v23 = vpop.f32.mrb[84].mxu0  ;;  %v4952_v34 = vpop.f32.mrb[84].mxu1  ;;  %5299 = vmatpush3.bf16.msra.mxu1 %v5880_v30 }
 0x1b2   : > { %v4889_v32 = vpop.f32.mrb[85].mxu0  ;;  %v4953_v22 = vpop.f32.mrb[85].mxu1 }
 0x1b3   : > { %v4890_v4 = vadd.f32 %v4889_v32, %v4888_v23  ;;  %v4954_v40 = vadd.f32 %v4953_v22, %v4952_v34  ;;  %v4891_v53 = vpop.f32.mrb[86].mxu0  ;;  %v4955_v19 = vpop.f32.mrb[86].mxu1 }
 0x1b4   : > { %v4892_v26 = vpop.f32.mrb[87].mxu0  ;;  %v4956_v16 = vpop.f32.mrb[87].mxu1 }
 0x1b5   : > { %v7436_v11 = vadd.f32 %v4890_v4, %v7293_v55  ;;  %v4893_v35 = vadd.f32 %v4892_v26, %v4891_v53  ;;  %v4957_v38 = vadd.f32 %v4956_v16, %v4955_v19  ;;  %v7439_v62 = vadd.f32 %v4954_v40, %v7296_v12 }
 0x1b7   : > { %v7445_v41 = vadd.f32 %v4893_v35, %v7301_v0  ;;  %v7448_v31 = vadd.f32 %v4957_v38, %v7304_v36 }
 0x1b9   : > { %v4894_v46 = vpop.f32.mrb[88].mxu0  ;;  %v4958_v55 = vpop.f32.mrb[88].mxu1 }
 0x1ba   : > { %v4895_v49 = vpop.f32.mrb[89].mxu0  ;;  %v4959_v8 = vpop.f32.mrb[89].mxu1 }
 0x1bb   : > { %v4896_v47 = vadd.f32 %v4895_v49, %v4894_v46  ;;  %v4960_v7 = vadd.f32 %v4959_v8, %v4958_v55  ;;  %v4897_v12 = vpop.f32.mrb[90].mxu0  ;;  %v4961_v45 = vpop.f32.mrb[90].mxu1  ;;  %v5884_v8 = vld [vmem:[%s8269_s3 + $0x128] sm:$0xff]  }
 0x1bc   : > { %v4898_v23 = vpop.f32.mrb[91].mxu0  ;;  %v4962_v34 = vpop.f32.mrb[91].mxu1 }
 0x1bd   : > { %v7451_v32 = vadd.f32 %v4896_v47, %v7313_v63  ;;  %v4899_v22 = vadd.f32 %v4898_v23, %v4897_v12  ;;  %v4963_v0 = vadd.f32 %v4962_v34, %v4961_v45  ;;  %v7454_v4 = vadd.f32 %v4960_v7, %v7316_v61  ;;  %v5883_v61 = vld [vmem:[%s8269_s3 + $0x168] sm:$0xff]  }
 0x1be   : > { %5300 = vmatprep.subr.bf16.mxu1 %v5883_v61 }
 0x1bf   : > { %v7457_v36 = vadd.f32 %v4899_v22, %v7318_v39  ;;  %v7460_v40 = vadd.f32 %v4963_v0, %v7321_v58  ;;  %5301 = vmatpush3.bf16.msra.mxu1 %v5884_v8 }
 0x1c1   : > { %v4900_v53 = vpop.f32.mrb[92].mxu0  ;;  %v4964_v19 = vpop.f32.mrb[92].mxu1 }
 0x1c2   : > { %v4901_v26 = vpop.f32.mrb[93].mxu0  ;;  %v4965_v16 = vpop.f32.mrb[93].mxu1 }
 0x1c3   : > { %v4902_v48 = vadd.f32 %v4901_v26, %v4900_v53  ;;  %v4966_v35 = vadd.f32 %v4965_v16, %v4964_v19  ;;  %v4903_v38 = vpop.f32.mrb[94].mxu0  ;;  %v4967_v63 = vpop.f32.mrb[94].mxu1 }
 0x1c4   : > { %v4904_v30 = vpop.f32.mrb[95].mxu0  ;;  %v4968_v46 = vpop.f32.mrb[95].mxu1 }
 0x1c5   : > { %v7466_v39 = vadd.f32 %v4902_v48, %v7333_v54  ;;  %v4905_v55 = vadd.f32 %v4904_v30, %v4903_v38  ;;  %v4969_v58 = vadd.f32 %v4968_v46, %v4967_v63  ;;  %v7469_v49 = vadd.f32 %v4966_v35, %v7336_v50 }
 0x1c7   : > { %v7475_v47 = vadd.f32 %v4905_v55, %v7338_v13  ;;  %v7478_v7 = vadd.f32 %v4969_v58, %v7341_v33 }
 0x1c9   : > { %v4906_v12 = vpop.f32.mrb[96].mxu0  ;;  %v4970_v54 = vpop.f32.mrb[96].mxu1 }
 0x1ca   : > { %v4907_v45 = vpop.f32.mrb[97].mxu0  ;;  %v4971_v23 = vpop.f32.mrb[97].mxu1 }
 0x1cb   : > { %v4908_v34 = vadd.f32 %v4907_v45, %v4906_v12  ;;  %v4972_v22 = vadd.f32 %v4971_v23, %v4970_v54  ;;  %v4909_v50 = vpop.f32.mrb[98].mxu0  ;;  %v4973_v0 = vpop.f32.mrb[98].mxu1  ;;  %v5888_v23 = vld [vmem:[%s8269_s3 + $0x130] sm:$0xff]  }
 0x1cc   : > { %v4910_v53 = vpop.f32.mrb[99].mxu0  ;;  %v4974_v19 = vpop.f32.mrb[99].mxu1 }
 0x1cd   : > { %v7481_v26 = vadd.f32 %v4908_v34, %v7353_v56  ;;  %v4911_v16 = vadd.f32 %v4910_v53, %v4909_v50  ;;  %v4975_v13 = vadd.f32 %v4974_v19, %v4973_v0  ;;  %v7484_v48 = vadd.f32 %v4972_v22, %v7356_v9  ;;  %v5887_v9 = vld [vmem:[%s8269_s3 + $0x170] sm:$0xff]  }
 0x1ce   : > { %5302 = vmatprep.subr.bf16.mxu1 %v5887_v9 }
 0x1cf   : > { %v7487_v33 = vadd.f32 %v4911_v16, %v7358_v2  ;;  %v7490_v35 = vadd.f32 %v4975_v13, %v7361_v29  ;;  %5303 = vmatpush3.bf16.msra.mxu1 %v5888_v23 }
 0x1d1   : > { %v4912_v38 = vpop.f32.mrb[100].mxu0  ;;  %v4976_v63 = vpop.f32.mrb[100].mxu1 }
 0x1d2   : > { %v4913_v30 = vpop.f32.mrb[101].mxu0  ;;  %v4977_v46 = vpop.f32.mrb[101].mxu1 }
 0x1d3   : > { %v4914_v61 = vadd.f32 %v4913_v30, %v4912_v38  ;;  %v4978_v55 = vadd.f32 %v4977_v46, %v4976_v63  ;;  %v4915_v58 = vpop.f32.mrb[102].mxu0  ;;  %v4979_v56 = vpop.f32.mrb[102].mxu1 }
 0x1d4   : > { %v4916_v8 = vpop.f32.mrb[103].mxu0  ;;  %v4980_v12 = vpop.f32.mrb[103].mxu1 }
 0x1d5   : > { %v7496_v2 = vadd.f32 %v4914_v61, %v7367_v42  ;;  %v4917_v54 = vadd.f32 %v4916_v8, %v4915_v58  ;;  %v4981_v29 = vadd.f32 %v4980_v12, %v4979_v56  ;;  %v7499_v45 = vadd.f32 %v4978_v55, %v7370_v37 }
 0x1d7   : > { %v7505_v34 = vadd.f32 %v4917_v54, %v7372_v3  ;;  %v7508_v22 = vadd.f32 %v4981_v29, %v7375_v14 }
 0x1d9   : > { %v4918_v50 = vpop.f32.mrb[104].mxu0  ;;  %v4982_v42 = vpop.f32.mrb[104].mxu1 }
 0x1da   : > { %v4919_v0 = vpop.f32.mrb[105].mxu0  ;;  %v4983_v53 = vpop.f32.mrb[105].mxu1 }
 0x1db   : > { %v4920_v19 = vadd.f32 %v4919_v0, %v4918_v50  ;;  %v4984_v16 = vadd.f32 %v4983_v53, %v4982_v42  ;;  %v4921_v37 = vpop.f32.mrb[106].mxu0  ;;  %v4985_v13 = vpop.f32.mrb[106].mxu1  ;;  %v5892_v53 = vld [vmem:[%s8269_s3 + $0x138] sm:$0xff]  }
 0x1dc   : > { %v4922_v38 = vpop.f32.mrb[107].mxu0  ;;  %v4986_v63 = vpop.f32.mrb[107].mxu1 }
 0x1dd   : > { %v7511_v30 = vadd.f32 %v4920_v19, %v7387_v1  ;;  %v4923_v46 = vadd.f32 %v4922_v38, %v4921_v37  ;;  %v4987_v3 = vadd.f32 %v4986_v63, %v4985_v13  ;;  %v7514_v61 = vadd.f32 %v4984_v16, %v7390_v44  ;;  %v5891_v44 = vld [vmem:[%s8269_s3 + $0x178] sm:$0xff]  }
 0x1de   : > { %5304 = vmatprep.subr.bf16.mxu1 %v5891_v44 }
 0x1df   : > { %v7517_v14 = vadd.f32 %v4923_v46, %v7392_v6  ;;  %v7520_v55 = vadd.f32 %v4987_v3, %v7395_v25  ;;  %5305 = vmatpush3.bf16.msra.mxu1 %v5892_v53 }
 0x1e1   : > { %v4924_v58 = vpop.f32.mrb[108].mxu0  ;;  %v4988_v56 = vpop.f32.mrb[108].mxu1 }
 0x1e2   : > { %v4925_v8 = vpop.f32.mrb[109].mxu0  ;;  %v4989_v12 = vpop.f32.mrb[109].mxu1 }
 0x1e3   : > { %v4926_v9 = vadd.f32 %v4925_v8, %v4924_v58  ;;  %v4990_v54 = vadd.f32 %v4989_v12, %v4988_v56  ;;  %v4927_v29 = vpop.f32.mrb[110].mxu0  ;;  %v4991_v1 = vpop.f32.mrb[110].mxu1 }
 0x1e4   : > { %v4928_v23 = vpop.f32.mrb[111].mxu0  ;;  %v4992_v50 = vpop.f32.mrb[111].mxu1 }
 0x1e5   : > { %v7526_v6 = vadd.f32 %v4926_v9, %v7401_v51  ;;  %v4929_v42 = vadd.f32 %v4928_v23, %v4927_v29  ;;  %v4993_v25 = vadd.f32 %v4992_v50, %v4991_v1  ;;  %v7529_v0 = vadd.f32 %v4990_v54, %v7404_v17 }
 0x1e7   : > { %v7535_v19 = vadd.f32 %v4929_v42, %v7406_v27  ;;  %v7538_v16 = vadd.f32 %v4993_v25, %v7409_v5 }
 0x1e9   : > { %v4994_v37 = vpop.f32.mrb[112].mxu1  ;;  %v5580_v51 = vpop.f32.mrb[112].mxu0 }
 0x1ea   : > { %v1964_v13 = vadd.f32 %v5580_v51, %v7439_v62  ;;  %v4995_v38 = vpop.f32.mrb[113].mxu1  ;;  %v1955_v63 = vpop.f32.mrb[113].mxu0 }
 0x1eb   : > { %v4996_v17 = vadd.f32 %v4995_v38, %v4994_v37  ;;  %v1956_v46 = vadd.f32 %v1955_v63, %v7415_v43  ;;  %v4997_v3 = vpop.f32.mrb[114].mxu1  ;;  %v5581_v58 = vpop.f32.mrb[114].mxu0 }
 0x1ec   : > { %v2084_v56 = vmax.f32 %v1964_v13, 0.0  ;;  %v1967_v8 = vadd.f32 %v5581_v58, %v7448_v31  ;;  %v4998_v27 = vpop.f32.mrb[115].mxu1  ;;  %v1958_v12 = vpop.f32.mrb[115].mxu0  ;;  %v2250_v58 = vld [vmem:[#allocation2 + $0x2] sm:$0xff] }
 0x1ed   : > { %v2082_v9 = vmax.f32 %v1956_v46, 0.0  ;;  %v4999_v5 = vadd.f32 %v4998_v27, %v4997_v3  ;;  %v1959_v54 = vadd.f32 %v1958_v12, %v7430_v57  ;;  %v7545_v29 = vadd.f32 %v4996_v17, %v7412_v18  ;;  %v7556_v17 = vld [vmem:[%s8269_s3 + $0x200] sm:$0xff]  }
 0x1ee   : > { %2156 = vst [vmem:[#allocation2 + $0x31] sm:$0xff] %v2084_v56  ;;  %v2085_v62 = vmax.f32 %v1967_v8, 0.0  ;;  %5610 = vmatprep.subr.bf16.mxu1 %v7556_v17 }
 0x1ef   : > { %2154 = vst [vmem:[#allocation2 + $0x19] sm:$0xff] %v2082_v9  ;;  %v2083_v1 = vmax.f32 %v1959_v54, 0.0  ;;  %v7548_v43 = vadd.f32 %v4999_v5, %v7427_v15 }
 0x1f0   : > { %2157 = vst [vmem:[#allocation2 + $0x39] sm:$0xff] %v2085_v62  ;;  %v2494_v23 = vpack.c.bf16 %v2085_v62, %v2084_v56  ;;  %v2251_v56 = vld [vmem:[#allocation2 + $0xa] sm:$0xff] }
 0x1f1   : > { %2155 = vst [vmem:[#allocation2 + $0x21] sm:$0xff] %v2083_v1  ;;  %v5000_v31 = vpop.f32.mrb[116].mxu1  ;;  %v5584_v50 = vpop.f32.mrb[116].mxu0  ;;  %v2485_v44 = vpack.c.bf16 %v2083_v1, %v2082_v9  ;;  %v2477_v5 = vpack.c.bf16 %v2251_v56, %v2250_v58  ;;  %v5882_v58 = vld [vmem:[%s8269_s3 + $0x188] sm:$0xff]  }
 0x1f2   : > { %v1980_v42 = vadd.f32 %v5584_v50, %v7469_v49  ;;  %v5001_v25 = vpop.f32.mrb[117].mxu1  ;;  %v1971_v57 = vpop.f32.mrb[117].mxu0  ;;  %v5878_v50 = vld [vmem:[%s8269_s3 + $0x180] sm:$0xff]  }
 0x1f3   : > { %v5002_v53 = vadd.f32 %v5001_v25, %v5000_v31  ;;  %v1972_v18 = vadd.f32 %v1971_v57, %v7454_v4  ;;  %v5003_v37 = vpop.f32.mrb[118].mxu1  ;;  %v5585_v51 = vpop.f32.mrb[118].mxu0  ;;  %3242 = vmatprep.mubr.bf16.mxu1 %v2485_v44  ;;  %v5881_v57 = vld [vmem:[%s8269_s3 + $0x1c8] sm:$0xff]  }
 0x1f4   : > { %v2088_v13 = vmax.f32 %v1980_v42, 0.0  ;;  %v1983_v15 = vadd.f32 %v5585_v51, %v7478_v7  ;;  %v5004_v38 = vpop.f32.mrb[119].mxu1  ;;  %v1974_v63 = vpop.f32.mrb[119].mxu0 }
 0x1f5   : > { %v2086_v46 = vmax.f32 %v1972_v18, 0.0  ;;  %v5005_v49 = vadd.f32 %v5004_v38, %v5003_v37  ;;  %v1975_v3 = vadd.f32 %v1974_v63, %v7460_v40  ;;  %v7560_v4 = vadd.f32 %v5002_v53, %v7436_v11  ;;  %v2284_v25 = vld [vmem:[#allocation2 + $0x30] sm:$0xff] }
 0x1f6   : > { %2160 = vst [vmem:[#allocation2 + $0x61] sm:$0xff] %v2088_v13  ;;  %v2089_v8 = vmax.f32 %v1983_v15, 0.0  ;;  %v2282_v12 = vld [vmem:[#allocation2 + $0x18] sm:$0xff] }
 0x1f7   : > { %2158 = vst [vmem:[#allocation2 + $0x49] sm:$0xff] %v2086_v46  ;;  %v2087_v7 = vmax.f32 %v1975_v3, 0.0  ;;  %v7564_v27 = vadd.f32 %v5005_v49, %v7445_v41  ;;  %v2285_v54 = vld [vmem:[#allocation2 + $0x38] sm:$0xff] }
 0x1f8   : > { %2161 = vst [vmem:[#allocation2 + $0x69] sm:$0xff] %v2089_v8  ;;  %v2283_v9 = vld [vmem:[#allocation2 + $0x20] sm:$0xff]  ;;  %v7566_v40 = vpack.c.bf16 %v2089_v8, %v2088_v13  ;;  %v7576_v13 = vpack.c.bf16 %v2285_v54, %v2284_v25 }
 0x1f9   : > { %2159 = vst [vmem:[#allocation2 + $0x51] sm:$0xff] %v2087_v7  ;;  %v5006_v62 = vpop.f32.mrb[120].mxu1  ;;  %v5588_v11 = vpop.f32.mrb[120].mxu0  ;;  %v2478_v1 = vpack.c.bf16 %v2283_v9, %v2282_v12  ;;  %v2503_v31 = vpack.c.bf16 %v2087_v7, %v2086_v46  ;;  %v2253_v8 = vld [vmem:[#allocation2 + $0x22] sm:$0xff] }
 0x1fa   : > { %v1996_v44 = vadd.f32 %v5588_v11, %v7499_v45  ;;  %v5007_v41 = vpop.f32.mrb[121].mxu1  ;;  %v1987_v42 = vpop.f32.mrb[121].mxu0 }
 0x1fb   : > { %v5008_v53 = vadd.f32 %v5007_v41, %v5006_v62  ;;  %v1988_v18 = vadd.f32 %v1987_v42, %v7484_v48  ;;  %v5009_v37 = vpop.f32.mrb[122].mxu1  ;;  %v5589_v51 = vpop.f32.mrb[122].mxu0  ;;  %3395 = vmatprep.mubr.bf16.mxu0 %v2478_v1  ;;  %3243 = vmatmul.mubr.bf16.gmra.mrb[148].mxu1 %v2478_v1  ;;  %v5886_v62 = vld [vmem:[%s8269_s3 + $0x190] sm:$0xff]   ;;  %v5889_v41 = vld [vmem:[%s8269_s3 + $0x1d8] sm:$0xff]  }
 0x1fc   : > { %v2092_v15 = vmax.f32 %v1996_v44, 0.0  ;;  %v1999_v38 = vadd.f32 %v5589_v51, %v7508_v22  ;;  %v5010_v45 = vpop.f32.mrb[123].mxu1  ;;  %v1990_v63 = vpop.f32.mrb[123].mxu0  ;;  %3396 = vmatmul.mubr.bf16.vlgmr.msra.gmra.mrb[144].mxu0 %v2477_v5  ;;  %3250 = vmatprep.mubr.bf16.mxu1 %v2494_v23  ;;  %v5885_v23 = vld [vmem:[%s8269_s3 + $0x1d0] sm:$0xff]  }
 0x1fd   : > { %v2090_v46 = vmax.f32 %v1988_v18, 0.0  ;;  %v5011_v49 = vadd.f32 %v5010_v45, %v5009_v37  ;;  %v1991_v3 = vadd.f32 %v1990_v63, %v7490_v35  ;;  %3403 = vmatprep.mubr.bf16.mxu0 %v7576_v13  ;;  %v7582_v48 = vadd.f32 %v5008_v53, %v7451_v32  ;;  %5403 = vmatpush3.bf16.msra.mxu0 %v5878_v50  ;;  %v2252_v35 = vld [vmem:[#allocation2 + $0x1a] sm:$0xff] }
 0x1fe   : > { %2164 = vst [vmem:[#allocation2 + $0x91] sm:$0xff] %v2092_v15  ;;  %v2093_v22 = vmax.f32 %v1999_v38, 0.0  ;;  %5404 = vmatprep.subr.bf16.mxu0 %v5881_v57  ;;  %v2286_v44 = vld [vmem:[#allocation2 + $0x48] sm:$0xff] }
 0x1ff   : > { %2162 = vst [vmem:[#allocation2 + $0x79] sm:$0xff] %v2090_v46  ;;  %v2091_v56 = vmax.f32 %v1991_v3, 0.0  ;;  %v7591_v7 = vadd.f32 %v5011_v49, %v7457_v36  ;;  %v7601_v36 = vpack.c.bf16 %v2253_v8, %v2252_v35  ;;  %v2255_v3 = vld [vmem:[#allocation2 + $0x3a] sm:$0xff] }
 0x200   : > { %2165 = vst [vmem:[#allocation2 + $0x99] sm:$0xff] %v2093_v22  ;;  %v2287_v32 = vld [vmem:[#allocation2 + $0x50] sm:$0xff]  ;;  %v7593_v12 = vpack.c.bf16 %v2093_v22, %v2092_v15  ;;  %v5894_v8 = vld [vmem:[%s8269_s3 + $0x1a0] sm:$0xff]  }
 0x201   : > { %2163 = vst [vmem:[#allocation2 + $0x81] sm:$0xff] %v2091_v56  ;;  %v5012_v9 = vpop.f32.mrb[124].mxu1  ;;  %v5592_v5 = vpop.f32.mrb[124].mxu0  ;;  %v7595_v54 = vpack.c.bf16 %v2091_v56, %v2090_v46  ;;  %5405 = vmatpush3.bf16.msra.mxu0 %v5882_v58  ;;  %v7608_v18 = vpack.c.bf16 %v2287_v32, %v2286_v44  ;;  %v5890_v46 = vld [vmem:[%s8269_s3 + $0x198] sm:$0xff]  }
 0x202   : > { %v2012_v11 = vadd.f32 %v5592_v5, %v7529_v0  ;;  %v5013_v1 = vpop.f32.mrb[125].mxu1  ;;  %v2003_v50 = vpop.f32.mrb[125].mxu0  ;;  %5406 = vmatprep.subr.bf16.mxu0 %v5885_v23 }
 0x203   : > { %v5014_v42 = vadd.f32 %v5013_v1, %v5012_v9  ;;  %v2004_v25 = vadd.f32 %v2003_v50, %v7514_v61  ;;  %v5015_v57 = vpop.f32.mrb[126].mxu1  ;;  %v5593_v53 = vpop.f32.mrb[126].mxu0  ;;  %3251 = vmatmul.mubr.bf16.gmra.mrb[152].mxu1 %v7576_v13 }
 0x204   : > { %v2096_v0 = vmax.f32 %v2012_v11, 0.0  ;;  %v2015_v37 = vadd.f32 %v5593_v53, %v7538_v16  ;;  %v5016_v51 = vpop.f32.mrb[127].mxu1  ;;  %v2006_v15 = vpop.f32.mrb[127].mxu0  ;;  %3404 = vmatmul.mubr.bf16.gmra.mrb[148].mxu0 %v7601_v36  ;;  %3258 = vmatprep.mubr.bf16.mxu1 %v2503_v31  ;;  %v5893_v31 = vld [vmem:[%s8269_s3 + $0x1e0] sm:$0xff]   ;;  %v5895_v11 = vld [vmem:[%s8269_s3 + $0x1e8] sm:$0xff]  }
 0x205   : > { %v2094_v38 = vmax.f32 %v2004_v25, 0.0  ;;  %v5017_v45 = vadd.f32 %v5016_v51, %v5015_v57  ;;  %v2007_v63 = vadd.f32 %v2006_v15, %v7520_v55  ;;  %3411 = vmatprep.mubr.bf16.mxu0 %v7608_v18  ;;  %v7615_v61 = vadd.f32 %v5014_v42, %v7466_v39  ;;  %5407 = vmatpush3.bf16.msra.mxu0 %v5886_v62  ;;  %v2254_v55 = vld [vmem:[#allocation2 + $0x32] sm:$0xff]  ;;  %v2289_v39 = vld [vmem:[#allocation2 + $0x68] sm:$0xff]  ;;  %v2288_v62 = vld [vmem:[#allocation2 + $0x60] sm:$0xff] }
 0x206   : > { %2168 = vst [vmem:[#allocation2 + $0xc1] sm:$0xff] %v2096_v0  ;;  %v2097_v16 = vmax.f32 %v2015_v37, 0.0  ;;  %5408 = vmatprep.subr.bf16.mxu0 %v5889_v41  ;;  %v7641_v42 = vpack.c.bf16 %v2289_v39, %v2288_v62 }
 0x207   : > { %2166 = vst [vmem:[#allocation2 + $0xa9] sm:$0xff] %v2094_v38  ;;  %v2095_v49 = vmax.f32 %v2007_v63, 0.0  ;;  %v7624_v58 = vadd.f32 %v5017_v45, %v7475_v47  ;;  %v7634_v47 = vpack.c.bf16 %v2255_v3, %v2254_v55  ;;  %v2446_v45 = vld [vmem:[#allocation2 + $0x52] sm:$0xff] }
 0x208   : > { %2169 = vst [vmem:[#allocation2 + $0xc9] sm:$0xff] %v2097_v16  ;;  %v7626_v22 = vpack.c.bf16 %v2097_v16, %v2096_v0  ;;  %v5899_v55 = vld [vmem:[%s8269_s3 + $0x1b0] sm:$0xff]  }
 0x209   : > { %2167 = vst [vmem:[#allocation2 + $0xb1] sm:$0xff] %v2095_v49  ;;  %v5018_v23 = vpop.f32.mrb[128].mxu1  ;;  %v5596_v56 = vpop.f32.mrb[128].mxu0  ;;  %v7628_v35 = vpack.c.bf16 %v2095_v49, %v2094_v38  ;;  %5409 = vmatpush3.bf16.msra.mxu0 %v5890_v46  ;;  %v2445_v38 = vld [vmem:[#allocation2 + $0x4a] sm:$0xff] }
 0x20a   : > { %v2028_v32 = vadd.f32 %v5596_v56, %v7560_v4  ;;  %v5019_v9 = vpop.f32.mrb[129].mxu1  ;;  %v2019_v5 = vpop.f32.mrb[129].mxu0  ;;  %5410 = vmatprep.subr.bf16.mxu0 %v5893_v31  ;;  %v7667_v3 = vpack.c.bf16 %v2446_v45, %v2445_v38  ;;  %v2290_v56 = vld [vmem:[#allocation2 + $0x78] sm:$0xff] }
 0x20b   : > { %v5020_v1 = vadd.f32 %v5019_v9, %v5018_v23  ;;  %v2020_v50 = vadd.f32 %v2019_v5, %v7545_v29  ;;  %v5021_v44 = vpop.f32.mrb[130].mxu1  ;;  %v5597_v41 = vpop.f32.mrb[130].mxu0  ;;  %3259 = vmatmul.mubr.bf16.gmra.mrb[156].mxu1 %v7608_v18 }
 0x20c   : > { %v2100_v4 = vmax.f32 %v2028_v32, 0.0  ;;  %v2031_v25 = vadd.f32 %v5597_v41, %v7564_v27  ;;  %v5022_v57 = vpop.f32.mrb[131].mxu1  ;;  %v2022_v53 = vpop.f32.mrb[131].mxu0  ;;  %3412 = vmatmul.mubr.bf16.gmra.mrb[152].mxu0 %v7634_v47  ;;  %3266 = vmatprep.mubr.bf16.mxu1 %v7566_v40  ;;  %v5896_v27 = vld [vmem:[%s8269_s3 + $0x1a8] sm:$0xff]   ;;  %v5897_v40 = vld [vmem:[%s8269_s3 + $0x1f0] sm:$0xff]  }
 0x20d   : > { %v2098_v0 = vmax.f32 %v2020_v50, 0.0  ;;  %v5023_v37 = vadd.f32 %v5022_v57, %v5021_v44  ;;  %v2023_v51 = vadd.f32 %v2022_v53, %v7548_v43  ;;  %3419 = vmatprep.mubr.bf16.mxu0 %v7641_v42  ;;  %v7649_v29 = vadd.f32 %v5020_v1, %v7481_v26  ;;  %5411 = vmatpush3.bf16.msra.mxu0 %v5894_v8  ;;  %v2291_v26 = vld [vmem:[#allocation2 + $0x80] sm:$0xff]  ;;  %v5900_v8 = vld [vmem:[%s8269_s3 + $0x1f8] sm:$0xff]  }
 0x20e   : > { %2172 = vst [vmem:[#allocation2 + $0xf1] sm:$0xff] %v2100_v4  ;;  %v2101_v15 = vmax.f32 %v2031_v25, 0.0  ;;  %5412 = vmatprep.subr.bf16.mxu0 %v5895_v11  ;;  %v7675_v11 = vpack.c.bf16 %v2291_v26, %v2290_v56  ;;  %v5901_v57 = vld [vmem:[%s8269_s3 + $0x1b8] sm:$0xff]   ;;  %v2292_v26 = vld [vmem:[#allocation2 + $0x90] sm:$0xff] }
 0x20f   : > { %2170 = vst [vmem:[#allocation2 + $0xd9] sm:$0xff] %v2098_v0  ;;  %v2099_v43 = vmax.f32 %v2023_v51, 0.0  ;;  %v7658_v63 = vadd.f32 %v5023_v37, %v7487_v33  ;;  %v2259_v37 = vld [vmem:[#allocation2 + $0x6a] sm:$0xff] }
 0x210   : > { %2173 = vst [vmem:[#allocation2 + $0xf9] sm:$0xff] %v2101_v15  ;;  %v7660_v46 = vpack.c.bf16 %v2101_v15, %v2100_v4 }
 0x211   : > { %2171 = vst [vmem:[#allocation2 + $0xe1] sm:$0xff] %v2099_v43  ;;  %v5024_v16 = vpop.f32.mrb[132].mxu1  ;;  %v5600_v31 = vpop.f32.mrb[132].mxu0  ;;  %v7662_v49 = vpack.c.bf16 %v2099_v43, %v2098_v0  ;;  %5413 = vmatpush3.bf16.msra.mxu0 %v5896_v27  ;;  %v2258_v0 = vld [vmem:[#allocation2 + $0x62] sm:$0xff] }
 0x212   : > { %v2044_v39 = vadd.f32 %v5600_v31, %v7615_v61  ;;  %v5025_v33 = vpop.f32.mrb[133].mxu1  ;;  %v2035_v23 = vpop.f32.mrb[133].mxu0  ;;  %5414 = vmatprep.subr.bf16.mxu0 %v5897_v40  ;;  %v7691_v43 = vpack.c.bf16 %v2259_v37, %v2258_v0 }
 0x213   : > { %v5026_v32 = vadd.f32 %v5025_v33, %v5024_v16  ;;  %v2036_v9 = vadd.f32 %v2035_v23, %v7582_v48  ;;  %v5027_v5 = vpop.f32.mrb[134].mxu1  ;;  %v5601_v62 = vpop.f32.mrb[134].mxu0  ;;  %3267 = vmatmul.mubr.bf16.gmra.mrb[160].mxu1 %v7641_v42 }
 0x214   : > { %v2104_v1 = vmax.f32 %v2044_v39, 0.0  ;;  %v2047_v61 = vadd.f32 %v5601_v62, %v7624_v58  ;;  %v5028_v50 = vpop.f32.mrb[135].mxu1  ;;  %v2038_v44 = vpop.f32.mrb[135].mxu0  ;;  %3420 = vmatmul.mubr.bf16.gmra.mrb[156].mxu0 %v7667_v3  ;;  %3274 = vmatprep.mubr.bf16.mxu1 %v7595_v54 }
 0x215   : > { %v2102_v41 = vmax.f32 %v2036_v9, 0.0  ;;  %v5029_v4 = vadd.f32 %v5028_v50, %v5027_v5  ;;  %v2039_v25 = vadd.f32 %v2038_v44, %v7591_v7  ;;  %3427 = vmatprep.mubr.bf16.mxu0 %v7675_v11  ;;  %v1899_v48 = vadd.f32 %v5026_v32, %v7496_v2  ;;  %5415 = vmatpush3.bf16.msra.mxu0 %v5899_v55  ;;  %v2293_v7 = vld [vmem:[#allocation2 + $0x98] sm:$0xff]  ;;  %v2261_v44 = vld [vmem:[#allocation2 + $0x82] sm:$0xff] }
 0x216   : > { %2176 = vst [vmem:[#allocation2 + $0x121] sm:$0xff] %v2104_v1  ;;  %v2105_v58 = vmax.f32 %v2047_v61, 0.0  ;;  %5416 = vmatprep.subr.bf16.mxu0 %v5900_v8  ;;  %v7695_v39 = vpack.c.bf16 %v2293_v7, %v2292_v26  ;;  %v2260_v50 = vld [vmem:[#allocation2 + $0x7a] sm:$0xff] }
 0x217   : > { %2174 = vst [vmem:[#allocation2 + $0x109] sm:$0xff] %v2102_v41  ;;  %v2103_v53 = vmax.f32 %v2039_v25, 0.0  ;;  %v1902_v54 = vadd.f32 %v5029_v4, %v7505_v34 }
 0x218   : > { %2177 = vst [vmem:[#allocation2 + $0x129] sm:$0xff] %v2105_v58  ;;  %v7687_v51 = vpack.c.bf16 %v2105_v58, %v2104_v1  ;;  %v2294_v58 = vld [vmem:[#allocation2 + $0xa8] sm:$0xff] }
 0x219   : > { %2175 = vst [vmem:[#allocation2 + $0x111] sm:$0xff] %v2103_v53  ;;  %v5030_v2 = vpop.f32.mrb[136].mxu1  ;;  %v5604_v27 = vpop.f32.mrb[136].mxu0  ;;  %v7689_v15 = vpack.c.bf16 %v2103_v53, %v2102_v41  ;;  %5417 = vmatpush3.bf16.msra.mxu0 %v5901_v57  ;;  %v2295_v41 = vld [vmem:[#allocation2 + $0xb0] sm:$0xff] }
 0x21a   : > { %v2060_v40 = vadd.f32 %v5604_v27, %v1899_v48  ;;  %v5031_v38 = vpop.f32.mrb[137].mxu1  ;;  %v2051_v45 = vpop.f32.mrb[137].mxu0  ;;  %v7710_v37 = vpack.c.bf16 %v2295_v41, %v2294_v58 }
 0x21b   : > { %v5032_v16 = vadd.f32 %v5031_v38, %v5030_v2  ;;  %v2052_v34 = vadd.f32 %v2051_v45, %v7649_v29  ;;  %v5033_v31 = vpop.f32.mrb[138].mxu1  ;;  %v5605_v55 = vpop.f32.mrb[138].mxu0  ;;  %3275 = vmatmul.mubr.bf16.gmra.mrb[164].mxu1 %v7675_v11 }
 0x21c   : > { %v2108_v33 = vmax.f32 %v2060_v40, 0.0  ;;  %v2063_v23 = vadd.f32 %v5605_v55, %v1902_v54  ;;  %v5034_v56 = vpop.f32.mrb[139].mxu1  ;;  %v2054_v8 = vpop.f32.mrb[139].mxu0  ;;  %3428 = vmatmul.mubr.bf16.gmra.mrb[160].mxu0 %v7691_v43  ;;  %3282 = vmatprep.mubr.bf16.mxu1 %v7593_v12  ;;  %v2263_v55 = vld [vmem:[#allocation2 + $0x9a] sm:$0xff] }
 0x21d   : > { %v2106_v32 = vmax.f32 %v2052_v34, 0.0  ;;  %v5035_v9 = vadd.f32 %v5034_v56, %v5033_v31  ;;  %v2055_v5 = vadd.f32 %v2054_v8, %v7658_v63  ;;  %3435 = vmatprep.mubr.bf16.mxu0 %v7695_v39  ;;  %v1907_v29 = vadd.f32 %v5032_v16, %v7511_v30  ;;  %v2262_v31 = vld [vmem:[#allocation2 + $0x92] sm:$0xff] }
 0x21e   : > { %2180 = vst [vmem:[#allocation2 + $0x151] sm:$0xff] %v2108_v33  ;;  %v2109_v62 = vmax.f32 %v2063_v23, 0.0  ;;  %v7707_v30 = vpack.c.bf16 %v2261_v44, %v2260_v50  ;;  %v7717_v8 = vpack.c.bf16 %v2263_v55, %v2262_v31  ;;  %v2267_v50 = vld [vmem:[#allocation2 + $0xca] sm:$0xff]  ;;  %v2301_v44 = vld [vmem:[#allocation2 + $0xf8] sm:$0xff] }
 0x21f   : > { %2178 = vst [vmem:[#allocation2 + $0x139] sm:$0xff] %v2106_v32  ;;  %v2107_v1 = vmax.f32 %v2055_v5, 0.0  ;;  %v1910_v61 = vadd.f32 %v5035_v9, %v7517_v14  ;;  %v2265_v5 = vld [vmem:[#allocation2 + $0xb2] sm:$0xff] }
 0x220   : > { %2181 = vst [vmem:[#allocation2 + $0x159] sm:$0xff] %v2109_v62  ;;  %v7703_v4 = vpack.c.bf16 %v2109_v62, %v2108_v33  ;;  %v2297_v33 = vld [vmem:[#allocation2 + $0xc8] sm:$0xff]  ;;  %v2273_v31 = vld [vmem:[#allocation2 + $0x112] sm:$0xff] }
 0x221   : > { %2179 = vst [vmem:[#allocation2 + $0x141] sm:$0xff] %v2107_v1  ;;  %v5036_v12 = vpop.f32.mrb[140].mxu1  ;;  %v5608_v25 = vpop.f32.mrb[140].mxu0  ;;  %v7705_v63 = vpack.c.bf16 %v2107_v1, %v2106_v32  ;;  %v2298_v1 = vld [vmem:[#allocation2 + $0xd8] sm:$0xff] }
 0x222   : > { %v5037_v48 = vpop.f32.mrb[141].mxu1  ;;  %v2067_v57 = vpop.f32.mrb[141].mxu0 }
 0x223   : > { %v5038_v53 = vadd.f32 %v5037_v48, %v5036_v12  ;;  %v2068_v54 = vadd.f32 %v2067_v57, %v1907_v29  ;;  %v5039_v0 = vpop.f32.mrb[142].mxu1  ;;  %v5609_v14 = vpop.f32.mrb[142].mxu0  ;;  %3283 = vmatmul.mubr.bf16.gmra.mrb[168].mxu1 %v7695_v39  ;;  %v2299_v29 = vld [vmem:[#allocation2 + $0xe0] sm:$0xff]  ;;  %v2300_v12 = vld [vmem:[#allocation2 + $0xf0] sm:$0xff] }
 0x224   : > { %v5040_v7 = vpop.f32.mrb[143].mxu1  ;;  %v2070_v2 = vpop.f32.mrb[143].mxu0  ;;  %3436 = vmatmul.mubr.bf16.gmra.mrb[164].mxu0 %v7707_v30  ;;  %3290 = vmatprep.mubr.bf16.mxu1 %v7628_v35  ;;  %v2296_v35 = vld [vmem:[#allocation2 + $0xc0] sm:$0xff]  ;;  %v2303_v57 = vld [vmem:[#allocation2 + $0x110] sm:$0xff] }
 0x225   : > { %v1915_v27 = vadd.f32 %v5038_v53, %v7526_v6  ;;  %v2110_v40 = vmax.f32 %v2068_v54, 0.0  ;;  %v5041_v38 = vadd.f32 %v5040_v7, %v5039_v0  ;;  %v2071_v45 = vadd.f32 %v2070_v2, %v1910_v61  ;;  %3443 = vmatprep.mubr.bf16.mxu0 %v7710_v37  ;;  %v2268_v48 = vld [vmem:[#allocation2 + $0xda] sm:$0xff]  ;;  %v2302_v53 = vld [vmem:[#allocation2 + $0x108] sm:$0xff]  ;;  %v2270_v2 = vld [vmem:[#allocation2 + $0xf2] sm:$0xff] }
 0x226   : > { %v7722_v9 = vpack.c.bf16 %v2297_v33, %v2296_v35  ;;  %v7730_v61 = vpack.c.bf16 %v2299_v29, %v2298_v1  ;;  %v7746_v54 = vpack.c.bf16 %v2303_v57, %v2302_v53  ;;  %v2274_v35 = vld [vmem:[#allocation2 + $0x122] sm:$0xff] }
 0x227   : > { %v2076_v26 = vadd.f32 %v5608_v25, %v1915_v27  ;;  %2182 = vst [vmem:[#allocation2 + $0x169] sm:$0xff] %v2110_v40  ;;  %v1918_v16 = vadd.f32 %v5041_v38, %v7535_v19  ;;  %v2111_v34 = vmax.f32 %v2071_v45, 0.0  ;;  %v2264_v19 = vld [vmem:[#allocation2 + $0xaa] sm:$0xff]  ;;  %v7738_v25 = vpack.c.bf16 %v2301_v44, %v2300_v12  ;;  %v2271_v27 = vld [vmem:[#allocation2 + $0xfa] sm:$0xff] }
 0x228   : > { %v7727_v62 = vpack.c.bf16 %v2265_v5, %v2264_v19  ;;  %v2305_v38 = vld [vmem:[#allocation2 + $0x128] sm:$0xff]  ;;  %v2307_v55 = vld [vmem:[#allocation2 + $0x140] sm:$0xff]  ;;  %v2308_v5 = vld [vmem:[#allocation2 + $0x150] sm:$0xff] }
 0x229   : > { %v2112_v23 = vmax.f32 %v2076_v26, 0.0  ;;  %v2079_v56 = vadd.f32 %v5609_v14, %v1918_v16  ;;  %2183 = vst [vmem:[#allocation2 + $0x171] sm:$0xff] %v2111_v34  ;;  %v7719_v6 = vpack.c.bf16 %v2111_v34, %v2110_v40  ;;  %v7755_v26 = vpack.c.bf16 %v2271_v27, %v2270_v2  ;;  %v2304_v16 = vld [vmem:[#allocation2 + $0x120] sm:$0xff] }
 0x22a   : > { %v7758_v34 = vpack.c.bf16 %v2305_v38, %v2304_v16  ;;  %v2276_v1 = vld [vmem:[#allocation2 + $0x13a] sm:$0xff]  ;;  %v2411_v16 = vld [vmem:[#allocation2 + $0x31] sm:$0xff] }
 0x22b   : > { %2184 = vst [vmem:[#allocation2 + $0x181] sm:$0xff] %v2112_v23  ;;  %v2113_v32 = vmax.f32 %v2079_v56, 0.0  ;;  %3291 = vmatmul.mubr.bf16.gmra.mrb[172].mxu1 %v7710_v37  ;;  %v2306_v23 = vld [vmem:[#allocation2 + $0x138] sm:$0xff] }
 0x22c   : > { %3444 = vmatmul.mubr.bf16.gmra.mrb[168].mxu0 %v7717_v8  ;;  %3298 = vmatprep.mubr.bf16.mxu1 %v7626_v22  ;;  %v2266_v22 = vld [vmem:[#allocation2 + $0xc2] sm:$0xff]  ;;  %v7766_v56 = vpack.c.bf16 %v2307_v55, %v2306_v23  ;;  %v2314_v2 = vld [vmem:[#allocation2 + $0x19] sm:$0xff]  ;;  %v2350_v55 = vld [vmem:[#allocation2 + $0x4a] sm:$0xff] }
 0x22d   : > { %2185 = vst [vmem:[#allocation2 + $0x189] sm:$0xff] %v2113_v32  ;;  %3451 = vmatprep.mubr.bf16.mxu0 %v7722_v9  ;;  %v7735_v41 = vpack.c.bf16 %v2267_v50, %v2266_v22  ;;  %v2309_v32 = vld [vmem:[#allocation2 + $0x158] sm:$0xff] }
 0x22e   : > { %v7774_v29 = vpack.c.bf16 %v2309_v32, %v2308_v5  ;;  %v2310_v44 = vld [vmem:[#allocation2 + $0x168] sm:$0xff]  ;;  %v2412_v27 = vld [vmem:[#allocation2 + $0x39] sm:$0xff] }
 0x22f   : > { %v2351_v23 = vld [vmem:[#allocation2 + $0x52] sm:$0xff]  ;;  %v2413_v32 = vld [vmem:[#allocation2 + $0x49] sm:$0xff] }
 0x230   : > { %v2311_v22 = vld [vmem:[#allocation2 + $0x170] sm:$0xff]  ;;  %v5904_v5 = vld [vmem:[%s8269_s3 + $0x218] sm:$0xff]  }
 0x231   : > { %v7782_v12 = vpack.c.bf16 %v2311_v22, %v2310_v44  ;;  %v5906_v22 = vld [vmem:[%s8269_s3 + $0x228] sm:$0xff]  }
 0x232   : > { %v2312_v53 = vld [vmem:[#allocation2 + $0x180] sm:$0xff] }
 0x233   : > { %3299 = vmatmul.mubr.bf16.gmra.mrb[176].mxu1 %v7722_v9 }
 0x234   : > { %3452 = vmatmul.mubr.bf16.gmra.mrb[172].mxu0 %v7727_v62  ;;  %3306 = vmatprep.mubr.bf16.mxu1 %v7662_v49  ;;  %v2269_v49 = vld [vmem:[#allocation2 + $0xe2] sm:$0xff] }
 0x235   : > { %3459 = vmatprep.mubr.bf16.mxu0 %v7730_v61  ;;  %v7743_v58 = vpack.c.bf16 %v2269_v49, %v2268_v48  ;;  %v2278_v48 = vld [vmem:[#allocation2 + $0x152] sm:$0xff]  ;;  %v2313_v49 = vld [vmem:[#allocation2 + $0x188] sm:$0xff] }
 0x23b   : > { %3307 = vmatmul.mubr.bf16.gmra.mrb[180].mxu1 %v7730_v61 }
 0x23c   : > { %3460 = vmatmul.mubr.bf16.gmra.mrb[176].mxu0 %v7735_v41  ;;  %3314 = vmatprep.mubr.bf16.mxu1 %v7660_v46 }
 0x23d   : > { %3467 = vmatprep.mubr.bf16.mxu0 %v7738_v25 }
 0x23f   : > { %v5082_v0 = vpop.f32.mrb[144].mxu1 }
 0x240   : > { %v5083_v46 = vpop.f32.mrb[145].mxu1 }
 0x241   : > { %v7751_v14 = vadd.f32 %v5083_v46, %v5082_v0  ;;  %v5085_v7 = vpop.f32.mrb[146].mxu1  ;;  %v7790_v0 = vpack.c.bf16 %v2313_v49, %v2312_v53  ;;  %v2315_v46 = vld [vmem:[#allocation2 + $0x21] sm:$0xff]  ;;  %v5908_v49 = vld [vmem:[%s8269_s3 + $0x238] sm:$0xff]  }
 0x242   : > { %v5086_v40 = vpop.f32.mrb[147].mxu1 }
 0x243   : > { %3315 = vmatmul.mubr.bf16.gmra.mrb[184].mxu1 %v7738_v25  ;;  %v7753_v45 = vadd.f32 %v5086_v40, %v5085_v7  ;;  %v2281_v7 = vld [vmem:[#allocation2 + $0x172] sm:$0xff]  ;;  %v2479_v40 = vpack.c.bf16 %v2315_v46, %v2314_v2 }
 0x244   : > { %3468 = vmatmul.mubr.bf16.gmra.mrb[180].mxu0 %v7743_v58  ;;  %3322 = vmatprep.mubr.bf16.mxu1 %v7689_v15  ;;  %v2272_v15 = vld [vmem:[#allocation2 + $0x10a] sm:$0xff] }
 0x245   : > { %3475 = vmatprep.mubr.bf16.mxu0 %v7746_v54  ;;  %v7763_v33 = vpack.c.bf16 %v2273_v31, %v2272_v15  ;;  %v5902_v15 = vld [vmem:[%s8269_s3 + $0x208] sm:$0xff]   ;;  %v2482_v31 = vpack.c.bf16 %v2412_v27, %v2411_v16 }
 0x24b   : > { %3323 = vmatmul.mubr.bf16.gmra.mrb[188].mxu1 %v7746_v54 }
 0x24c   : > { %3476 = vmatmul.mubr.bf16.gmra.mrb[184].mxu0 %v7755_v26  ;;  %3330 = vmatprep.mubr.bf16.mxu1 %v7687_v51  ;;  %v2275_v51 = vld [vmem:[#allocation2 + $0x12a] sm:$0xff] }
 0x24d   : > { %3483 = vmatprep.mubr.bf16.mxu0 %v7758_v34  ;;  %v7771_v19 = vpack.c.bf16 %v2275_v51, %v2274_v35  ;;  %v2414_v35 = vld [vmem:[#allocation2 + $0x51] sm:$0xff]  ;;  %v2498_v51 = vpack.c.bf16 %v2351_v23, %v2350_v55 }
 0x253   : > { %3331 = vmatmul.mubr.bf16.gmra.mrb[192].mxu1 %v7758_v34 }
 0x254   : > { %3484 = vmatmul.mubr.bf16.gmra.mrb[188].mxu0 %v7763_v33  ;;  %3338 = vmatprep.mubr.bf16.mxu1 %v7705_v63  ;;  %v2277_v63 = vld [vmem:[#allocation2 + $0x142] sm:$0xff] }
 0x255   : > { %3491 = vmatprep.mubr.bf16.mxu0 %v7766_v56  ;;  %v7779_v50 = vpack.c.bf16 %v2277_v63, %v2276_v1  ;;  %v2416_v1 = vld [vmem:[#allocation2 + $0x69] sm:$0xff]  ;;  %v2415_v63 = vld [vmem:[#allocation2 + $0x61] sm:$0xff] }
 0x256   : > { %v2500_v44 = vpack.c.bf16 %v2416_v1, %v2415_v63  ;;  %v2435_v1 = vld [vmem:[#allocation2 + $0x151] sm:$0xff] }
 0x25b   : > { %3339 = vmatmul.mubr.bf16.gmra.mrb[196].mxu1 %v7766_v56 }
 0x25c   : > { %3492 = vmatmul.mubr.bf16.gmra.mrb[192].mxu0 %v7771_v19  ;;  %3346 = vmatprep.mubr.bf16.mxu1 %v7703_v4  ;;  %v2279_v4 = vld [vmem:[#allocation2 + $0x15a] sm:$0xff] }
 0x25d   : > { %3499 = vmatprep.mubr.bf16.mxu0 %v7774_v29  ;;  %v7787_v57 = vpack.c.bf16 %v2279_v4, %v2278_v48  ;;  %v2418_v48 = vld [vmem:[#allocation2 + $0x81] sm:$0xff]  ;;  %v2417_v4 = vld [vmem:[#allocation2 + $0x79] sm:$0xff] }
 0x25e   : > { %v2509_v53 = vpack.c.bf16 %v2418_v48, %v2417_v4 }
 0x263   : > { %3347 = vmatmul.mubr.bf16.gmra.mrb[200].mxu1 %v7774_v29 }
 0x264   : > { %3500 = vmatmul.mubr.bf16.gmra.mrb[196].mxu0 %v7779_v50  ;;  %3354 = vmatprep.mubr.bf16.mxu1 %v7719_v6  ;;  %v2280_v6 = vld [vmem:[#allocation2 + $0x16a] sm:$0xff] }
 0x265   : > { %3507 = vmatprep.mubr.bf16.mxu0 %v7782_v12  ;;  %v7795_v38 = vpack.c.bf16 %v2281_v7, %v2280_v6  ;;  %v2422_v6 = vld [vmem:[#allocation2 + $0xb1] sm:$0xff]  ;;  %v2421_v7 = vld [vmem:[#allocation2 + $0xa9] sm:$0xff] }
 0x266   : > { %v2527_v2 = vpack.c.bf16 %v2422_v6, %v2421_v7 }
 0x26b   : > { %3355 = vmatmul.mubr.bf16.gmra.mrb[204].mxu1 %v7782_v12 }
 0x26c   : > { %3508 = vmatmul.mubr.bf16.gmra.mrb[200].mxu0 %v7787_v57  ;;  %3556 = vmatprep.mubr.bf16.mxu1 %v7601_v36  ;;  %v5903_v36 = vld [vmem:[%s8269_s3 + $0x210] sm:$0xff]  }
 0x26d   : > { %3515 = vmatprep.mubr.bf16.mxu0 %v7790_v0 }
 0x273   : > { %3557 = vmatmul.mubr.bf16.vlgmr.msra.gmra.mrb[208].mxu1 %v2479_v40 }
 0x274   : > { %3516 = vmatmul.mubr.bf16.gmra.mrb[204].mxu0 %v7795_v38  ;;  %3564 = vmatprep.mubr.bf16.mxu1 %v7634_v47  ;;  %v2491_v47 = vpack.c.bf16 %v2414_v35, %v2413_v32 }
 0x275   : > { %3717 = vmatprep.mubr.bf16.mxu0 %v2482_v31  ;;  %5611 = vmatpush3.bf16.msra.mxu1 %v7556_v17  ;;  %v5905_v17 = vld [vmem:[%s8269_s3 + $0x220] sm:$0xff]  }
 0x276   : > { %5612 = vmatprep.subr.bf16.mxu1 %v5902_v15 }
 0x279   : > { %5613 = vmatpush3.bf16.msra.mxu1 %v5902_v15 }
 0x27a   : > { %5614 = vmatprep.subr.bf16.mxu1 %v5903_v36 }
 0x27b   : > { %3565 = vmatmul.mubr.bf16.gmra.mrb[212].mxu1 %v2482_v31 }
 0x27c   : > { %3718 = vmatmul.mubr.bf16.vlgmr.msra.gmra.mrb[208].mxu0 %v7576_v13  ;;  %3572 = vmatprep.mubr.bf16.mxu1 %v2498_v51  ;;  %v5907_v13 = vld [vmem:[%s8269_s3 + $0x230] sm:$0xff]   ;;  %v2436_v51 = vld [vmem:[#allocation2 + $0x159] sm:$0xff] }
 0x27d   : > { %3725 = vmatprep.mubr.bf16.mxu0 %v2491_v47  ;;  %5615 = vmatpush3.bf16.msra.mxu1 %v5903_v36 }
 0x27e   : > { %5616 = vmatprep.subr.bf16.mxu1 %v5904_v5 }
 0x281   : > { %5617 = vmatpush3.bf16.msra.mxu1 %v5904_v5 }
 0x282   : > { %5618 = vmatprep.subr.bf16.mxu1 %v5905_v17 }
 0x283   : > { %3573 = vmatmul.mubr.bf16.gmra.mrb[216].mxu1 %v2491_v47 }
 0x284   : > { %3726 = vmatmul.mubr.bf16.gmra.mrb[212].mxu0 %v7608_v18  ;;  %3580 = vmatprep.mubr.bf16.mxu1 %v7691_v43  ;;  %v2420_v18 = vld [vmem:[#allocation2 + $0x99] sm:$0xff]  ;;  %v2419_v43 = vld [vmem:[#allocation2 + $0x91] sm:$0xff] }
 0x285   : > { %3733 = vmatprep.mubr.bf16.mxu0 %v2500_v44  ;;  %5619 = vmatpush3.bf16.msra.mxu1 %v5905_v17  ;;  %v2518_v46 = vpack.c.bf16 %v2420_v18, %v2419_v43 }
 0x286   : > { %5620 = vmatprep.subr.bf16.mxu1 %v5906_v22 }
 0x289   : > { %5621 = vmatpush3.bf16.msra.mxu1 %v5906_v22 }
 0x28a   : > { %5622 = vmatprep.subr.bf16.mxu1 %v5907_v13 }
 0x28b   : > { %3581 = vmatmul.mubr.bf16.gmra.mrb[220].mxu1 %v2500_v44 }
 0x28c   : > { %3734 = vmatmul.mubr.bf16.gmra.mrb[216].mxu0 %v7641_v42  ;;  %3588 = vmatprep.mubr.bf16.mxu1 %v7707_v30  ;;  %v2424_v42 = vld [vmem:[#allocation2 + $0xc9] sm:$0xff]  ;;  %v2423_v30 = vld [vmem:[#allocation2 + $0xc1] sm:$0xff] }
 0x28d   : > { %3741 = vmatprep.mubr.bf16.mxu0 %v2509_v53  ;;  %5623 = vmatpush3.bf16.msra.mxu1 %v5907_v13  ;;  %v2536_v27 = vpack.c.bf16 %v2424_v42, %v2423_v30  ;;  %v2590_v13 = vpack.c.bf16 %v2436_v51, %v2435_v1  ;;  %v2437_v30 = vld [vmem:[#allocation2 + $0x169] sm:$0xff] }
 0x28e   : > { %5624 = vmatprep.subr.bf16.mxu1 %v5908_v49 }
 0x291   : > { %5625 = vmatpush3.bf16.msra.mxu1 %v5908_v49 }
 0x293   : > { %3589 = vmatmul.mubr.bf16.gmra.mrb[224].mxu1 %v2509_v53 }
 0x294   : > { %3742 = vmatmul.mubr.bf16.gmra.mrb[220].mxu0 %v7675_v11  ;;  %3596 = vmatprep.mubr.bf16.mxu1 %v7717_v8  ;;  %v2426_v11 = vld [vmem:[#allocation2 + $0xe1] sm:$0xff]  ;;  %v2425_v8 = vld [vmem:[#allocation2 + $0xd9] sm:$0xff] }
 0x295   : > { %3749 = vmatprep.mubr.bf16.mxu0 %v2518_v46  ;;  %v2545_v40 = vpack.c.bf16 %v2426_v11, %v2425_v8 }
 0x29b   : > { %3597 = vmatmul.mubr.bf16.gmra.mrb[228].mxu1 %v2518_v46  ;;  %v2438_v46 = vld [vmem:[#allocation2 + $0x171] sm:$0xff] }
 0x29c   : > { %3750 = vmatmul.mubr.bf16.gmra.mrb[224].mxu0 %v7695_v39  ;;  %3604 = vmatprep.mubr.bf16.mxu1 %v7727_v62  ;;  %v2428_v39 = vld [vmem:[#allocation2 + $0xf9] sm:$0xff]  ;;  %v2427_v62 = vld [vmem:[#allocation2 + $0xf1] sm:$0xff] }
 0x29d   : > { %3757 = vmatprep.mubr.bf16.mxu0 %v2527_v2  ;;  %v2554_v16 = vpack.c.bf16 %v2428_v39, %v2427_v62 }
 0x2a3   : > { %3605 = vmatmul.mubr.bf16.gmra.mrb[232].mxu1 %v2527_v2 }
 0x2a4   : > { %3758 = vmatmul.mubr.bf16.gmra.mrb[228].mxu0 %v7710_v37  ;;  %3612 = vmatprep.mubr.bf16.mxu1 %v7735_v41  ;;  %v2430_v37 = vld [vmem:[#allocation2 + $0x111] sm:$0xff]  ;;  %v2429_v41 = vld [vmem:[#allocation2 + $0x109] sm:$0xff] }
 0x2a5   : > { %3765 = vmatprep.mubr.bf16.mxu0 %v2536_v27  ;;  %v2563_v15 = vpack.c.bf16 %v2430_v37, %v2429_v41  ;;  %v2376_v41 = vld [vmem:[#allocation2 + $0x182] sm:$0xff] }
 0x2ab   : > { %3613 = vmatmul.mubr.bf16.gmra.mrb[236].mxu1 %v2536_v27 }
 0x2ac   : > { %3766 = vmatmul.mubr.bf16.gmra.mrb[232].mxu0 %v7722_v9  ;;  %3620 = vmatprep.mubr.bf16.mxu1 %v7743_v58  ;;  %v2432_v9 = vld [vmem:[#allocation2 + $0x129] sm:$0xff]  ;;  %v2431_v58 = vld [vmem:[#allocation2 + $0x121] sm:$0xff] }
 0x2ad   : > { %3773 = vmatprep.mubr.bf16.mxu0 %v2545_v40  ;;  %v2572_v31 = vpack.c.bf16 %v2432_v9, %v2431_v58 }
 0x2b3   : > { %3621 = vmatmul.mubr.bf16.gmra.mrb[240].mxu1 %v2545_v40  ;;  %v2599_v40 = vpack.c.bf16 %v2438_v46, %v2437_v30 }
 0x2b4   : > { %3774 = vmatmul.mubr.bf16.gmra.mrb[236].mxu0 %v7730_v61  ;;  %3628 = vmatprep.mubr.bf16.mxu1 %v7755_v26  ;;  %v2434_v61 = vld [vmem:[#allocation2 + $0x141] sm:$0xff]  ;;  %v2433_v26 = vld [vmem:[#allocation2 + $0x139] sm:$0xff] }
 0x2b5   : > { %3781 = vmatprep.mubr.bf16.mxu0 %v2554_v16  ;;  %v2581_v36 = vpack.c.bf16 %v2434_v61, %v2433_v26  ;;  %v2440_v61 = vld [vmem:[#allocation2 + $0x189] sm:$0xff] }
 0x2bb   : > { %3629 = vmatmul.mubr.bf16.gmra.mrb[244].mxu1 %v2554_v16 }
 0x2bc   : > { %3782 = vmatmul.mubr.bf16.gmra.mrb[240].mxu0 %v7738_v25  ;;  %3636 = vmatprep.mubr.bf16.mxu1 %v7763_v33  ;;  %v7845_v25 = vld [vmem:[%s8270_s4] ss:$0 sm:$0xff] }
 0x2bd   : > { %3789 = vmatprep.mubr.bf16.mxu0 %v2563_v15  ;;  %v3237_v32 = vadd.f32 %v7751_v14, %v7845_v25  ;;  %v3240_v63 = vadd.f32 %v7753_v45, %v7845_v25  ;;  %v5909_v14 = vld [vmem:[%s8271_s5] sm:$0xff]  }
 0x2be   : > { %5658 = vmatprep.subr.bf16.mxu0 %v5909_v14 }
 0x2bf   : > { %5659 = vmatpush3.bf16.msra.mxu0 %v5909_v14 }
 0x2c3   : > { %3637 = vmatmul.mubr.bf16.gmra.mrb[248].mxu1 %v2563_v15  ;;  %v2377_v15 = vld [vmem:[#allocation2 + $0x18a] sm:$0xff] }
 0x2c4   : > { %3790 = vmatmul.mubr.bf16.gmra.mrb[244].mxu0 %v7746_v54  ;;  %3644 = vmatprep.mubr.bf16.mxu1 %v7771_v19 }
 0x2c5   : > { %3797 = vmatprep.mubr.bf16.mxu0 %v2572_v31 }
 0x2cb   : > { %3645 = vmatmul.mubr.bf16.gmra.mrb[252].mxu1 %v2572_v31 }
 0x2cc   : > { %3798 = vmatmul.mubr.bf16.gmra.mrb[248].mxu0 %v7758_v34  ;;  %3652 = vmatprep.mubr.bf16.mxu1 %v7779_v50 }
 0x2cd   : > { %3805 = vmatprep.mubr.bf16.mxu0 %v2581_v36 }
 0x2ce   : > { %v5088_v33 = vpop.f32.mrb[148].mxu1 }
 0x2cf   : > { %v5194_v55 = vpop.f32.mrb[144].mxu0  ;;  %v5089_v54 = vpop.f32.mrb[149].mxu1 }
 0x2d0   : > { %v5090_v23 = vadd.f32 %v5089_v54, %v5088_v33  ;;  %v5195_v19 = vpop.f32.mrb[145].mxu0  ;;  %v5091_v35 = vpop.f32.mrb[150].mxu1 }
 0x2d1   : > { %v5196_v5 = vadd.f32 %v5195_v19, %v5194_v55  ;;  %v5197_v34 = vpop.f32.mrb[146].mxu0  ;;  %v5092_v47 = vpop.f32.mrb[151].mxu1 }
 0x2d2   : > { %v5093_v50 = vadd.f32 %v5092_v47, %v5091_v35  ;;  %v5198_v17 = vpop.f32.mrb[147].mxu0 }
 0x2d3   : > { %v7851_v22 = vadd.f32 %v5196_v5, %v3237_v32  ;;  %v5199_v44 = vadd.f32 %v5198_v17, %v5197_v34  ;;  %3653 = vmatmul.mubr.bf16.gmra.mrb[0].mxu1 %v2581_v36  ;;  %v5910_v5 = vld [vmem:[%s8271_s5 + $0x8] sm:$0xff]  }
 0x2d4   : > { %3806 = vmatmul.mubr.bf16.gmra.mrb[252].mxu0 %v7766_v56  ;;  %3660 = vmatprep.mubr.bf16.mxu1 %v7787_v57  ;;  %v3245_v56 = vadd.f32 %v5090_v23, %v7845_v25  ;;  %v3248_v27 = vadd.f32 %v5093_v50, %v7845_v25  ;;  %v2439_v23 = vld [vmem:[#allocation2 + $0x181] sm:$0xff]  ;;  %v2441_v50 = vld [vmem:[#allocation2 + $0x199] sm:$0xff] }
 0x2d5   : > { %v7858_v48 = vadd.f32 %v5199_v44, %v3240_v63  ;;  %3813 = vmatprep.mubr.bf16.mxu0 %v2590_v13  ;;  %v2608_v32 = vpack.c.bf16 %v2440_v61, %v2439_v23  ;;  %v2442_v17 = vld [vmem:[#allocation2 + $0x1a1] sm:$0xff]  ;;  %5660 = vmatprep.subr.bf16.mxu0 %v5910_v5  ;;  %v2443_v44 = vld [vmem:[#allocation2 + $0x32] sm:$0xff] }
 0x2d6   : > { %v5094_v4 = vpop.f32.mrb[152].mxu1  ;;  %5661 = vmatpush3.bf16.msra.mxu0 %v5910_v5  ;;  %v5911_v23 = vld [vmem:[%s8271_s5 + $0x10] sm:$0xff]   ;;  %v2450_v5 = vld [vmem:[#allocation2 + $0x82] sm:$0xff] }
 0x2d7   : > { %v5200_v49 = vpop.f32.mrb[148].mxu0  ;;  %v5095_v45 = vpop.f32.mrb[153].mxu1  ;;  %5662 = vmatprep.subr.bf16.mxu0 %v5911_v23 }
 0x2d8   : > { %v5096_v53 = vadd.f32 %v5095_v45, %v5094_v4  ;;  %v5201_v18 = vpop.f32.mrb[149].mxu0  ;;  %v5097_v43 = vpop.f32.mrb[154].mxu1 }
 0x2d9   : > { %v5202_v6 = vadd.f32 %v5201_v18, %v5200_v49  ;;  %v5203_v57 = vpop.f32.mrb[150].mxu0  ;;  %v5098_v7 = vpop.f32.mrb[155].mxu1 }
 0x2da   : > { %v5099_v2 = vadd.f32 %v5098_v7, %v5097_v43  ;;  %v5204_v42 = vpop.f32.mrb[151].mxu0  ;;  %v3253_v26 = vadd.f32 %v5096_v53, %v7845_v25  ;;  %v2617_v43 = vpack.c.bf16 %v2442_v17, %v2441_v50  ;;  %v2451_v17 = vld [vmem:[#allocation2 + $0x92] sm:$0xff]  ;;  %5663 = vmatpush3.bf16.msra.mxu0 %v5911_v23 }
 0x2db   : > { %v7862_v11 = vadd.f32 %v5202_v6, %v3245_v56  ;;  %v5205_v8 = vadd.f32 %v5204_v42, %v5203_v57  ;;  %3661 = vmatmul.mubr.bf16.gmra.mrb[4].mxu1 %v2590_v13  ;;  %v2444_v13 = vld [vmem:[#allocation2 + $0x3a] sm:$0xff] }
 0x2dc   : > { %3814 = vmatmul.mubr.bf16.gmra.mrb[0].mxu0 %v7774_v29  ;;  %3668 = vmatprep.mubr.bf16.mxu1 %v7795_v38  ;;  %v7869_v38 = vpack.c.bf16 %v2377_v15, %v2376_v41  ;;  %v3256_v19 = vadd.f32 %v5099_v2, %v7845_v25  ;;  %v2483_v6 = vpack.c.bf16 %v2444_v13, %v2443_v44  ;;  %v5917_v15 = vld [vmem:[#allocation2] sm:$0xff]  ;;  %v5912_v23 = vld [vmem:[%s8271_s5 + $0x18] sm:$0xff]  }
 0x2dd   : > { %v7866_v39 = vadd.f32 %v5205_v8, %v3248_v27  ;;  %3821 = vmatprep.mubr.bf16.mxu0 %v2599_v40  ;;  %5664 = vmatprep.subr.bf16.mxu0 %v5912_v23 }
 0x2de   : > { %v5100_v62 = vpop.f32.mrb[156].mxu1  ;;  %5665 = vmatpush3.bf16.msra.mxu0 %v5912_v23 }
 0x2df   : > { %v5206_v16 = vpop.f32.mrb[152].mxu0  ;;  %v5101_v37 = vpop.f32.mrb[157].mxu1 }
 0x2e0   : > { %v5102_v9 = vadd.f32 %v5101_v37, %v5100_v62  ;;  %v5207_v58 = vpop.f32.mrb[153].mxu0  ;;  %v5103_v31 = vpop.f32.mrb[158].mxu1  ;;  %v2448_v62 = vld [vmem:[#allocation2 + $0x6a] sm:$0xff] }
 0x2e1   : > { %v5208_v36 = vadd.f32 %v5207_v58, %v5206_v16  ;;  %v5209_v33 = vpop.f32.mrb[154].mxu0  ;;  %v5104_v55 = vpop.f32.mrb[159].mxu1 }
 0x2e2   : > { %v5105_v29 = vadd.f32 %v5104_v55, %v5103_v31  ;;  %v5210_v54 = vpop.f32.mrb[155].mxu0  ;;  %v3261_v49 = vadd.f32 %v5102_v9, %v7845_v25  ;;  %v2616_v9 = vpack.c.bf16 %v5917_v15, %v5917_v15 }
 0x2e3   : > { %v7872_v35 = vadd.f32 %v5208_v36, %v3253_v26  ;;  %v5211_v51 = vadd.f32 %v5210_v54, %v5209_v33  ;;  %3669 = vmatmul.mubr.bf16.gmra.mrb[8].mxu1 %v2599_v40  ;;  %v2447_v40 = vld [vmem:[#allocation2 + $0x62] sm:$0xff] }
 0x2e4   : > { %3822 = vmatmul.mubr.bf16.gmra.mrb[4].mxu0 %v7782_v12  ;;  %3676 = vmatprep.mubr.bf16.mxu1 %v7869_v38  ;;  %v3264_v57 = vadd.f32 %v5105_v29, %v7845_v25  ;;  %v2501_v33 = vpack.c.bf16 %v2448_v62, %v2447_v40  ;;  %v2455_v40 = vld [vmem:[#allocation2 + $0xc2] sm:$0xff]  ;;  %v2456_v62 = vld [vmem:[#allocation2 + $0xca] sm:$0xff] }
 0x2e5   : > { %v7879_v34 = vadd.f32 %v5211_v51, %v3256_v19  ;;  %3829 = vmatprep.mubr.bf16.mxu0 %v2608_v32 }
 0x2e6   : > { %v5106_v47 = vpop.f32.mrb[160].mxu1 }
 0x2e7   : > { %v5212_v1 = vpop.f32.mrb[156].mxu0  ;;  %v5107_v63 = vpop.f32.mrb[161].mxu1 }
 0x2e8   : > { %v5108_v14 = vadd.f32 %v5107_v63, %v5106_v47  ;;  %v5213_v12 = vpop.f32.mrb[157].mxu0  ;;  %v5109_v4 = vpop.f32.mrb[162].mxu1 }
 0x2e9   : > { %v5214_v45 = vadd.f32 %v5213_v12, %v5212_v1  ;;  %v5215_v53 = vpop.f32.mrb[158].mxu0  ;;  %v5110_v18 = vpop.f32.mrb[163].mxu1  ;;  %v2452_v1 = vld [vmem:[#allocation2 + $0x9a] sm:$0xff] }
 0x2ea   : > { %v5111_v46 = vadd.f32 %v5110_v18, %v5109_v4  ;;  %v5216_v56 = vpop.f32.mrb[159].mxu0  ;;  %v3269_v58 = vadd.f32 %v5108_v14, %v7845_v25  ;;  %v2519_v18 = vpack.c.bf16 %v2452_v1, %v2451_v17  ;;  %v2459_v1 = vld [vmem:[#allocation2 + $0xf2] sm:$0xff] }
 0x2eb   : > { %v7883_v7 = vadd.f32 %v5214_v45, %v3261_v49  ;;  %v5217_v2 = vadd.f32 %v5216_v56, %v5215_v53  ;;  %3677 = vmatmul.mubr.bf16.gmra.mrb[12].mxu1 %v2608_v32  ;;  %v2449_v32 = vld [vmem:[#allocation2 + $0x7a] sm:$0xff] }
 0x2ec   : > { %3830 = vmatmul.mubr.bf16.gmra.mrb[8].mxu0 %v7790_v0  ;;  %5626 = vmatprep.mubr.bf16.mxu1 %v2483_v6  ;;  %v3272_v55 = vadd.f32 %v5111_v46, %v7845_v25  ;;  %v2510_v49 = vpack.c.bf16 %v2450_v5, %v2449_v32  ;;  %v2457_v5 = vld [vmem:[#allocation2 + $0xda] sm:$0xff] }
 0x2ed   : > { %v7886_v42 = vadd.f32 %v5217_v2, %v3264_v57  ;;  %3837 = vmatprep.mubr.bf16.mxu0 %v2617_v43  ;;  %v2453_v2 = vld [vmem:[#allocation2 + $0xaa] sm:$0xff] }
 0x2ee   : > { %v5112_v30 = vpop.f32.mrb[164].mxu1 }
 0x2ef   : > { %v5218_v27 = vpop.f32.mrb[160].mxu0  ;;  %v5113_v8 = vpop.f32.mrb[165].mxu1 }
 0x2f0   : > { %v5114_v16 = vadd.f32 %v5113_v8, %v5112_v30  ;;  %v5219_v37 = vpop.f32.mrb[161].mxu0  ;;  %v5115_v41 = vpop.f32.mrb[166].mxu1  ;;  %v2454_v30 = vld [vmem:[#allocation2 + $0xb2] sm:$0xff] }
 0x2f1   : > { %v5220_v31 = vadd.f32 %v5219_v37, %v5218_v27  ;;  %v5221_v61 = vpop.f32.mrb[162].mxu0  ;;  %v5116_v26 = vpop.f32.mrb[167].mxu1 }
 0x2f2   : > { %v5117_v0 = vadd.f32 %v5116_v26, %v5115_v41  ;;  %v5222_v36 = vpop.f32.mrb[163].mxu0  ;;  %v3277_v13 = vadd.f32 %v5114_v16, %v7845_v25 }
 0x2f3   : > { %v7890_v29 = vadd.f32 %v5220_v31, %v3269_v58  ;;  %v5223_v54 = vadd.f32 %v5222_v36, %v5221_v61  ;;  %5627 = vmatmul.mubr.bf16.vlgmr.msra.gmra.mrb[16].mxu1 %v7667_v3  ;;  %v2528_v61 = vpack.c.bf16 %v2454_v30, %v2453_v2  ;;  %v2537_v36 = vpack.c.bf16 %v2456_v62, %v2455_v40  ;;  %v2462_v40 = vld [vmem:[#allocation2 + $0x112] sm:$0xff] }
 0x2f4   : > { %3838 = vmatmul.mubr.bf16.gmra.mrb[12].mxu0 %v2616_v9  ;;  %5630 = vmatprep.mubr.bf16.mxu1 %v2501_v33  ;;  %v3280_v43 = vadd.f32 %v5117_v0, %v7845_v25 }
 0x2f5   : > { %v7896_v19 = vadd.f32 %v5223_v54, %v3272_v55 }
 0x2f6   : > { %v5118_v51 = vpop.f32.mrb[168].mxu1 }
 0x2f7   : > { %v5224_v47 = vpop.f32.mrb[164].mxu0  ;;  %v5119_v50 = vpop.f32.mrb[169].mxu1 }
 0x2f8   : > { %v5120_v63 = vadd.f32 %v5119_v50, %v5118_v51  ;;  %v5225_v44 = vpop.f32.mrb[165].mxu0  ;;  %v5121_v3 = vpop.f32.mrb[170].mxu1 }
 0x2f9   : > { %v5226_v14 = vadd.f32 %v5225_v44, %v5224_v47  ;;  %v5227_v12 = vpop.f32.mrb[166].mxu0  ;;  %v5122_v4 = vpop.f32.mrb[171].mxu1  ;;  %v2458_v47 = vld [vmem:[#allocation2 + $0xe2] sm:$0xff] }
 0x2fa   : > { %v5123_v45 = vadd.f32 %v5122_v4, %v5121_v3  ;;  %v5228_v53 = vpop.f32.mrb[167].mxu0  ;;  %v3285_v15 = vadd.f32 %v5120_v63, %v7845_v25  ;;  %v2460_v63 = vld [vmem:[#allocation2 + $0xfa] sm:$0xff] }
 0x2fb   : > { %v7900_v46 = vadd.f32 %v5226_v14, %v3277_v13  ;;  %v5229_v56 = vadd.f32 %v5228_v53, %v5227_v12  ;;  %5631 = vmatmul.mubr.bf16.gmra.mrb[20].mxu1 %v2510_v49 }
 0x2fc   : > { %5634 = vmatprep.mubr.bf16.mxu1 %v2519_v18  ;;  %v3288_v33 = vadd.f32 %v5123_v45, %v7845_v25  ;;  %v2546_v45 = vpack.c.bf16 %v2458_v47, %v2457_v5 }
 0x2fd   : > { %v7902_v6 = vadd.f32 %v5229_v56, %v3280_v43  ;;  %v2555_v43 = vpack.c.bf16 %v2460_v63, %v2459_v1  ;;  %v2465_v63 = vld [vmem:[#allocation2 + $0x13a] sm:$0xff] }
 0x2fe   : > { %v5124_v57 = vpop.f32.mrb[172].mxu1 }
 0x2ff   : > { %v5230_v27 = vpop.f32.mrb[168].mxu0  ;;  %v5125_v8 = vpop.f32.mrb[173].mxu1 }
 0x300   : > { %v5126_v16 = vadd.f32 %v5125_v8, %v5124_v57  ;;  %v5231_v37 = vpop.f32.mrb[169].mxu0  ;;  %v5127_v41 = vpop.f32.mrb[174].mxu1  ;;  %v2461_v8 = vld [vmem:[#allocation2 + $0x10a] sm:$0xff] }
 0x301   : > { %v5232_v9 = vadd.f32 %v5231_v37, %v5230_v27  ;;  %v5233_v58 = vpop.f32.mrb[170].mxu0  ;;  %v5128_v31 = vpop.f32.mrb[175].mxu1  ;;  %v2463_v37 = vld [vmem:[#allocation2 + $0x122] sm:$0xff] }
 0x302   : > { %v5129_v26 = vadd.f32 %v5128_v31, %v5127_v41  ;;  %v5234_v0 = vpop.f32.mrb[171].mxu0  ;;  %v3293_v14 = vadd.f32 %v5126_v16, %v7845_v25  ;;  %v2464_v41 = vld [vmem:[#allocation2 + $0x12a] sm:$0xff] }
 0x303   : > { %v7906_v55 = vadd.f32 %v5232_v9, %v3285_v15  ;;  %v5235_v54 = vadd.f32 %v5234_v0, %v5233_v58  ;;  %5635 = vmatmul.mubr.bf16.gmra.mrb[24].mxu1 %v2528_v61  ;;  %v2573_v23 = vpack.c.bf16 %v2464_v41, %v2463_v37 }
 0x304   : > { %5638 = vmatprep.mubr.bf16.mxu1 %v2537_v36  ;;  %v3296_v56 = vadd.f32 %v5129_v26, %v7845_v25  ;;  %v2564_v36 = vpack.c.bf16 %v2462_v40, %v2461_v8 }
 0x305   : > { %v7911_v51 = vadd.f32 %v5235_v54, %v3288_v33 }
 0x306   : > { %v5130_v32 = vpop.f32.mrb[176].mxu1 }
 0x307   : > { %v5236_v50 = vpop.f32.mrb[172].mxu0  ;;  %v5131_v17 = vpop.f32.mrb[177].mxu1 }
 0x308   : > { %v5132_v44 = vadd.f32 %v5131_v17, %v5130_v32  ;;  %v5237_v3 = vpop.f32.mrb[173].mxu0  ;;  %v5133_v13 = vpop.f32.mrb[178].mxu1 }
 0x309   : > { %v5238_v12 = vadd.f32 %v5237_v3, %v5236_v50  ;;  %v5239_v4 = vpop.f32.mrb[174].mxu0  ;;  %v5134_v49 = vpop.f32.mrb[179].mxu1  ;;  %v5913_v50 = vld [vmem:[%s8271_s5 + $0x20] sm:$0xff]  }
 0x30a   : > { %v5135_v53 = vadd.f32 %v5134_v49, %v5133_v13  ;;  %v5240_v18 = vpop.f32.mrb[175].mxu0  ;;  %v3301_v31 = vadd.f32 %v5132_v44, %v7845_v25  ;;  %v2466_v44 = vld [vmem:[#allocation2 + $0x142] sm:$0xff]  ;;  %5666 = vmatprep.subr.bf16.mxu0 %v5913_v50 }
 0x30b   : > { %v7915_v57 = vadd.f32 %v5238_v12, %v3293_v14  ;;  %v5241_v2 = vadd.f32 %v5240_v18, %v5239_v4  ;;  %5639 = vmatmul.mubr.bf16.gmra.mrb[28].mxu1 %v2546_v45  ;;  %v2467_v14 = vld [vmem:[#allocation2 + $0x152] sm:$0xff]  ;;  %v2468_v12 = vld [vmem:[#allocation2 + $0x15a] sm:$0xff]  ;;  %5667 = vmatpush3.bf16.msra.mxu0 %v5913_v50 }
 0x30c   : > { %5642 = vmatprep.mubr.bf16.mxu1 %v2555_v43  ;;  %v3304_v32 = vadd.f32 %v5135_v53, %v7845_v25  ;;  %v2591_v40 = vpack.c.bf16 %v2468_v12, %v2467_v14  ;;  %v2474_v14 = vld [vmem:[#allocation2 + $0x1a2] sm:$0xff] }
 0x30d   : > { %v7917_v30 = vadd.f32 %v5241_v2, %v3296_v56  ;;  %v2582_v2 = vpack.c.bf16 %v2466_v44, %v2465_v63  ;;  %v5914_v12 = vld [vmem:[%s8271_s5 + $0x28] sm:$0xff]  }
 0x30e   : > { %v5136_v27 = vpop.f32.mrb[180].mxu1  ;;  %5668 = vmatprep.subr.bf16.mxu0 %v5914_v12 }
 0x30f   : > { %v5242_v62 = vpop.f32.mrb[176].mxu0  ;;  %v5137_v16 = vpop.f32.mrb[181].mxu1  ;;  %5669 = vmatpush3.bf16.msra.mxu0 %v5914_v12  ;;  %v5915_v12 = vld [vmem:[%s8271_s5 + $0x30] sm:$0xff]  }
 0x310   : > { %v5138_v15 = vadd.f32 %v5137_v16, %v5136_v27  ;;  %v5243_v9 = vpop.f32.mrb[177].mxu0  ;;  %v5139_v58 = vpop.f32.mrb[182].mxu1  ;;  %5670 = vmatprep.subr.bf16.mxu0 %v5915_v12 }
 0x311   : > { %v5244_v61 = vadd.f32 %v5243_v9, %v5242_v62  ;;  %v5245_v26 = vpop.f32.mrb[178].mxu0  ;;  %v5140_v0 = vpop.f32.mrb[183].mxu1 }
 0x312   : > { %v5141_v33 = vadd.f32 %v5140_v0, %v5139_v58  ;;  %v5246_v54 = vpop.f32.mrb[179].mxu0  ;;  %v3309_v53 = vadd.f32 %v5138_v15, %v7845_v25  ;;  %v2469_v58 = vld [vmem:[#allocation2 + $0x16a] sm:$0xff] }
 0x313   : > { %v7921_v5 = vadd.f32 %v5244_v61, %v3301_v31  ;;  %v5247_v47 = vadd.f32 %v5246_v54, %v5245_v26  ;;  %5643 = vmatmul.mubr.bf16.gmra.mrb[32].mxu1 %v2564_v36  ;;  %v2470_v31 = vld [vmem:[#allocation2 + $0x172] sm:$0xff]  ;;  %5671 = vmatpush3.bf16.msra.mxu0 %v5915_v12 }
 0x314   : > { %5646 = vmatprep.mubr.bf16.mxu1 %v2573_v23  ;;  %v3312_v62 = vadd.f32 %v5141_v33, %v7845_v25 }
 0x315   : > { %v7926_v17 = vadd.f32 %v5247_v47, %v3304_v32  ;;  %v2600_v47 = vpack.c.bf16 %v2470_v31, %v2469_v58 }
 0x316   : > { %v5142_v1 = vpop.f32.mrb[184].mxu1 }
 0x317   : > { %v5248_v3 = vpop.f32.mrb[180].mxu0  ;;  %v5143_v13 = vpop.f32.mrb[185].mxu1 }
 0x318   : > { %v5144_v4 = vadd.f32 %v5143_v13, %v5142_v1  ;;  %v5249_v49 = vpop.f32.mrb[181].mxu0  ;;  %v5145_v45 = vpop.f32.mrb[186].mxu1  ;;  %v2473_v13 = vld [vmem:[#allocation2 + $0x19a] sm:$0xff] }
 0x319   : > { %v5250_v18 = vadd.f32 %v5249_v49, %v5248_v3  ;;  %v5251_v43 = vpop.f32.mrb[182].mxu0  ;;  %v5146_v56 = vpop.f32.mrb[187].mxu1 }
 0x31a   : > { %v5147_v27 = vadd.f32 %v5146_v56, %v5145_v45  ;;  %v5252_v8 = vpop.f32.mrb[183].mxu0  ;;  %v3317_v54 = vadd.f32 %v5144_v4, %v7845_v25 }
 0x31b   : > { %v7930_v16 = vadd.f32 %v5250_v18, %v3309_v53  ;;  %v5253_v37 = vadd.f32 %v5252_v8, %v5251_v43  ;;  %5647 = vmatmul.mubr.bf16.gmra.mrb[36].mxu1 %v2582_v2  ;;  %v2618_v18 = vpack.c.bf16 %v2474_v14, %v2473_v13 }
 0x31c   : > { %5650 = vmatprep.mubr.bf16.mxu1 %v2591_v40  ;;  %v3320_v63 = vadd.f32 %v5147_v27, %v7845_v25 }
 0x31d   : > { %v7932_v41 = vadd.f32 %v5253_v37, %v3312_v62 }
 0x31e   : > { %v5148_v9 = vpop.f32.mrb[188].mxu1 }
 0x31f   : > { %v5254_v15 = vpop.f32.mrb[184].mxu0  ;;  %v5149_v61 = vpop.f32.mrb[189].mxu1 }
 0x320   : > { %v5150_v26 = vadd.f32 %v5149_v61, %v5148_v9  ;;  %v5255_v0 = vpop.f32.mrb[185].mxu0  ;;  %v5151_v36 = vpop.f32.mrb[190].mxu1 }
 0x321   : > { %v5256_v23 = vadd.f32 %v5255_v0, %v5254_v15  ;;  %v5257_v32 = vpop.f32.mrb[186].mxu0  ;;  %v5152_v33 = vpop.f32.mrb[191].mxu1 }
 0x322   : > { %v5153_v50 = vadd.f32 %v5152_v33, %v5151_v36  ;;  %v5258_v1 = vpop.f32.mrb[187].mxu0  ;;  %v3325_v27 = vadd.f32 %v5150_v26, %v7845_v25 }
 0x323   : > { %v7936_v44 = vadd.f32 %v5256_v23, %v3317_v54  ;;  %v5259_v3 = vadd.f32 %v5258_v1, %v5257_v32  ;;  %5651 = vmatmul.mubr.bf16.gmra.mrb[40].mxu1 %v2600_v47 }
 0x324   : > { %5654 = vmatprep.mubr.bf16.mxu1 %v7869_v38  ;;  %v3328_v9 = vadd.f32 %v5153_v50, %v7845_v25 }
 0x325   : > { %v7942_v4 = vadd.f32 %v5259_v3, %v3320_v63 }
 0x326   : > { %v5154_v49 = vpop.f32.mrb[192].mxu1 }
 0x327   : > { %v5260_v45 = vpop.f32.mrb[188].mxu0  ;;  %v5155_v53 = vpop.f32.mrb[193].mxu1 }
 0x328   : > { %v5156_v43 = vadd.f32 %v5155_v53, %v5154_v49  ;;  %v5261_v56 = vpop.f32.mrb[189].mxu0  ;;  %v5157_v2 = vpop.f32.mrb[194].mxu1 }
 0x329   : > { %v5262_v38 = vadd.f32 %v5261_v56, %v5260_v45  ;;  %v5263_v8 = vpop.f32.mrb[190].mxu0  ;;  %v5158_v40 = vpop.f32.mrb[195].mxu1 }
 0x32a   : > { %v5159_v62 = vadd.f32 %v5158_v40, %v5157_v2  ;;  %v5264_v37 = vpop.f32.mrb[191].mxu0  ;;  %v3333_v26 = vadd.f32 %v5156_v43, %v7845_v25 }
 0x32b   : > { %v7946_v58 = vadd.f32 %v5262_v38, %v3325_v27  ;;  %v5265_v31 = vadd.f32 %v5264_v37, %v5263_v8  ;;  %5655 = vmatmul.mubr.bf16.gmra.mrb[44].mxu1 %v2618_v18 }
 0x32c   : > { %v3336_v50 = vadd.f32 %v5159_v62, %v7845_v25 }
 0x32d   : > { %v7948_v15 = vadd.f32 %v5265_v31, %v3328_v9 }
 0x32e   : > { %v5160_v61 = vpop.f32.mrb[196].mxu1 }
 0x32f   : > { %v5266_v0 = vpop.f32.mrb[192].mxu0  ;;  %v5161_v36 = vpop.f32.mrb[197].mxu1 }
 0x330   : > { %v5162_v54 = vadd.f32 %v5161_v36, %v5160_v61  ;;  %v5267_v23 = vpop.f32.mrb[193].mxu0  ;;  %v5163_v32 = vpop.f32.mrb[198].mxu1 }
 0x331   : > { %v5268_v33 = vadd.f32 %v5267_v23, %v5266_v0  ;;  %v5269_v47 = vpop.f32.mrb[194].mxu0  ;;  %v5164_v1 = vpop.f32.mrb[199].mxu1 }
 0x332   : > { %v5165_v63 = vadd.f32 %v5164_v1, %v5163_v32  ;;  %v5270_v3 = vpop.f32.mrb[195].mxu0  ;;  %v3341_v27 = vadd.f32 %v5162_v54, %v7845_v25 }
 0x333   : > { %v7952_v13 = vadd.f32 %v5268_v33, %v3333_v26  ;;  %v5271_v14 = vadd.f32 %v5270_v3, %v5269_v47 }
 0x334   : > { %v3344_v9 = vadd.f32 %v5165_v63, %v7845_v25 }
 0x335   : > { %v7957_v49 = vadd.f32 %v5271_v14, %v3336_v50 }
 0x336   : > { %v5166_v45 = vpop.f32.mrb[200].mxu1 }
 0x337   : > { %v5272_v53 = vpop.f32.mrb[196].mxu0  ;;  %v5167_v18 = vpop.f32.mrb[201].mxu1 }
 0x338   : > { %v5168_v43 = vadd.f32 %v5167_v18, %v5166_v45  ;;  %v5273_v56 = vpop.f32.mrb[197].mxu0  ;;  %v5169_v2 = vpop.f32.mrb[202].mxu1  ;;  %v5916_v18 = vld [vmem:[%s8271_s5 + $0x38] sm:$0xff]  }
 0x339   : > { %v5274_v38 = vadd.f32 %v5273_v56, %v5272_v53  ;;  %v5275_v8 = vpop.f32.mrb[198].mxu0  ;;  %v5170_v40 = vpop.f32.mrb[203].mxu1  ;;  %5672 = vmatprep.subr.bf16.mxu0 %v5916_v18 }
 0x33a   : > { %v5171_v62 = vadd.f32 %v5170_v40, %v5169_v2  ;;  %v5276_v37 = vpop.f32.mrb[199].mxu0  ;;  %v3349_v54 = vadd.f32 %v5168_v43, %v7845_v25  ;;  %5673 = vmatpush3.bf16.msra.mxu0 %v5916_v18 }
 0x33b   : > { %v7961_v31 = vadd.f32 %v5274_v38, %v3341_v27  ;;  %v5277_v61 = vadd.f32 %v5276_v37, %v5275_v8 }
 0x33c   : > { %v3352_v63 = vadd.f32 %v5171_v62, %v7845_v25 }
 0x33d   : > { %v7963_v0 = vadd.f32 %v5277_v61, %v3344_v9 }
 0x33e   : > { %v5172_v36 = vpop.f32.mrb[204].mxu1 }
 0x33f   : > { %v5278_v23 = vpop.f32.mrb[200].mxu0  ;;  %v5173_v32 = vpop.f32.mrb[205].mxu1 }
 0x340   : > { %v5174_v26 = vadd.f32 %v5173_v32, %v5172_v36  ;;  %v5279_v33 = vpop.f32.mrb[201].mxu0  ;;  %v5175_v47 = vpop.f32.mrb[206].mxu1 }
 0x341   : > { %v5280_v1 = vadd.f32 %v5279_v33, %v5278_v23  ;;  %v5281_v3 = vpop.f32.mrb[202].mxu0  ;;  %v5176_v50 = vpop.f32.mrb[207].mxu1 }
 0x342   : > { %v5177_v14 = vadd.f32 %v5176_v50, %v5175_v47  ;;  %v5282_v12 = vpop.f32.mrb[203].mxu0  ;;  %v3357_v37 = vadd.f32 %v5174_v26, %v7845_v25 }
 0x343   : > { %v7967_v45 = vadd.f32 %v5280_v1, %v3349_v54  ;;  %v5283_v53 = vadd.f32 %v5282_v12, %v5281_v3 }
 0x344   : > { %v3360_v33 = vadd.f32 %v5177_v14, %v7845_v25 }
 0x345   : > { %v7972_v56 = vadd.f32 %v5283_v53, %v3352_v63 }
 0x346   : > { %v5306_v2 = vpop.f32.mrb[208].mxu1 }
 0x347   : > { %v5284_v27 = vpop.f32.mrb[204].mxu0  ;;  %v5307_v43 = vpop.f32.mrb[209].mxu1 }
 0x348   : > { %v5285_v38 = vpop.f32.mrb[205].mxu0  ;;  %v5308_v8 = vadd.f32 %v5307_v43, %v5306_v2  ;;  %v5309_v40 = vpop.f32.mrb[210].mxu1 }
 0x349   : > { %v5286_v62 = vadd.f32 %v5285_v38, %v5284_v27  ;;  %v5287_v9 = vpop.f32.mrb[206].mxu0  ;;  %v5310_v61 = vpop.f32.mrb[211].mxu1 }
 0x34a   : > { %v3559_v36 = vadd.f32 %v5308_v8, %v7851_v22  ;;  %v5288_v23 = vpop.f32.mrb[207].mxu0  ;;  %v5311_v32 = vadd.f32 %v5310_v61, %v5309_v40 }
 0x34b   : > { %v7977_v47 = vadd.f32 %v5286_v62, %v3357_v37  ;;  %v5289_v54 = vadd.f32 %v5288_v23, %v5287_v9 }
 0x34c   : > { %v3562_v1 = vadd.f32 %v5311_v32, %v7858_v48 }
 0x34d   : > { %v7980_v3 = vadd.f32 %v5289_v54, %v3360_v33 }
 0x34e   : > { %v5312_v50 = vpop.f32.mrb[212].mxu1 }
 0x34f   : > { %v5418_v12 = vpop.f32.mrb[208].mxu0  ;;  %v5313_v63 = vpop.f32.mrb[213].mxu1 }
 0x350   : > { %v5314_v26 = vadd.f32 %v5313_v63, %v5312_v50  ;;  %v5419_v53 = vpop.f32.mrb[209].mxu0  ;;  %v5315_v18 = vpop.f32.mrb[214].mxu1 }
 0x351   : > { %v5420_v2 = vadd.f32 %v5419_v53, %v5418_v12  ;;  %v5421_v27 = vpop.f32.mrb[210].mxu0  ;;  %v5316_v22 = vpop.f32.mrb[215].mxu1 }
 0x352   : > { %v3567_v43 = vadd.f32 %v5314_v26, %v7862_v11  ;;  %v5317_v38 = vadd.f32 %v5316_v22, %v5315_v18  ;;  %v5422_v25 = vpop.f32.mrb[211].mxu0 }
 0x353   : > { %v5423_v14 = vadd.f32 %v5422_v25, %v5421_v27  ;;  %v7983_v8 = vadd.f32 %v5420_v2, %v3559_v36 }
 0x354   : > { %v3570_v48 = vadd.f32 %v5317_v38, %v7866_v39 }
 0x355   : > { %v7986_v40 = vadd.f32 %v5423_v14, %v3562_v1 }
 0x356   : > { %v5318_v37 = vpop.f32.mrb[216].mxu1 }
 0x357   : > { %v5424_v62 = vpop.f32.mrb[212].mxu0  ;;  %v5319_v9 = vpop.f32.mrb[217].mxu1 }
 0x358   : > { %v5320_v61 = vadd.f32 %v5319_v9, %v5318_v37  ;;  %v5425_v23 = vpop.f32.mrb[213].mxu0  ;;  %v5321_v32 = vpop.f32.mrb[218].mxu1 }
 0x359   : > { %v5426_v33 = vadd.f32 %v5425_v23, %v5424_v62  ;;  %v5427_v54 = vpop.f32.mrb[214].mxu0  ;;  %v5322_v50 = vpop.f32.mrb[219].mxu1 }
 0x35a   : > { %v3575_v11 = vadd.f32 %v5320_v61, %v7872_v35  ;;  %v5323_v12 = vadd.f32 %v5322_v50, %v5321_v32  ;;  %v5428_v63 = vpop.f32.mrb[215].mxu0 }
 0x35b   : > { %v5429_v26 = vadd.f32 %v5428_v63, %v5427_v54  ;;  %v7989_v36 = vadd.f32 %v5426_v33, %v3567_v43 }
 0x35c   : > { %v3578_v39 = vadd.f32 %v5323_v12, %v7879_v34 }
 0x35d   : > { %v7992_v1 = vadd.f32 %v5429_v26, %v3570_v48 }
 0x35e   : > { %v5324_v53 = vpop.f32.mrb[220].mxu1 }
 0x35f   : > { %v5430_v18 = vpop.f32.mrb[216].mxu0  ;;  %v5325_v2 = vpop.f32.mrb[221].mxu1 }
 0x360   : > { %v5326_v27 = vadd.f32 %v5325_v2, %v5324_v53  ;;  %v5431_v22 = vpop.f32.mrb[217].mxu0  ;;  %v5327_v38 = vpop.f32.mrb[222].mxu1 }
 0x361   : > { %v5432_v25 = vadd.f32 %v5431_v22, %v5430_v18  ;;  %v5433_v14 = vpop.f32.mrb[218].mxu0  ;;  %v5328_v37 = vpop.f32.mrb[223].mxu1 }
 0x362   : > { %v3583_v35 = vadd.f32 %v5326_v27, %v7883_v7  ;;  %v5329_v62 = vadd.f32 %v5328_v37, %v5327_v38  ;;  %v5434_v9 = vpop.f32.mrb[219].mxu0 }
 0x363   : > { %v5435_v61 = vadd.f32 %v5434_v9, %v5433_v14  ;;  %v7995_v43 = vadd.f32 %v5432_v25, %v3575_v11 }
 0x364   : > { %v3586_v34 = vadd.f32 %v5329_v62, %v7886_v42 }
 0x365   : > { %v7998_v48 = vadd.f32 %v5435_v61, %v3578_v39 }
 0x366   : > { %v5330_v23 = vpop.f32.mrb[224].mxu1 }
 0x367   : > { %v5436_v32 = vpop.f32.mrb[220].mxu0  ;;  %v5331_v33 = vpop.f32.mrb[225].mxu1 }
 0x368   : > { %v5332_v54 = vadd.f32 %v5331_v33, %v5330_v23  ;;  %v5437_v50 = vpop.f32.mrb[221].mxu0  ;;  %v5333_v12 = vpop.f32.mrb[226].mxu1 }
 0x369   : > { %v5438_v63 = vadd.f32 %v5437_v50, %v5436_v32  ;;  %v5439_v26 = vpop.f32.mrb[222].mxu0  ;;  %v5334_v53 = vpop.f32.mrb[227].mxu1 }
 0x36a   : > { %v3591_v7 = vadd.f32 %v5332_v54, %v7890_v29  ;;  %v5335_v18 = vadd.f32 %v5334_v53, %v5333_v12  ;;  %v5440_v2 = vpop.f32.mrb[223].mxu0 }
 0x36b   : > { %v5441_v27 = vadd.f32 %v5440_v2, %v5439_v26  ;;  %v8001_v11 = vadd.f32 %v5438_v63, %v3583_v35 }
 0x36c   : > { %v3594_v42 = vadd.f32 %v5335_v18, %v7896_v19 }
 0x36d   : > { %v8004_v39 = vadd.f32 %v5441_v27, %v3586_v34 }
 0x36e   : > { %v5336_v22 = vpop.f32.mrb[228].mxu1 }
 0x36f   : > { %v5442_v38 = vpop.f32.mrb[224].mxu0  ;;  %v5337_v25 = vpop.f32.mrb[229].mxu1 }
 0x370   : > { %v5338_v14 = vadd.f32 %v5337_v25, %v5336_v22  ;;  %v5443_v37 = vpop.f32.mrb[225].mxu0  ;;  %v5339_v62 = vpop.f32.mrb[230].mxu1 }
 0x371   : > { %v5444_v9 = vadd.f32 %v5443_v37, %v5442_v38  ;;  %v5445_v61 = vpop.f32.mrb[226].mxu0  ;;  %v5340_v23 = vpop.f32.mrb[231].mxu1 }
 0x372   : > { %v3599_v29 = vadd.f32 %v5338_v14, %v7900_v46  ;;  %v5341_v32 = vadd.f32 %v5340_v23, %v5339_v62  ;;  %v5446_v33 = vpop.f32.mrb[227].mxu0 }
 0x373   : > { %v5447_v54 = vadd.f32 %v5446_v33, %v5445_v61  ;;  %v8007_v35 = vadd.f32 %v5444_v9, %v3591_v7 }
 0x374   : > { %v3602_v19 = vadd.f32 %v5341_v32, %v7902_v6 }
 0x375   : > { %v8010_v34 = vadd.f32 %v5447_v54, %v3594_v42 }
 0x376   : > { %v5342_v50 = vpop.f32.mrb[232].mxu1 }
 0x377   : > { %v5448_v12 = vpop.f32.mrb[228].mxu0  ;;  %v5343_v63 = vpop.f32.mrb[233].mxu1 }
 0x378   : > { %v5344_v26 = vadd.f32 %v5343_v63, %v5342_v50  ;;  %v5449_v53 = vpop.f32.mrb[229].mxu0  ;;  %v5345_v18 = vpop.f32.mrb[234].mxu1 }
 0x379   : > { %v5450_v2 = vadd.f32 %v5449_v53, %v5448_v12  ;;  %v5451_v27 = vpop.f32.mrb[230].mxu0  ;;  %v5346_v22 = vpop.f32.mrb[235].mxu1 }
 0x37a   : > { %v3607_v46 = vadd.f32 %v5344_v26, %v7906_v55  ;;  %v5347_v38 = vadd.f32 %v5346_v22, %v5345_v18  ;;  %v5452_v25 = vpop.f32.mrb[231].mxu0 }
 0x37b   : > { %v5453_v14 = vadd.f32 %v5452_v25, %v5451_v27  ;;  %v8013_v7 = vadd.f32 %v5450_v2, %v3599_v29 }
 0x37c   : > { %v3610_v6 = vadd.f32 %v5347_v38, %v7911_v51 }
 0x37d   : > { %v8016_v42 = vadd.f32 %v5453_v14, %v3602_v19 }
 0x37e   : > { %v5348_v37 = vpop.f32.mrb[236].mxu1 }
 0x37f   : > { %v5454_v62 = vpop.f32.mrb[232].mxu0  ;;  %v5349_v9 = vpop.f32.mrb[237].mxu1 }
 0x380   : > { %v5350_v61 = vadd.f32 %v5349_v9, %v5348_v37  ;;  %v5455_v23 = vpop.f32.mrb[233].mxu0  ;;  %v5351_v32 = vpop.f32.mrb[238].mxu1 }
 0x381   : > { %v5456_v33 = vadd.f32 %v5455_v23, %v5454_v62  ;;  %v5457_v54 = vpop.f32.mrb[234].mxu0  ;;  %v5352_v50 = vpop.f32.mrb[239].mxu1 }
 0x382   : > { %v3615_v55 = vadd.f32 %v5350_v61, %v7915_v57  ;;  %v5353_v12 = vadd.f32 %v5352_v50, %v5351_v32  ;;  %v5458_v63 = vpop.f32.mrb[235].mxu0 }
 0x383   : > { %v5459_v26 = vadd.f32 %v5458_v63, %v5457_v54  ;;  %v8019_v29 = vadd.f32 %v5456_v33, %v3607_v46 }
 0x384   : > { %v3618_v51 = vadd.f32 %v5353_v12, %v7917_v30 }
 0x385   : > { %v8022_v19 = vadd.f32 %v5459_v26, %v3610_v6 }
 0x386   : > { %v5354_v53 = vpop.f32.mrb[240].mxu1 }
 0x387   : > { %v5460_v18 = vpop.f32.mrb[236].mxu0  ;;  %v5355_v2 = vpop.f32.mrb[241].mxu1 }
 0x388   : > { %v5356_v27 = vadd.f32 %v5355_v2, %v5354_v53  ;;  %v5461_v22 = vpop.f32.mrb[237].mxu0  ;;  %v5357_v38 = vpop.f32.mrb[242].mxu1 }
 0x389   : > { %v5462_v25 = vadd.f32 %v5461_v22, %v5460_v18  ;;  %v5463_v14 = vpop.f32.mrb[238].mxu0  ;;  %v5358_v37 = vpop.f32.mrb[243].mxu1 }
 0x38a   : > { %v3623_v57 = vadd.f32 %v5356_v27, %v7921_v5  ;;  %v5359_v62 = vadd.f32 %v5358_v37, %v5357_v38  ;;  %v5464_v9 = vpop.f32.mrb[239].mxu0 }
 0x38b   : > { %v5465_v61 = vadd.f32 %v5464_v9, %v5463_v14  ;;  %v8025_v46 = vadd.f32 %v5462_v25, %v3615_v55 }
 0x38c   : > { %v3626_v30 = vadd.f32 %v5359_v62, %v7926_v17 }
 0x38d   : > { %v8028_v6 = vadd.f32 %v5465_v61, %v3618_v51 }
 0x38e   : > { %v5360_v23 = vpop.f32.mrb[244].mxu1 }
 0x38f   : > { %v5466_v32 = vpop.f32.mrb[240].mxu0  ;;  %v5361_v33 = vpop.f32.mrb[245].mxu1 }
 0x390   : > { %v5362_v54 = vadd.f32 %v5361_v33, %v5360_v23  ;;  %v5467_v50 = vpop.f32.mrb[241].mxu0  ;;  %v5363_v12 = vpop.f32.mrb[246].mxu1 }
 0x391   : > { %v5468_v63 = vadd.f32 %v5467_v50, %v5466_v32  ;;  %v5469_v26 = vpop.f32.mrb[242].mxu0  ;;  %v5364_v53 = vpop.f32.mrb[247].mxu1 }
 0x392   : > { %v3631_v5 = vadd.f32 %v5362_v54, %v7930_v16  ;;  %v5365_v18 = vadd.f32 %v5364_v53, %v5363_v12  ;;  %v5470_v2 = vpop.f32.mrb[243].mxu0 }
 0x393   : > { %v5471_v27 = vadd.f32 %v5470_v2, %v5469_v26  ;;  %v8031_v55 = vadd.f32 %v5468_v63, %v3623_v57 }
 0x394   : > { %v3634_v17 = vadd.f32 %v5365_v18, %v7932_v41 }
 0x395   : > { %v8034_v51 = vadd.f32 %v5471_v27, %v3626_v30 }
 0x396   : > { %v5366_v22 = vpop.f32.mrb[248].mxu1 }
 0x397   : > { %v5472_v38 = vpop.f32.mrb[244].mxu0  ;;  %v5367_v25 = vpop.f32.mrb[249].mxu1 }
 0x398   : > { %v5368_v14 = vadd.f32 %v5367_v25, %v5366_v22  ;;  %v5473_v37 = vpop.f32.mrb[245].mxu0  ;;  %v5369_v62 = vpop.f32.mrb[250].mxu1 }
 0x399   : > { %v5474_v9 = vadd.f32 %v5473_v37, %v5472_v38  ;;  %v5475_v61 = vpop.f32.mrb[246].mxu0  ;;  %v5370_v23 = vpop.f32.mrb[251].mxu1 }
 0x39a   : > { %v3639_v16 = vadd.f32 %v5368_v14, %v7936_v44  ;;  %v5371_v32 = vadd.f32 %v5370_v23, %v5369_v62  ;;  %v5476_v33 = vpop.f32.mrb[247].mxu0 }
 0x39b   : > { %v5477_v54 = vadd.f32 %v5476_v33, %v5475_v61  ;;  %v8037_v57 = vadd.f32 %v5474_v9, %v3631_v5 }
 0x39c   : > { %v3642_v41 = vadd.f32 %v5371_v32, %v7942_v4 }
 0x39d   : > { %v8040_v30 = vadd.f32 %v5477_v54, %v3634_v17 }
 0x39e   : > { %v5372_v50 = vpop.f32.mrb[252].mxu1 }
 0x39f   : > { %v5478_v12 = vpop.f32.mrb[248].mxu0  ;;  %v5373_v63 = vpop.f32.mrb[253].mxu1 }
 0x3a0   : > { %v5374_v26 = vadd.f32 %v5373_v63, %v5372_v50  ;;  %v5479_v53 = vpop.f32.mrb[249].mxu0  ;;  %v5375_v18 = vpop.f32.mrb[254].mxu1 }
 0x3a1   : > { %v5480_v2 = vadd.f32 %v5479_v53, %v5478_v12  ;;  %v5481_v27 = vpop.f32.mrb[250].mxu0  ;;  %v5376_v22 = vpop.f32.mrb[255].mxu1 }
 0x3a2   : > { %v3647_v44 = vadd.f32 %v5374_v26, %v7946_v58  ;;  %v5377_v38 = vadd.f32 %v5376_v22, %v5375_v18  ;;  %v5482_v25 = vpop.f32.mrb[251].mxu0 }
 0x3a3   : > { %v5483_v14 = vadd.f32 %v5482_v25, %v5481_v27  ;;  %v8043_v5 = vadd.f32 %v5480_v2, %v3639_v16 }
 0x3a4   : > { %v3650_v4 = vadd.f32 %v5377_v38, %v7948_v15 }
 0x3a5   : > { %v8046_v17 = vadd.f32 %v5483_v14, %v3642_v41 }
 0x3a6   : > { %v5378_v37 = vpop.f32.mrb[0].mxu1 }
 0x3a7   : > { %v5484_v62 = vpop.f32.mrb[252].mxu0  ;;  %v5379_v9 = vpop.f32.mrb[1].mxu1 }
 0x3a8   : > { %v5380_v61 = vadd.f32 %v5379_v9, %v5378_v37  ;;  %v5485_v23 = vpop.f32.mrb[253].mxu0  ;;  %v5381_v32 = vpop.f32.mrb[2].mxu1 }
 0x3a9   : > { %v5486_v33 = vadd.f32 %v5485_v23, %v5484_v62  ;;  %v5487_v54 = vpop.f32.mrb[254].mxu0  ;;  %v5382_v50 = vpop.f32.mrb[3].mxu1 }
 0x3aa   : > { %v3655_v58 = vadd.f32 %v5380_v61, %v7952_v13  ;;  %v5383_v12 = vadd.f32 %v5382_v50, %v5381_v32  ;;  %v5488_v63 = vpop.f32.mrb[255].mxu0 }
 0x3ab   : > { %v5489_v26 = vadd.f32 %v5488_v63, %v5487_v54  ;;  %v8049_v16 = vadd.f32 %v5486_v33, %v3647_v44 }
 0x3ac   : > { %v3658_v15 = vadd.f32 %v5383_v12, %v7957_v49 }
 0x3ad   : > { %v8052_v41 = vadd.f32 %v5489_v26, %v3650_v4 }
 0x3ae   : > { %v5384_v53 = vpop.f32.mrb[4].mxu1 }
 0x3af   : > { %v5490_v18 = vpop.f32.mrb[0].mxu0  ;;  %v5385_v2 = vpop.f32.mrb[5].mxu1 }
 0x3b0   : > { %v5386_v27 = vadd.f32 %v5385_v2, %v5384_v53  ;;  %v5491_v22 = vpop.f32.mrb[1].mxu0  ;;  %v5387_v38 = vpop.f32.mrb[6].mxu1 }
 0x3b1   : > { %v5492_v25 = vadd.f32 %v5491_v22, %v5490_v18  ;;  %v5493_v14 = vpop.f32.mrb[2].mxu0  ;;  %v5388_v37 = vpop.f32.mrb[7].mxu1 }
 0x3b2   : > { %v3663_v13 = vadd.f32 %v5386_v27, %v7961_v31  ;;  %v5389_v62 = vadd.f32 %v5388_v37, %v5387_v38  ;;  %v5494_v9 = vpop.f32.mrb[3].mxu0 }
 0x3b3   : > { %v5495_v61 = vadd.f32 %v5494_v9, %v5493_v14  ;;  %v8055_v44 = vadd.f32 %v5492_v25, %v3655_v58 }
 0x3b4   : > { %v3666_v49 = vadd.f32 %v5389_v62, %v7963_v0 }
 0x3b5   : > { %v8058_v4 = vadd.f32 %v5495_v61, %v3658_v15 }
 0x3b6   : > { %v5390_v23 = vpop.f32.mrb[8].mxu1 }
 0x3b7   : > { %v5496_v32 = vpop.f32.mrb[4].mxu0  ;;  %v5391_v33 = vpop.f32.mrb[9].mxu1 }
 0x3b8   : > { %v5392_v54 = vadd.f32 %v5391_v33, %v5390_v23  ;;  %v5497_v50 = vpop.f32.mrb[5].mxu0  ;;  %v5393_v12 = vpop.f32.mrb[10].mxu1 }
 0x3b9   : > { %v5498_v63 = vadd.f32 %v5497_v50, %v5496_v32  ;;  %v5499_v26 = vpop.f32.mrb[6].mxu0  ;;  %v5394_v53 = vpop.f32.mrb[11].mxu1 }
 0x3ba   : > { %v3671_v31 = vadd.f32 %v5392_v54, %v7967_v45  ;;  %v5395_v18 = vadd.f32 %v5394_v53, %v5393_v12  ;;  %v5500_v2 = vpop.f32.mrb[7].mxu0 }
 0x3bb   : > { %v5501_v27 = vadd.f32 %v5500_v2, %v5499_v26  ;;  %v8061_v58 = vadd.f32 %v5498_v63, %v3663_v13 }
 0x3bc   : > { %v3674_v0 = vadd.f32 %v5395_v18, %v7972_v56 }
 0x3bd   : > { %v8064_v15 = vadd.f32 %v5501_v27, %v3666_v49 }
 0x3be   : > { %v5396_v22 = vpop.f32.mrb[12].mxu1 }
 0x3bf   : > { %v5502_v38 = vpop.f32.mrb[8].mxu0  ;;  %v5397_v25 = vpop.f32.mrb[13].mxu1 }
 0x3c0   : > { %v5398_v14 = vadd.f32 %v5397_v25, %v5396_v22  ;;  %v5503_v37 = vpop.f32.mrb[9].mxu0  ;;  %v5399_v62 = vpop.f32.mrb[14].mxu1 }
 0x3c1   : > { %v5504_v9 = vadd.f32 %v5503_v37, %v5502_v38  ;;  %v5505_v61 = vpop.f32.mrb[10].mxu0  ;;  %v5400_v23 = vpop.f32.mrb[15].mxu1 }
 0x3c2   : > { %v3679_v45 = vadd.f32 %v5398_v14, %v7977_v47  ;;  %v5401_v32 = vadd.f32 %v5400_v23, %v5399_v62  ;;  %v5506_v33 = vpop.f32.mrb[11].mxu0 }
 0x3c3   : > { %v5507_v54 = vadd.f32 %v5506_v33, %v5505_v61  ;;  %v8067_v13 = vadd.f32 %v5504_v9, %v3671_v31 }
 0x3c4   : > { %v3682_v56 = vadd.f32 %v5401_v32, %v7980_v3 }
 0x3c5   : > { %v8070_v49 = vadd.f32 %v5507_v54, %v3674_v0 }
 0x3c6   : > { %v5628_v50 = vpop.f32.mrb[16].mxu1 }
 0x3c7   : > { %v5508_v12 = vpop.f32.mrb[12].mxu0  ;;  %v3889_v63 = vadd.f32 %v5628_v50, %v7989_v36  ;;  %v3880_v26 = vpop.f32.mrb[17].mxu1 }
 0x3c8   : > { %v5509_v53 = vpop.f32.mrb[13].mxu0  ;;  %v3881_v18 = vadd.f32 %v3880_v26, %v7983_v8  ;;  %v5629_v2 = vpop.f32.mrb[18].mxu1 }
 0x3c9   : > { %v5510_v27 = vadd.f32 %v5509_v53, %v5508_v12  ;;  %v5511_v47 = vpop.f32.mrb[14].mxu0  ;;  %v3892_v22 = vadd.f32 %v5629_v2, %v7992_v1  ;;  %v3883_v38 = vpop.f32.mrb[19].mxu1  ;;  %v4009_v3 = vmax.f32 %v3889_v63, 0.0 }
 0x3ca   : > { %v5512_v31 = vpop.f32.mrb[15].mxu0  ;;  %v3884_v25 = vadd.f32 %v3883_v38, %v7986_v40  ;;  %v4007_v62 = vmax.f32 %v3881_v18, 0.0 }
 0x3cb   : > { %v4010_v0 = vmax.f32 %v3892_v22, 0.0  ;;  %v5513_v14 = vadd.f32 %v5512_v31, %v5511_v47  ;;  %v8076_v37 = vadd.f32 %v5510_v27, %v3679_v45 }
 0x3cc   : > { %v4008_v36 = vmax.f32 %v3884_v25, 0.0 }
 0x3cd   : > { %v4040_v9 = vpack.c.bf16 %v4010_v0, %v4009_v3  ;;  %v8078_v61 = vadd.f32 %v5513_v14, %v3682_v56 }
 0x3ce   : > { %v4039_v8 = vpack.c.bf16 %v4008_v36, %v4007_v62  ;;  %v5632_v23 = vpop.f32.mrb[20].mxu1 }
 0x3cf   : > { %v3905_v32 = vadd.f32 %v5632_v23, %v8001_v11  ;;  %v3896_v33 = vpop.f32.mrb[21].mxu1 }
 0x3d0   : > { %v3897_v1 = vadd.f32 %v3896_v33, %v7995_v43  ;;  %v5633_v54 = vpop.f32.mrb[22].mxu1  ;;  %5674 = vmatprep.mubr.bf16.mxu0 %v4039_v8 }
 0x3d1   : > { %v3908_v40 = vadd.f32 %v5633_v54, %v8004_v39  ;;  %v3899_v50 = vpop.f32.mrb[23].mxu1  ;;  %5675 = vmatmul.mubr.bf16.vlgmr.msra.gmra.mrb[16].mxu0 %v4040_v9  ;;  %v4013_v12 = vmax.f32 %v3905_v32, 0.0 }
 0x3d2   : > { %v3900_v45 = vadd.f32 %v3899_v50, %v7998_v48  ;;  %v4011_v26 = vmax.f32 %v3897_v1, 0.0 }
 0x3d3   : > { %v4014_v63 = vmax.f32 %v3908_v40, 0.0 }
 0x3d4   : > { %v4012_v56 = vmax.f32 %v3900_v45, 0.0 }
 0x3d5   : > { %v4042_v53 = vpack.c.bf16 %v4014_v63, %v4013_v12 }
 0x3d6   : > { %v4041_v18 = vpack.c.bf16 %v4012_v56, %v4011_v26  ;;  %v5636_v2 = vpop.f32.mrb[24].mxu1 }
 0x3d7   : > { %v3921_v11 = vadd.f32 %v5636_v2, %v8013_v7  ;;  %v3912_v27 = vpop.f32.mrb[25].mxu1 }
 0x3d8   : > { %v3913_v43 = vadd.f32 %v3912_v27, %v8007_v35  ;;  %v5637_v47 = vpop.f32.mrb[26].mxu1  ;;  %5678 = vmatprep.mubr.bf16.mxu0 %v4041_v18 }
 0x3d9   : > { %v3924_v39 = vadd.f32 %v5637_v47, %v8016_v42  ;;  %v3915_v22 = vpop.f32.mrb[27].mxu1  ;;  %5679 = vmatmul.mubr.bf16.gmra.mrb[20].mxu0 %v4042_v53  ;;  %v4017_v38 = vmax.f32 %v3921_v11, 0.0 }
 0x3da   : > { %v3916_v48 = vadd.f32 %v3915_v22, %v8010_v34  ;;  %v4015_v25 = vmax.f32 %v3913_v43, 0.0 }
 0x3db   : > { %v4018_v31 = vmax.f32 %v3924_v39, 0.0 }
 0x3dc   : > { %v4016_v3 = vmax.f32 %v3916_v48, 0.0 }
 0x3dd   : > { %v4044_v0 = vpack.c.bf16 %v4018_v31, %v4017_v38 }
 0x3de   : > { %v4043_v14 = vpack.c.bf16 %v4016_v3, %v4015_v25  ;;  %v5640_v62 = vpop.f32.mrb[28].mxu1 }
 0x3df   : > { %v3937_v7 = vadd.f32 %v5640_v62, %v8025_v46  ;;  %v3928_v36 = vpop.f32.mrb[29].mxu1 }
 0x3e0   : > { %v3929_v35 = vadd.f32 %v3928_v36, %v8019_v29  ;;  %v5641_v9 = vpop.f32.mrb[30].mxu1  ;;  %5682 = vmatprep.mubr.bf16.mxu0 %v4043_v14 }
 0x3e1   : > { %v3940_v42 = vadd.f32 %v5641_v9, %v8028_v6  ;;  %v3931_v8 = vpop.f32.mrb[31].mxu1  ;;  %5683 = vmatmul.mubr.bf16.gmra.mrb[24].mxu0 %v4044_v0  ;;  %v4021_v23 = vmax.f32 %v3937_v7, 0.0 }
 0x3e2   : > { %v3932_v34 = vadd.f32 %v3931_v8, %v8022_v19  ;;  %v4019_v33 = vmax.f32 %v3929_v35, 0.0 }
 0x3e3   : > { %v4022_v32 = vmax.f32 %v3940_v42, 0.0 }
 0x3e4   : > { %v4020_v1 = vmax.f32 %v3932_v34, 0.0 }
 0x3e5   : > { %v4046_v54 = vpack.c.bf16 %v4022_v32, %v4021_v23 }
 0x3e6   : > { %v4045_v40 = vpack.c.bf16 %v4020_v1, %v4019_v33  ;;  %v5644_v50 = vpop.f32.mrb[32].mxu1 }
 0x3e7   : > { %v3953_v46 = vadd.f32 %v5644_v50, %v8037_v57  ;;  %v3944_v45 = vpop.f32.mrb[33].mxu1 }
 0x3e8   : > { %v3945_v29 = vadd.f32 %v3944_v45, %v8031_v55  ;;  %v5645_v12 = vpop.f32.mrb[34].mxu1  ;;  %5686 = vmatprep.mubr.bf16.mxu0 %v4045_v40 }
 0x3e9   : > { %v3956_v6 = vadd.f32 %v5645_v12, %v8040_v30  ;;  %v3947_v63 = vpop.f32.mrb[35].mxu1  ;;  %5687 = vmatmul.mubr.bf16.gmra.mrb[28].mxu0 %v4046_v54  ;;  %v4025_v26 = vmax.f32 %v3953_v46, 0.0 }
 0x3ea   : > { %v3948_v19 = vadd.f32 %v3947_v63, %v8034_v51  ;;  %v4023_v53 = vmax.f32 %v3945_v29, 0.0  ;;  %v8386_v63 = vld [vmem:[#allocation14_spill] sm:$0xff] }
 0x3eb   : > { %v4026_v56 = vmax.f32 %v3956_v6, 0.0 }
 0x3ec   : > { %v4024_v18 = vmax.f32 %v3948_v19, 0.0 }
 0x3ed   : > { %v4048_v2 = vpack.c.bf16 %v4026_v56, %v4025_v26 }
 0x3ee   : > { %v4047_v11 = vpack.c.bf16 %v4024_v18, %v4023_v53  ;;  %v5648_v27 = vpop.f32.mrb[36].mxu1  ;;  %v8387_v53 = vld [vmem:[#allocation9_spill] sm:$0xff] }
 0x3ef   : > { %v3969_v57 = vadd.f32 %v5648_v27, %v8049_v16  ;;  %v3960_v43 = vpop.f32.mrb[37].mxu1 }
 0x3f0   : > { %v3961_v55 = vadd.f32 %v3960_v43, %v8043_v5  ;;  %v5649_v47 = vpop.f32.mrb[38].mxu1  ;;  %5690 = vmatprep.mubr.bf16.mxu0 %v4047_v11  ;;  %v8388_v11 = vld [vmem:[#allocation15_spill] sm:$0xff] }
 0x3f1   : > { %v3972_v30 = vadd.f32 %v5649_v47, %v8052_v41  ;;  %v3963_v39 = vpop.f32.mrb[39].mxu1  ;;  %5691 = vmatmul.mubr.bf16.gmra.mrb[32].mxu0 %v4048_v2  ;;  %v4029_v22 = vmax.f32 %v3969_v57, 0.0  ;;  %v8389_v57 = vld [vmem:[#allocation10_spill] sm:$0xff] }
 0x3f2   : > { %v3964_v51 = vadd.f32 %v3963_v39, %v8046_v17  ;;  %v4027_v38 = vmax.f32 %v3961_v55, 0.0 }
 0x3f3   : > { %v4030_v48 = vmax.f32 %v3972_v30, 0.0 }
 0x3f4   : > { %v4028_v31 = vmax.f32 %v3964_v51, 0.0 }
 0x3f5   : > { %v4050_v25 = vpack.c.bf16 %v4030_v48, %v4029_v22  ;;  %v8390_v22 = vld [vmem:[#allocation26_spill] sm:$0xff] }
 0x3f6   : > { %v4049_v3 = vpack.c.bf16 %v4028_v31, %v4027_v38  ;;  %v5652_v0 = vpop.f32.mrb[40].mxu1 }
 0x3f7   : > { %v3985_v16 = vadd.f32 %v5652_v0, %v8061_v58  ;;  %v3976_v14 = vpop.f32.mrb[41].mxu1 }
 0x3f8   : > { %v3977_v5 = vadd.f32 %v3976_v14, %v8055_v44  ;;  %v5653_v62 = vpop.f32.mrb[42].mxu1  ;;  %5694 = vmatprep.mubr.bf16.mxu0 %v4049_v3 }
 0x3f9   : > { %v3988_v41 = vadd.f32 %v5653_v62, %v8064_v15  ;;  %v3979_v7 = vpop.f32.mrb[43].mxu1  ;;  %5695 = vmatmul.mubr.bf16.gmra.mrb[36].mxu0 %v4050_v25  ;;  %v4033_v36 = vmax.f32 %v3985_v16, 0.0  ;;  %v8391_v25 = vld [vmem:[#allocation19_spill] sm:$0xff] }
 0x3fa   : > { %v3980_v17 = vadd.f32 %v3979_v7, %v8058_v4  ;;  %v4031_v9 = vmax.f32 %v3977_v5, 0.0  ;;  %v8392_v16 = vld [vmem:[#allocation27_spill] sm:$0xff]  ;;  %v8393_v5 = vld [vmem:[#allocation20_spill] sm:$0xff] }
 0x3fb   : > { %v4034_v35 = vmax.f32 %v3988_v41, 0.0 }
 0x3fc   : > { %v4032_v42 = vmax.f32 %v3980_v17, 0.0 }
 0x3fd   : > { %v4052_v8 = vpack.c.bf16 %v4034_v35, %v4033_v36 }
 0x3fe   : > { %v4051_v34 = vpack.c.bf16 %v4032_v42, %v4031_v9  ;;  %v5656_v23 = vpop.f32.mrb[44].mxu1  ;;  %v8394_v9 = vld [vmem:[#allocation32_spill] sm:$0xff] }
 0x3ff   : > { %v4001_v58 = vadd.f32 %v5656_v23, %v8076_v37  ;;  %v3992_v32 = vpop.f32.mrb[45].mxu1  ;;  %v8395_v23 = vld [vmem:[#allocation29_spill] sm:$0xff] }
 0x400   : > { %v3993_v44 = vadd.f32 %v3992_v32, %v8067_v13  ;;  %v5657_v33 = vpop.f32.mrb[46].mxu1  ;;  %5698 = vmatprep.mubr.bf16.mxu0 %v4051_v34  ;;  %v8112_v13 = vld [vmem:[%s8272_s6] ss:$0 sm:$0xff] }
 0x401   : > { %v4004_v15 = vadd.f32 %v5657_v33, %v8078_v61  ;;  %v3995_v1 = vpop.f32.mrb[47].mxu1  ;;  %5699 = vmatmul.mubr.bf16.gmra.mrb[40].mxu0 %v4052_v8  ;;  %v4037_v54 = vmax.f32 %v4001_v58, 0.0 }
 0x402   : > { %v3996_v4 = vadd.f32 %v3995_v1, %v8070_v49  ;;  %v4035_v50 = vmax.f32 %v3993_v44, 0.0  ;;  %v8396_v44 = vld [vmem:[#allocation33_spill] sm:$0xff] }
 0x403   : > { %v4038_v40 = vmax.f32 %v4004_v15, 0.0  ;;  %v8397_v15 = vld [vmem:[#allocation30_spill] sm:$0xff] }
 0x404   : > { %v4036_v46 = vmax.f32 %v3996_v4, 0.0 }
 0x405   : > { %v4054_v45 = vpack.c.bf16 %v4038_v40, %v4037_v54 }
 0x406   : > { %v4053_v29 = vpack.c.bf16 %v4036_v46, %v4035_v50 }
 0x408   : > { %5702 = vmatprep.mubr.bf16.mxu0 %v4053_v29 }
 0x409   : > { %5703 = vmatmul.mubr.bf16.gmra.mrb[44].mxu0 %v4054_v45  ;;  %v8398_v45 = vld [vmem:[#allocation39_spill] sm:$0xff] }
 0x4a4   : > { %v5676_v37 = vpop.f32.mrb[16].mxu0 }
 0x4a5   : > { %v4169_v61 = vadd.f32 %v5676_v37, %v8112_v13  ;;  %v4160_v49 = vpop.f32.mrb[17].mxu0 }
 0x4a6   : > { %v4161_v12 = vadd.f32 %v8112_v13, %v4160_v49  ;;  %v5677_v6 = vpop.f32.mrb[18].mxu0  ;;  %v8399_v49 = vld [vmem:[#allocation35_spill] sm:$0xff] }
 0x4a7   : > { %v4289_v19 = vadd.f32 %v4169_v61, %v8386_v63  ;;  %v4172_v26 = vadd.f32 %v5677_v6, %v8112_v13  ;;  %v4163_v56 = vpop.f32.mrb[19].mxu0  ;;  %v8400_v63 = vld [vmem:[#allocation40_spill] sm:$0xff] }
 0x4a8   : > { %v4287_v18 = vadd.f32 %v4161_v12, %v8387_v53  ;;  %v4164_v2 = vadd.f32 %v8112_v13, %v4163_v56 }
 0x4a9   : > { %4321 = vst [vmem:[%s8122_s18 + $0x10] sm:$0xff] %v4289_v19  ;;  %v4290_v27 = vadd.f32 %v4172_v26, %v8388_v11  ;;  %v8401_v26 = vld [vmem:[#allocation36_spill] sm:$0xff] }
 0x4aa   : > { %4319 = vst [vmem:[%s8122_s18] sm:$0xff] %v4287_v18  ;;  %v4288_v43 = vadd.f32 %v4164_v2, %v8389_v57 }
 0x4ab   : > { %4322 = vst [vmem:[%s8122_s18 + $0x18] sm:$0xff] %v4290_v27 }
 0x4ac   : > { %4320 = vst [vmem:[%s8122_s18 + $0x8] sm:$0xff] %v4288_v43  ;;  %v5680_v55 = vpop.f32.mrb[20].mxu0 }
 0x4ad   : > { %v4185_v47 = vadd.f32 %v5680_v55, %v8112_v13  ;;  %v4176_v30 = vpop.f32.mrb[21].mxu0 }
 0x4ae   : > { %v4177_v39 = vadd.f32 %v8112_v13, %v4176_v30  ;;  %v5681_v51 = vpop.f32.mrb[22].mxu0 }
 0x4af   : > { %v4293_v48 = vadd.f32 %v4185_v47, %v8390_v22  ;;  %v4188_v38 = vadd.f32 %v5681_v51, %v8112_v13  ;;  %v4179_v31 = vpop.f32.mrb[23].mxu0 }
 0x4b0   : > { %v4291_v3 = vadd.f32 %v4177_v39, %v8391_v25  ;;  %v4180_v0 = vadd.f32 %v8112_v13, %v4179_v31  ;;  %v8402_v31 = vld [vmem:[#allocation6_spill] sm:$0xff] }
 0x4b1   : > { %4325 = vst [vmem:[%s8122_s18 + $0x30] sm:$0xff] %v4293_v48  ;;  %v4294_v14 = vadd.f32 %v4188_v38, %v8392_v16  ;;  %v8403_v16 = vld [vmem:[#allocation7_spill] sm:$0xff] }
 0x4b2   : > { %4323 = vst [vmem:[%s8122_s18 + $0x20] sm:$0xff] %v4291_v3  ;;  %v4292_v62 = vadd.f32 %v4180_v0, %v8393_v5 }
 0x4b3   : > { %4326 = vst [vmem:[%s8122_s18 + $0x38] sm:$0xff] %v4294_v14 }
 0x4b4   : > { %4324 = vst [vmem:[%s8122_s18 + $0x28] sm:$0xff] %v4292_v62  ;;  %v5684_v41 = vpop.f32.mrb[24].mxu0 }
 0x4b5   : > { %v4201_v7 = vadd.f32 %v5684_v41, %v8112_v13  ;;  %v4192_v17 = vpop.f32.mrb[25].mxu0 }
 0x4b6   : > { %v4193_v36 = vadd.f32 %v8112_v13, %v4192_v17  ;;  %v5685_v35 = vpop.f32.mrb[26].mxu0 }
 0x4b7   : > { %v4297_v42 = vadd.f32 %v4201_v7, %v8394_v9  ;;  %v4204_v8 = vadd.f32 %v5685_v35, %v8112_v13  ;;  %v4195_v34 = vpop.f32.mrb[27].mxu0 }
 0x4b8   : > { %v4295_v58 = vadd.f32 %v4193_v36, %v8395_v23  ;;  %v4196_v32 = vadd.f32 %v8112_v13, %v4195_v34  ;;  %v8404_v36 = vld [vmem:[#allocation16_spill] sm:$0xff]  ;;  %v8406_v23 = vld [vmem:[#allocation17_spill] sm:$0xff] }
 0x4b9   : > { %4329 = vst [vmem:[%s8122_s18 + $0x50] sm:$0xff] %v4297_v42  ;;  %v4298_v33 = vadd.f32 %v4204_v8, %v8396_v44  ;;  %v8405_v8 = vld [vmem:[#allocation11_spill] sm:$0xff] }
 0x4ba   : > { %4327 = vst [vmem:[%s8122_s18 + $0x40] sm:$0xff] %v4295_v58  ;;  %v4296_v1 = vadd.f32 %v4196_v32, %v8397_v15  ;;  %v8407_v32 = vld [vmem:[#allocation12_spill] sm:$0xff] }
 0x4bb   : > { %4330 = vst [vmem:[%s8122_s18 + $0x58] sm:$0xff] %v4298_v33 }
 0x4bc   : > { %4328 = vst [vmem:[%s8122_s18 + $0x48] sm:$0xff] %v4296_v1  ;;  %v5688_v4 = vpop.f32.mrb[28].mxu0 }
 0x4bd   : > { %v4217_v54 = vadd.f32 %v5688_v4, %v8112_v13  ;;  %v4208_v40 = vpop.f32.mrb[29].mxu0 }
 0x4be   : > { %v4209_v50 = vadd.f32 %v8112_v13, %v4208_v40  ;;  %v5689_v46 = vpop.f32.mrb[30].mxu0 }
 0x4bf   : > { %v4301_v29 = vadd.f32 %v4217_v54, %v8398_v45  ;;  %v4220_v37 = vadd.f32 %v5689_v46, %v8112_v13  ;;  %v4211_v61 = vpop.f32.mrb[31].mxu0  ;;  %v8408_v45 = vld [vmem:[#allocation21_spill] sm:$0xff] }
 0x4c0   : > { %v4299_v12 = vadd.f32 %v4209_v50, %v8399_v49  ;;  %v4212_v6 = vadd.f32 %v8112_v13, %v4211_v61 }
 0x4c1   : > { %4333 = vst [vmem:[%s8122_s18 + $0x70] sm:$0xff] %v4301_v29  ;;  %v4302_v19 = vadd.f32 %v4220_v37, %v8400_v63 }
 0x4c2   : > { %4331 = vst [vmem:[%s8122_s18 + $0x60] sm:$0xff] %v4299_v12  ;;  %v4300_v56 = vadd.f32 %v4212_v6, %v8401_v26 }
 0x4c3   : > { %4334 = vst [vmem:[%s8122_s18 + $0x78] sm:$0xff] %v4302_v19 }
 0x4c4   : > { %4332 = vst [vmem:[%s8122_s18 + $0x68] sm:$0xff] %v4300_v56  ;;  %v5692_v53 = vpop.f32.mrb[32].mxu0 }
 0x4c5   : > { %v4233_v18 = vadd.f32 %v5692_v53, %v8112_v13  ;;  %v4224_v2 = vpop.f32.mrb[33].mxu0 }
 0x4c6   : > { %v4225_v11 = vadd.f32 %v8112_v13, %v4224_v2  ;;  %v5693_v27 = vpop.f32.mrb[34].mxu0 }
 0x4c7   : > { %v4305_v57 = vadd.f32 %v4233_v18, %v6793_v24  ;;  %v4236_v43 = vadd.f32 %v5693_v27, %v8112_v13  ;;  %v4227_v55 = vpop.f32.mrb[35].mxu0 }
 0x4c8   : > { %v4303_v47 = vadd.f32 %v4225_v11, %v6751_v20  ;;  %v4228_v30 = vadd.f32 %v8112_v13, %v4227_v55 }
 0x4c9   : > { %4337 = vst [vmem:[%s8122_s18 + $0x90] sm:$0xff] %v4305_v57  ;;  %v4306_v39 = vadd.f32 %v4236_v43, %v6796_v21 }
 0x4ca   : > { %4335 = vst [vmem:[%s8122_s18 + $0x80] sm:$0xff] %v4303_v47  ;;  %v4304_v51 = vadd.f32 %v4228_v30, %v6754_v10 }
 0x4cb   : > { %4338 = vst [vmem:[%s8122_s18 + $0x98] sm:$0xff] %v4306_v39 }
 0x4cc   : > { %4336 = vst [vmem:[%s8122_s18 + $0x88] sm:$0xff] %v4304_v51  ;;  %v5696_v24 = vpop.f32.mrb[36].mxu0 }
 0x4cd   : > { %v4249_v22 = vadd.f32 %v5696_v24, %v8112_v13  ;;  %v4240_v48 = vpop.f32.mrb[37].mxu0 }
 0x4ce   : > { %v4241_v20 = vadd.f32 %v8112_v13, %v4240_v48  ;;  %v5697_v38 = vpop.f32.mrb[38].mxu0 }
 0x4cf   : > { %v4309_v25 = vadd.f32 %v4249_v22, %v8402_v31  ;;  %v4252_v3 = vadd.f32 %v5697_v38, %v8112_v13  ;;  %v4243_v21 = vpop.f32.mrb[39].mxu0 }
 0x4d0   : > { %v4307_v0 = vadd.f32 %v4241_v20, %v6821_v59  ;;  %v4244_v10 = vadd.f32 %v8112_v13, %v4243_v21 }
 0x4d1   : > { %4341 = vst [vmem:[%s8122_s18 + $0xb0] sm:$0xff] %v4309_v25  ;;  %v4310_v14 = vadd.f32 %v4252_v3, %v8403_v16 }
 0x4d2   : > { %4339 = vst [vmem:[%s8122_s18 + $0xa0] sm:$0xff] %v4307_v0  ;;  %v4308_v5 = vadd.f32 %v4244_v10, %v6824_v52 }
 0x4d3   : > { %4342 = vst [vmem:[%s8122_s18 + $0xb8] sm:$0xff] %v4310_v14 }
 0x4d4   : > { %4340 = vst [vmem:[%s8122_s18 + $0xa8] sm:$0xff] %v4308_v5  ;;  %v5700_v62 = vpop.f32.mrb[40].mxu0 }
 0x4d5   : > { %v4265_v41 = vadd.f32 %v5700_v62, %v8112_v13  ;;  %v4256_v7 = vpop.f32.mrb[41].mxu0 }
 0x4d6   : > { %v4257_v59 = vadd.f32 %v8112_v13, %v4256_v7  ;;  %v5701_v17 = vpop.f32.mrb[42].mxu0 }
 0x4d7   : > { %v4313_v35 = vadd.f32 %v4265_v41, %v8404_v36  ;;  %v4268_v9 = vadd.f32 %v5701_v17, %v8112_v13  ;;  %v4259_v42 = vpop.f32.mrb[43].mxu0 }
 0x4d8   : > { %v4311_v52 = vadd.f32 %v4257_v59, %v8405_v8  ;;  %v4260_v34 = vadd.f32 %v8112_v13, %v4259_v42 }
 0x4d9   : > { %4345 = vst [vmem:[%s8122_s18 + $0xd0] sm:$0xff] %v4313_v35  ;;  %v4314_v58 = vadd.f32 %v4268_v9, %v8406_v23 }
 0x4da   : > { %4343 = vst [vmem:[%s8122_s18 + $0xc0] sm:$0xff] %v4311_v52  ;;  %v4312_v44 = vadd.f32 %v4260_v34, %v8407_v32 }
 0x4db   : > { %4346 = vst [vmem:[%s8122_s18 + $0xd8] sm:$0xff] %v4314_v58 }
 0x4dc   : > { %4344 = vst [vmem:[%s8122_s18 + $0xc8] sm:$0xff] %v4312_v44  ;;  %v5704_v33 = vpop.f32.mrb[44].mxu0 }
 0x4dd   : > { %v4281_v15 = vadd.f32 %v5704_v33, %v8112_v13  ;;  %v4272_v1 = vpop.f32.mrb[45].mxu0 }
 0x4de   : > { %v4273_v4 = vadd.f32 %v8112_v13, %v4272_v1  ;;  %v5705_v54 = vpop.f32.mrb[46].mxu0 }
 0x4df   : > { %v4317_v40 = vadd.f32 %v4281_v15, %v6872_v28  ;;  %v4284_v50 = vadd.f32 %v5705_v54, %v8112_v13  ;;  %v4275_v46 = vpop.f32.mrb[47].mxu0  ;;  %v8409_v28 = vld [vmem:[#allocation22_spill] sm:$0xff] }
 0x4e0   : > { %v4315_v29 = vadd.f32 %v4273_v4, %v8408_v45  ;;  %v4276_v37 = vadd.f32 %v8112_v13, %v4275_v46 }
 0x4e1   : > { %4349 = vst [vmem:[%s8122_s18 + $0xf0] sm:$0xff] %v4317_v40  ;;  %v4318_v61 = vadd.f32 %v4284_v50, %v7004_v60 }
 0x4e2   : > { %4347 = vst [vmem:[%s8122_s18 + $0xe0] sm:$0xff] %v4315_v29  ;;  %v4316_v49 = vadd.f32 %v4276_v37, %v8409_v28 }
 0x4e3   : > { %4350 = vst [vmem:[%s8122_s18 + $0xf8] sm:$0xff] %v4318_v61 }
 0x4e4   : > { %4348 = vst [vmem:[%s8122_s18 + $0xe8] sm:$0xff] %v4316_v49 }
 0x4e5   : > { %5931 = shalt.err (!%p5928_p3)
}
 0x4e6   : > { %s5932_s14 = scalar_lea.hbm %s8215_s23, 4096  ;;  %s5936_s17 = scalar_lea.hbm %s8273_s7, 8192 }
 0x4e7   : > { %p5933_p4 = scmp.ne.s32.totalorder %s8215_s23, %s5932_s14  ;;  %p5937_p9 = scmp.lt.u32.totalorder %s8215_s23, %s8273_s7 }
 0x4e8   : > { %p5938_p10 = scmp.lt.u32.totalorder %s5936_s17, %s5932_s14  ;;  %p5940_p12 = scmp.lt.u32.totalorder %s5932_s14, %s8215_s23 }
 0x4e9   : > { %p5934_p7 = pnand %p5933_p4, %p6065_p5 }
 0x4ea   : > { %p5939_p11 = por %p5938_p10, %p5937_p9 }
 0x4eb   : > { %p5935_p8 = pneg %p5934_p7 }
 0x4ec   : > { %p5941_p13 = por %p5940_p12, %p5939_p11 }
 0x4ee   : > { %p5942_p0 = pnand %p5941_p13, %p5935_p8 }
 0x4f0   : > { %5945 = shalt.err (!%p5942_p0)
}
 0x4f1   : > { %s5985_s22 = smov 128   ;;  %s5986_s29 = smov 8  }
 0x4f2   : > { %5723 = dma.vmem_to_hbm [thread:$0]  (%p6065_p5), %s8217_s20, 4096, %s8215_s23, %s8225_s28, %s5985_s22, %s5985_s22, %s5986_s29  }
 0x4f3 PF: > { %p5729_p1 = scmp.ge.s32.totalorder %s5980_s27, 2  ;;  %s4380_s8 = sand.u32 1, %s5968_s24  }
 0x4f4   : > { %s4381_s9 = scalar_lea.sflag [#allocation4], %s4380_s8 }
 0x4f5   : > { %p5726_p2 = pnand %p5729_p1, %p6069_p6 }
 0x4f7   : > { %5963 = dma.done.wait (!%p5726_p2), %s4381_s9, 4096  }
 0x4f8   : > { %5965 = vsyncadd (!%p5726_p2), %s4381_s9, 4294963200  ;;  %p17_p3 = scmp.ge.s32.totalorder %s6052_s30, 4   ;;  %s8410_s24 = smov %s5972_s25 }
 0x4f9   : > { %s8411_s25 = smov %s5976_s26  ;;  %s8412_s26 = smov %s6063_s10 }
 0x4fa   : > { %s8413_s27 = smov %s6052_s30  ;;  %19 = sbr.rel (!%p17_p3) target bundleno = 3 (0x3), region = 86 }
 0x501   :  { %4386 = vsyncpa [#allocation4], 1 }
 0x502   :  { %4388 = vsyncpa [#allocation4 + $0x1], 1 }

</bundles_post_ra>
